<compile_context>
chip_gen: v6e
topology: v6e:2x2x1
jax: 0.10.0
libtpu: 0.0.40
codegen_flags: <defaults>
</compile_context>

<pallas_src>
import functools
import math

import jax
import jax.numpy as jnp
from jax import lax
from jax.experimental import pallas as pl
from jax.experimental.pallas import tpu as pltpu

LANE = 128  # hidden is zero-padded to this width inside the kernels


# ------------------------------ kernel 1 ------------------------------------
# Audio_encoder: prenet conv + conv blocks (residual, masks) + out_linear
# grid = (BH,), one batch*history element per grid step.

def _audio_encoder_kernel(audio_ref, akeep_ref, pre_w_ref, pre_b_ref,
                          cb_w_ref, cb_b_ref, ow_ref, ob_ref, ah_ref,
                          *, K, n_blocks, L):
    f32, bf16 = jnp.float32, jnp.bfloat16
    pad = (K - 1) // 2
    keep = akeep_ref[...]                                     # (L, 1)

    # per-tap validity masks ('same' zero padding), hoisted once per block
    pos = lax.broadcasted_iota(jnp.int32, (L, 1), 0)
    tapmask = [((pos + (k - pad) >= 0) & (pos + (k - pad) < L)).astype(f32)
               for k in range(K)]

    def conv_relu(x, wk, b):
        # 'same' stride-1 1-D conv = K accumulated MXU matmuls over rolled
        # taps (pltpu.roll -> XLU slot; no im2col scratch, no masked stores).
        acc = None
        for k in range(K):
            shift = (pad - k) % L
            tap = x if shift == 0 else pltpu.roll(x, shift, axis=0)
            if k != pad:
                tap = tap * tapmask[k]
            part = jnp.dot(tap.astype(bf16), wk(k), preferred_element_type=f32)
            acc = part if acc is None else acc + part
        return jnp.maximum(acc + b, 0.0)       # conv + (folded eval BN) + ReLU

    out = conv_relu(audio_ref[...], lambda k: pre_w_ref[k], pre_b_ref[...]) * keep
    residual = out
    for blk in range(n_blocks):
        c0, c1 = 2 * blk, 2 * blk + 1
        h1 = conv_relu(out, lambda k, c=c0: cb_w_ref[c * K + k], cb_b_ref[c0])
        h2 = conv_relu(h1, lambda k, c=c1: cb_w_ref[c * K + k], cb_b_ref[c1])
        out = h2 * keep + residual
        residual = out

    ah = jnp.dot(out.astype(bf16), ow_ref[...],
                 preferred_element_type=f32) + ob_ref[...]
    ah_ref[...] = ah * keep                                   # (L, LANE) dense store


def _whole(a):
    return pl.BlockSpec(a.shape, lambda i, nd=a.ndim: (0,) * nd)


def _audio_encoder_call(p, audio2d, akeep, *, BH, al):
    n_mels = audio2d.shape[1]
    DP = p["ow"].shape[1]
    K = p["pre_w"].shape[0]
    n_blocks = p["cb_b"].shape[0] // 2
    args = (audio2d, akeep, p["pre_w"], p["pre_b"], p["cb_w"], p["cb_b"],
            p["ow"], p["ob"])
    kern = functools.partial(_audio_encoder_kernel, K=K, n_blocks=n_blocks, L=al)
    in_specs = [pl.BlockSpec((al, n_mels), lambda i: (i, 0)),
                pl.BlockSpec((al, 1), lambda i: (i, 0))]
    in_specs += [_whole(a) for a in args[2:]]
    return pl.pallas_call(
        kern,
        grid=(BH,),
        out_shape=jax.ShapeDtypeStruct((BH * al, DP), jnp.float32),
        in_specs=in_specs,
        out_specs=pl.BlockSpec((al, DP), lambda i: (i, 0)),
        compiler_params=pltpu.CompilerParams(
            dimension_semantics=("parallel",),
            vmem_limit_bytes=32 * 1024 * 1024),
    )(*args)


# ------------------------------ kernel 2 ------------------------------------
# text_linear + n_layers x (bi-attention + 2 PWFF + residuals) + fusion gate
# grid = (BH,), one batch*history element per grid step.

def _layers_kernel(text_ref, aal_ref, tkeep_ref, tmrow_ref,
                   tw_ref, tb_ref, attn_wt_ref, attn_wa_ref,
                   pwb_w1_ref, pwb_b1_ref, pwb_w2_ref, pwb_b2_ref,
                   pwb_g_ref, pwb_beta_ref,
                   aw1t_ref, aw1a_ref, ab1_ref, aw2_ref, ab2_ref,
                   out_ref, *, n_layers, T, D, DP, K):
    f32, bf16 = jnp.float32, jnp.bfloat16
    pad = (K - 1) // 2

    keep = tkeep_ref[...]                                     # (T, 1)
    kbias = tmrow_ref[0] * (-1e9)                             # (1, T) additive key bias

    # hoisted masks (not re-emitted per layer / per tap)
    pos = lax.broadcasted_iota(jnp.int32, (T, 1), 0)
    tapmask = [((pos + (k - pad) >= 0) & (pos + (k - pad) < T)).astype(f32)
               for k in range(K)]
    ch = lax.broadcasted_iota(jnp.int32, (1, DP), 1)
    chmask = (ch < D).astype(f32)                             # real-channel mask
    inv_d = jnp.float32(1.0 / D)

    def softmax(x):
        m = jnp.max(x, axis=-1, keepdims=True)
        e = jnp.exp(x - m)
        return e * pl.reciprocal(jnp.sum(e, axis=-1, keepdims=True), approx=True)

    def pwb(x, idx):
        # conv(k=K,'same') -> ReLU -> conv(k=1) -> +residual -> masked LayerNorm
        acc = None
        for k in range(K):
            shift = (pad - k) % T
            tap = x if shift == 0 else pltpu.roll(x, shift, axis=0)
            if k != pad:
                tap = tap * tapmask[k]
            part = jnp.dot(tap.astype(bf16), pwb_w1_ref[idx * K + k],
                           preferred_element_type=f32)
            acc = part if acc is None else acc + part
        h = jnp.maximum(acc + pwb_b1_ref[idx], 0.0)
        h = jnp.dot(h.astype(bf16), pwb_w2_ref[idx],
                    preferred_element_type=f32) + pwb_b2_ref[idx]
        y = h + x
        # LayerNorm over the real D channels only (pad channels are zero)
        mu = jnp.sum(y * chmask, axis=-1, keepdims=True) * inv_d
        yc = (y - mu) * chmask
        var = jnp.sum(yc * yc, axis=-1, keepdims=True) * inv_d
        yn = yc * lax.rsqrt(var + 1e-5)
        return yn * pwb_g_ref[idx] + pwb_beta_ref[idx]

    # text branch (folded here; no HBM round trip): linear + masked_fill
    th = jnp.dot(text_ref[...].astype(bf16), tw_ref[...],
                 preferred_element_type=f32) + tb_ref[...]
    text = th * keep
    audio = aal_ref[...]                                      # pad channels are zero

    dn = (((1,), (1,)), ((), ()))                             # contract last dims
    for li in range(n_layers):
        pt = jnp.dot(text.astype(bf16), attn_wt_ref[li], preferred_element_type=f32)
        pa = jnp.dot(audio.astype(bf16), attn_wa_ref[li], preferred_element_type=f32)
        qb, vt = pt[:, :DP].astype(bf16), pt[:, DP:]
        kb, va = pa[:, :DP].astype(bf16), pa[:, DP:]
        # forward scores q k^T (no transpose), reverse scores as a 2nd matmul
        s_t = lax.dot_general(qb, kb, dn, preferred_element_type=f32)   # (T, T)
        s_a = lax.dot_general(kb, qb, dn, preferred_element_type=f32)   # (T, T) == s_t.T
        # NOTE: the reference passes text_mask as the key mask for BOTH
        # directions (audio has been re-aligned to text length); reproduced.
        t_att = jnp.dot(softmax(s_t + kbias).astype(bf16), va.astype(bf16),
                        preferred_element_type=f32)
        a_att = jnp.dot(softmax(s_a + kbias).astype(bf16), vt.astype(bf16),
                        preferred_element_type=f32)
        audio = pwb(a_att, 2 * li + 1) + audio
        text = pwb(t_att, 2 * li + 0) + text

    # alpha_mlp fusion gate: sigmoid(W2 relu(W1 [text|audio] + b1) + b2)
    hdn = (jnp.dot(text.astype(bf16), aw1t_ref[...], preferred_element_type=f32)
           + jnp.dot(audio.astype(bf16), aw1a_ref[...], preferred_element_type=f32)
           + ab1_ref[...])
    hdn = jnp.maximum(hdn, 0.0)
    logit = jnp.dot(hdn.astype(bf16), aw2_ref[...],
                    preferred_element_type=f32) + ab2_ref[...]
    gate = 1.0 / (1.0 + jnp.exp(-logit))      # exact: the gate scales the output
    out_ref[...] = gate * text + (1.0 - gate) * audio         # (T, LANE) dense store


def _layers_call(p, text2d, a_aligned, tkeep, tmrow, *, BH, tl, D):
    c = text2d.shape[1]
    DP = p["tw"].shape[1]
    n_layers = p["attn_wt"].shape[0]
    K = p["pwb_w1"].shape[0] // (2 * n_layers)
    wargs = (p["tw"], p["tb"], p["attn_wt"], p["attn_wa"],
             p["pwb_w1"], p["pwb_b1"], p["pwb_w2"], p["pwb_b2"],
             p["pwb_g"], p["pwb_beta"],
             p["aw1t"], p["aw1a"], p["ab1"], p["aw2"], p["ab2"])
    args = (text2d, a_aligned, tkeep, tmrow) + wargs
    kern = functools.partial(_layers_kernel, n_layers=n_layers, T=tl, D=D,
                             DP=DP, K=K)
    in_specs = [pl.BlockSpec((tl, c), lambda i: (i, 0)),
                pl.BlockSpec((tl, DP), lambda i: (i, 0)),
                pl.BlockSpec((tl, 1), lambda i: (i, 0)),
                pl.BlockSpec((1, 1, tl), lambda i: (i, 0, 0))]
    in_specs += [_whole(a) for a in wargs]
    return pl.pallas_call(
        kern,
        grid=(BH,),
        out_shape=jax.ShapeDtypeStruct((BH * tl, DP), jnp.float32),
        in_specs=in_specs,
        out_specs=pl.BlockSpec((tl, DP), lambda i: (i, 0)),
        compiler_params=pltpu.CompilerParams(
            dimension_semantics=("parallel",),
            vmem_limit_bytes=32 * 1024 * 1024),
    )(*args)


# ------------------------------ module glue ---------------------------------

def t_a_align_mean(audios, alignments, *, hidden):
    """torch.mean(audio[start:start+a]) (scalar over span x real hidden).
    Ragged / data-dependent -> kept in plain JAX via cumulative sums."""
    BH, al, _ = audios.shape
    row_sum = audios.sum(axis=-1)                               # pad channels are 0
    csum = jnp.concatenate(
        [jnp.zeros((BH, 1), jnp.float32), jnp.cumsum(row_sum, axis=1)], axis=1)
    starts = jnp.concatenate(
        [jnp.zeros((BH, 1), jnp.int32), jnp.cumsum(alignments, axis=1)[:, :-1]],
        axis=1)
    ends = starts + alignments
    seg_sum = (jnp.take_along_axis(csum, ends, axis=1)
               - jnp.take_along_axis(csum, starts, axis=1))     # (BH, tl)
    denom = (alignments * hidden).astype(jnp.float32)
    return jnp.where(alignments > 0, seg_sum / jnp.maximum(denom, 1.0), 0.0)


def local_feature_extractor_fwd(params, text, audio, history_mask,
                                text_mask, audio_mask, text_audio_align,
                                *, hidden):
    b, h, tl, c = text.shape
    _, _, al, n_mels = audio.shape
    BH = b * h
    D = hidden
    DP = params["tw"].shape[1]
    del history_mask  # expanded but never consumed in the reference forward

    text2d = text.reshape(BH * tl, c).astype(jnp.float32)
    audio2d = audio.reshape(BH * al, n_mels).astype(jnp.float32)
    tkeep = 1.0 - text_mask.reshape(BH * tl, 1).astype(jnp.float32)
    akeep = 1.0 - audio_mask.reshape(BH * al, 1).astype(jnp.float32)
    tmrow = text_mask.reshape(BH, 1, tl).astype(jnp.float32)

    ah2d = _audio_encoder_call(params, audio2d, akeep, BH=BH, al=al)

    align = text_audio_align.reshape(BH, tl).astype(jnp.int32)
    mean = t_a_align_mean(ah2d.reshape(BH, al, DP), align, hidden=D)   # (BH, tl)
    chvec = (jnp.arange(DP) < D).astype(jnp.float32)
    a_aligned = (mean[:, :, None] * chvec).reshape(BH * tl, DP)

    fused = _layers_call(params, text2d, a_aligned, tkeep, tmrow,
                         BH=BH, tl=tl, D=D)
    return fused[:, :D].reshape(b, h, tl, D)


# ---------------------------- parameter creation ----------------------------

def init_params(key, *, text_dim, n_mels, hidden, n_layers,
                A_conv_kernel, A_n_layers, d_pad=LANE):
    D = hidden
    DP = max(d_pad, hidden)
    keys = iter(jax.random.split(key, 512))
    bn_scale = 1.0 / math.sqrt(1.0 + 1e-5)   # eval BN folded (mean=0, var=1)

    def rw(cin, cout):
        return jax.random.normal(next(keys), (cin, cout), jnp.float32) / math.sqrt(cin)

    def rb(cout):
        return 0.02 * jax.random.normal(next(keys), (cout,), jnp.float32)

    def pad_mat(w, rp, cp):
        return jnp.pad(w, ((0, rp - w.shape[0]), (0, cp - w.shape[1])))

    def pad_row(bv):
        return jnp.pad(bv.reshape(1, -1), ((0, 0), (0, DP - bv.shape[0])))

    def conv_w(Kk, cin, cin_p, fold_bn):
        w = jax.random.normal(next(keys), (Kk, cin, D), jnp.float32)
        w = w / math.sqrt(cin * Kk)
        bv = rb(D)
        if fold_bn:
            w = w * bn_scale
            bv = bv * bn_scale
        w = jnp.pad(w, ((0, 0), (0, cin_p - cin), (0, DP - D)))
        return w.astype(jnp.bfloat16), pad_row(bv)

    # text linear
    tw = pad_mat(rw(text_dim, D), text_dim, DP).astype(jnp.bfloat16)
    tb = pad_row(rb(D))

    # audio encoder
    K = A_conv_kernel
    pre_w, pre_b = conv_w(K, n_mels, n_mels, True)
    n_blocks = A_n_layers - 1
    cb_w, cb_b = [], []
    for _ in range(2 * n_blocks):
        w, bv = conv_w(K, D, DP, True)
        cb_w.append(w)
        cb_b.append(bv)
    ow = pad_mat(rw(D, D), DP, DP).astype(jnp.bfloat16)
    ob = pad_row(rb(D))

    # bi-attention + PWFF stacks (1/sqrt(D) folded into Wq)
    scale = 1.0 / math.sqrt(D)
    attn_wt, attn_wa = [], []
    pwb_w1, pwb_b1, pwb_w2, pwb_b2, pwb_g, pwb_beta = [], [], [], [], [], []
    for _ in range(n_layers):
        wq = pad_mat(rw(D, D) * scale, DP, DP)
        wk = pad_mat(rw(D, D), DP, DP)
        wvt = pad_mat(rw(D, D), DP, DP)
        wva = pad_mat(rw(D, D), DP, DP)
        attn_wt.append(jnp.concatenate([wq, wvt], axis=1).astype(jnp.bfloat16))
        attn_wa.append(jnp.concatenate([wk, wva], axis=1).astype(jnp.bfloat16))
        for _side in range(2):                 # 0 = text PWB, 1 = audio PWB
            w1, b1 = conv_w(9, D, DP, False)
            w2 = pad_mat(rw(D, D), DP, DP).astype(jnp.bfloat16)   # 1x1 conv
            b2 = pad_row(rb(D))
            pwb_w1.append(w1)
            pwb_b1.append(b1)
            pwb_w2.append(w2)
            pwb_b2.append(b2)
            g = jnp.zeros((1, DP), jnp.float32).at[:, :D].set(1.0)
            pwb_g.append(g)
            pwb_beta.append(jnp.zeros((1, DP), jnp.float32))

    a_w1 = rw(2 * D, D)
    aw1t = pad_mat(a_w1[:D], DP, DP).astype(jnp.bfloat16)
    aw1a = pad_mat(a_w1[D:], DP, DP).astype(jnp.bfloat16)
    ab1 = pad_row(rb(D))
    aw2 = jnp.pad(rw(D, 1), ((0, DP - D), (0, 0))).astype(jnp.bfloat16)
    ab2 = rb(1).reshape(1, 1)

    return dict(
        tw=tw, tb=tb,
        pre_w=pre_w, pre_b=pre_b,
        cb_w=jnp.concatenate(cb_w, axis=0),       # (2*n_blocks*K, DP, DP)
        cb_b=jnp.stack(cb_b),                     # (2*n_blocks, 1, DP)
        ow=ow, ob=ob,
        attn_wt=jnp.stack(attn_wt), attn_wa=jnp.stack(attn_wa),
        pwb_w1=jnp.concatenate(pwb_w1, axis=0),   # (2*n_layers*9, DP, DP)
        pwb_b1=jnp.stack(pwb_b1), pwb_w2=jnp.stack(pwb_w2),
        pwb_b2=jnp.stack(pwb_b2), pwb_g=jnp.stack(pwb_g),
        pwb_beta=jnp.stack(pwb_beta),
        aw1t=aw1t, aw1a=aw1a, ab1=ab1, aw2=aw2, ab2=ab2,
    )


# ----------------------------------- main ------------------------------------

if __name__ == "__main__":
    # config analogues of preprocess_config / model_config
    text_dim, n_mels, hidden = 16, 8, 32
    n_layers = 2                 # WiSeGTN.TA_Encoder.n_layers
    A_conv_kernel, A_n_layers = 3, 2

    b, h, tl, al = 2, 2, 8, 16

    key = jax.random.PRNGKey(0)
    kp, kt, ka = jax.random.split(key, 3)
    params = init_params(kp, text_dim=text_dim, n_mels=n_mels, hidden=hidden,
                         n_layers=n_layers, A_conv_kernel=A_conv_kernel,
                         A_n_layers=A_n_layers)

    text = jax.random.normal(kt, (b, h, tl, text_dim), jnp.float32)
    audio = jax.random.normal(ka, (b, h, al, n_mels), jnp.float32)
    history_mask = jnp.zeros((b, h), bool)
    text_mask = jnp.zeros((b, h, tl), bool).at[:, :, -1].set(True)
    audio_mask = jnp.zeros((b, h, al), bool).at[:, :, -2:].set(True)
    text_audio_align = jnp.tile(
        jnp.array([1, 3, 2, 2, 1, 3, 2, 2], jnp.int32), (b, h, 1))  # sums to al

    fwd = jax.jit(functools.partial(local_feature_extractor_fwd, params,
                                    hidden=hidden))
    out = fwd(text, audio, history_mask, text_mask, audio_mask, text_audio_align)
    out = jax.block_until_ready(out)

    assert out.shape == (b, h, tl, hidden), out.shape
    assert bool(jnp.all(jnp.isfinite(out)))
    print("KERNEL_OK")
</pallas_src>

<mosaic_0001>
module attributes {stable_mosaic.version = 11 : i64} {
  func.func @_audio_encoder_kernel(%arg0: i32, %arg1: memref<16x8xf32, #tpu.memory_space<vmem>>, %arg2: memref<16x1xf32, #tpu.memory_space<vmem>>, %arg3: memref<3x8x128xbf16, #tpu.memory_space<vmem>>, %arg4: memref<1x128xf32, #tpu.memory_space<vmem>>, %arg5: memref<6x128x128xbf16, #tpu.memory_space<vmem>>, %arg6: memref<2x1x128xf32, #tpu.memory_space<vmem>>, %arg7: memref<128x128xbf16, #tpu.memory_space<vmem>>, %arg8: memref<1x128xf32, #tpu.memory_space<vmem>>, %arg9: memref<16x128xf32, #tpu.memory_space<vmem>>) attributes {dimension_semantics = [#tpu.dimension_semantics<parallel>], iteration_bounds = array<i64: 4>, scalar_prefetch = 0 : i64, scratch_operands = 0 : i64, tpu.core_type = #tpu.core_type<tc>, window_params = [{transform_indices = @transform_0, window_bounds = array<i64: 16, 8>}, {transform_indices = @transform_1, window_bounds = array<i64: 16, 1>}, {pipeline_mode = #tpu.pipeline_mode<synchronous>, transform_indices = @transform_2, window_bounds = array<i64: 3, 8, 128>}, {pipeline_mode = #tpu.pipeline_mode<synchronous>, transform_indices = @transform_3, window_bounds = array<i64: 1, 128>}, {pipeline_mode = #tpu.pipeline_mode<synchronous>, transform_indices = @transform_4, window_bounds = array<i64: 6, 128, 128>}, {pipeline_mode = #tpu.pipeline_mode<synchronous>, transform_indices = @transform_5, window_bounds = array<i64: 2, 1, 128>}, {pipeline_mode = #tpu.pipeline_mode<synchronous>, transform_indices = @transform_6, window_bounds = array<i64: 128, 128>}, {pipeline_mode = #tpu.pipeline_mode<synchronous>, transform_indices = @transform_7, window_bounds = array<i64: 1, 128>}, {transform_indices = @transform_8, window_bounds = array<i64: 16, 128>}]} {
    %c0 = arith.constant 0 : index
    %c0_0 = arith.constant 0 : index
    %0 = vector.load %arg2[%c0, %c0_0] : memref<16x1xf32, #tpu.memory_space<vmem>>, vector<16x1xf32>
    %1 = tpu.iota {dimensions = array<i32: 0>} : vector<16x1xi32>
    %c-1_i32 = arith.constant -1 : i32
    %2 = vector.broadcast %c-1_i32 : i32 to vector<16x1xi32>
    %3 = arith.addi %1, %2 : vector<16x1xi32>
    %c0_i32 = arith.constant 0 : i32
    %4 = vector.broadcast %c0_i32 : i32 to vector<16x1xi32>
    %5 = arith.cmpi sge, %3, %4 : vector<16x1xi32>
    %c-1_i32_1 = arith.constant -1 : i32
    %6 = vector.broadcast %c-1_i32_1 : i32 to vector<16x1xi32>
    %7 = arith.addi %1, %6 : vector<16x1xi32>
    %c16_i32 = arith.constant 16 : i32
    %8 = vector.broadcast %c16_i32 : i32 to vector<16x1xi32>
    %9 = arith.cmpi slt, %7, %8 : vector<16x1xi32>
    %10 = arith.andi %5, %9 : vector<16x1xi1>
    %11 = arith.extui %10 : vector<16x1xi1> to vector<16x1xi32>
    %12 = arith.sitofp %11 : vector<16x1xi32> to vector<16x1xf32>
    %c1_i32 = arith.constant 1 : i32
    %13 = vector.broadcast %c1_i32 : i32 to vector<16x1xi32>
    %14 = arith.addi %1, %13 : vector<16x1xi32>
    %c0_i32_2 = arith.constant 0 : i32
    %15 = vector.broadcast %c0_i32_2 : i32 to vector<16x1xi32>
    %16 = arith.cmpi sge, %14, %15 : vector<16x1xi32>
    %c1_i32_3 = arith.constant 1 : i32
    %17 = vector.broadcast %c1_i32_3 : i32 to vector<16x1xi32>
    %18 = arith.addi %1, %17 : vector<16x1xi32>
    %c16_i32_4 = arith.constant 16 : i32
    %19 = vector.broadcast %c16_i32_4 : i32 to vector<16x1xi32>
    %20 = arith.cmpi slt, %18, %19 : vector<16x1xi32>
    %21 = arith.andi %16, %20 : vector<16x1xi1>
    %22 = arith.extui %21 : vector<16x1xi1> to vector<16x1xi32>
    %23 = arith.sitofp %22 : vector<16x1xi32> to vector<16x1xf32>
    %c0_5 = arith.constant 0 : index
    %c0_6 = arith.constant 0 : index
    %24 = vector.load %arg1[%c0_5, %c0_6] : memref<16x8xf32, #tpu.memory_space<vmem>>, vector<16x8xf32>
    %c0_7 = arith.constant 0 : index
    %c0_8 = arith.constant 0 : index
    %25 = vector.load %arg4[%c0_7, %c0_8] : memref<1x128xf32, #tpu.memory_space<vmem>>, vector<1x128xf32>
    %c1_i32_9 = arith.constant 1 : i32
    %26 = tpu.dynamic_rotate %24 by %c1_i32_9 dim 0 : vector<16x8xf32>, i32 -> vector<16x8xf32>
    %27 = vector.broadcast %12 : vector<16x1xf32> to vector<16x8xf32>
    %28 = arith.mulf %26, %27 : vector<16x8xf32>
    %29 = arith.truncf %28 : vector<16x8xf32> to vector<16x8xbf16>
    %c0_10 = arith.constant 0 : index
    %c0_11 = arith.constant 0 : index
    %c0_12 = arith.constant 0 : index
    %30 = vector.load %arg3[%c0_10, %c0_11, %c0_12] : memref<3x8x128xbf16, #tpu.memory_space<vmem>>, vector<1x8x128xbf16>
    %31 = vector.shape_cast %30 : vector<1x8x128xbf16> to vector<8x128xbf16>
    %cst = arith.constant dense<0.000000e+00> : vector<16x128xf32>
    %32 = tpu.matmul %29, %31, %cst {dimension_numbers = #tpu.dot_dimension_numbers<[1], [0], [0], [1], [0, 0, 1, 1], [], []>} : vector<16x8xbf16>, vector<8x128xbf16>, vector<16x128xf32> -> vector<16x128xf32>
    %33 = arith.truncf %24 : vector<16x8xf32> to vector<16x8xbf16>
    %c1 = arith.constant 1 : index
    %c0_13 = arith.constant 0 : index
    %c0_14 = arith.constant 0 : index
    %34 = vector.load %arg3[%c1, %c0_13, %c0_14] : memref<3x8x128xbf16, #tpu.memory_space<vmem>>, vector<1x8x128xbf16>
    %35 = vector.shape_cast %34 : vector<1x8x128xbf16> to vector<8x128xbf16>
    %cst_15 = arith.constant dense<0.000000e+00> : vector<16x128xf32>
    %36 = tpu.matmul %33, %35, %cst_15 {dimension_numbers = #tpu.dot_dimension_numbers<[1], [0], [0], [1], [0, 0, 1, 1], [], []>} : vector<16x8xbf16>, vector<8x128xbf16>, vector<16x128xf32> -> vector<16x128xf32>
    %37 = arith.addf %32, %36 : vector<16x128xf32>
    %c15_i32 = arith.constant 15 : i32
    %38 = tpu.dynamic_rotate %24 by %c15_i32 dim 0 : vector<16x8xf32>, i32 -> vector<16x8xf32>
    %39 = vector.broadcast %23 : vector<16x1xf32> to vector<16x8xf32>
    %40 = arith.mulf %38, %39 : vector<16x8xf32>
    %41 = arith.truncf %40 : vector<16x8xf32> to vector<16x8xbf16>
    %c2 = arith.constant 2 : index
    %c0_16 = arith.constant 0 : index
    %c0_17 = arith.constant 0 : index
    %42 = vector.load %arg3[%c2, %c0_16, %c0_17] : memref<3x8x128xbf16, #tpu.memory_space<vmem>>, vector<1x8x128xbf16>
    %43 = vector.shape_cast %42 : vector<1x8x128xbf16> to vector<8x128xbf16>
    %cst_18 = arith.constant dense<0.000000e+00> : vector<16x128xf32>
    %44 = tpu.matmul %41, %43, %cst_18 {dimension_numbers = #tpu.dot_dimension_numbers<[1], [0], [0], [1], [0, 0, 1, 1], [], []>} : vector<16x8xbf16>, vector<8x128xbf16>, vector<16x128xf32> -> vector<16x128xf32>
    %45 = arith.addf %37, %44 : vector<16x128xf32>
    %46 = vector.broadcast %25 : vector<1x128xf32> to vector<16x128xf32>
    %47 = arith.addf %45, %46 : vector<16x128xf32>
    %cst_19 = arith.constant 0.000000e+00 : f32
    %48 = vector.broadcast %cst_19 : f32 to vector<16x128xf32>
    %49 = arith.maximumf %47, %48 : vector<16x128xf32>
    %50 = vector.broadcast %0 : vector<16x1xf32> to vector<16x128xf32>
    %51 = arith.mulf %49, %50 : vector<16x128xf32>
    %c0_20 = arith.constant 0 : index
    %c0_21 = arith.constant 0 : index
    %c0_22 = arith.constant 0 : index
    %52 = vector.load %arg6[%c0_20, %c0_21, %c0_22] : memref<2x1x128xf32, #tpu.memory_space<vmem>>, vector<1x1x128xf32>
    %53 = vector.shape_cast %52 : vector<1x1x128xf32> to vector<1x128xf32>
    %c1_i32_23 = arith.constant 1 : i32
    %54 = tpu.dynamic_rotate %51 by %c1_i32_23 dim 0 : vector<16x128xf32>, i32 -> vector<16x128xf32>
    %55 = vector.broadcast %12 : vector<16x1xf32> to vector<16x128xf32>
    %56 = arith.mulf %54, %55 : vector<16x128xf32>
    %57 = arith.truncf %56 : vector<16x128xf32> to vector<16x128xbf16>
    %c0_24 = arith.constant 0 : index
    %c0_25 = arith.constant 0 : index
    %c0_26 = arith.constant 0 : index
    %58 = vector.load %arg5[%c0_24, %c0_25, %c0_26] : memref<6x128x128xbf16, #tpu.memory_space<vmem>>, vector<1x128x128xbf16>
    %59 = vector.shape_cast %58 : vector<1x128x128xbf16> to vector<128x128xbf16>
    %cst_27 = arith.constant dense<0.000000e+00> : vector<16x128xf32>
    %60 = tpu.matmul %57, %59, %cst_27 {dimension_numbers = #tpu.dot_dimension_numbers<[1], [0], [0], [1], [0, 0, 1, 1], [], []>} : vector<16x128xbf16>, vector<128x128xbf16>, vector<16x128xf32> -> vector<16x128xf32>
    %61 = arith.truncf %51 : vector<16x128xf32> to vector<16x128xbf16>
    %c1_28 = arith.constant 1 : index
    %c0_29 = arith.constant 0 : index
    %c0_30 = arith.constant 0 : index
    %62 = vector.load %arg5[%c1_28, %c0_29, %c0_30] : memref<6x128x128xbf16, #tpu.memory_space<vmem>>, vector<1x128x128xbf16>
    %63 = vector.shape_cast %62 : vector<1x128x128xbf16> to vector<128x128xbf16>
    %cst_31 = arith.constant dense<0.000000e+00> : vector<16x128xf32>
    %64 = tpu.matmul %61, %63, %cst_31 {dimension_numbers = #tpu.dot_dimension_numbers<[1], [0], [0], [1], [0, 0, 1, 1], [], []>} : vector<16x128xbf16>, vector<128x128xbf16>, vector<16x128xf32> -> vector<16x128xf32>
    %65 = arith.addf %60, %64 : vector<16x128xf32>
    %c15_i32_32 = arith.constant 15 : i32
    %66 = tpu.dynamic_rotate %51 by %c15_i32_32 dim 0 : vector<16x128xf32>, i32 -> vector<16x128xf32>
    %67 = vector.broadcast %23 : vector<16x1xf32> to vector<16x128xf32>
    %68 = arith.mulf %66, %67 : vector<16x128xf32>
    %69 = arith.truncf %68 : vector<16x128xf32> to vector<16x128xbf16>
    %c2_33 = arith.constant 2 : index
    %c0_34 = arith.constant 0 : index
    %c0_35 = arith.constant 0 : index
    %70 = vector.load %arg5[%c2_33, %c0_34, %c0_35] : memref<6x128x128xbf16, #tpu.memory_space<vmem>>, vector<1x128x128xbf16>
    %71 = vector.shape_cast %70 : vector<1x128x128xbf16> to vector<128x128xbf16>
    %cst_36 = arith.constant dense<0.000000e+00> : vector<16x128xf32>
    %72 = tpu.matmul %69, %71, %cst_36 {dimension_numbers = #tpu.dot_dimension_numbers<[1], [0], [0], [1], [0, 0, 1, 1], [], []>} : vector<16x128xbf16>, vector<128x128xbf16>, vector<16x128xf32> -> vector<16x128xf32>
    %73 = arith.addf %65, %72 : vector<16x128xf32>
    %74 = vector.broadcast %53 : vector<1x128xf32> to vector<16x128xf32>
    %75 = arith.addf %73, %74 : vector<16x128xf32>
    %cst_37 = arith.constant 0.000000e+00 : f32
    %76 = vector.broadcast %cst_37 : f32 to vector<16x128xf32>
    %77 = arith.maximumf %75, %76 : vector<16x128xf32>
    %c1_38 = arith.constant 1 : index
    %c0_39 = arith.constant 0 : index
    %c0_40 = arith.constant 0 : index
    %78 = vector.load %arg6[%c1_38, %c0_39, %c0_40] : memref<2x1x128xf32, #tpu.memory_space<vmem>>, vector<1x1x128xf32>
    %79 = vector.shape_cast %78 : vector<1x1x128xf32> to vector<1x128xf32>
    %c1_i32_41 = arith.constant 1 : i32
    %80 = tpu.dynamic_rotate %77 by %c1_i32_41 dim 0 : vector<16x128xf32>, i32 -> vector<16x128xf32>
    %81 = vector.broadcast %12 : vector<16x1xf32> to vector<16x128xf32>
    %82 = arith.mulf %80, %81 : vector<16x128xf32>
    %83 = arith.truncf %82 : vector<16x128xf32> to vector<16x128xbf16>
    %c3 = arith.constant 3 : index
    %c0_42 = arith.constant 0 : index
    %c0_43 = arith.constant 0 : index
    %84 = vector.load %arg5[%c3, %c0_42, %c0_43] : memref<6x128x128xbf16, #tpu.memory_space<vmem>>, vector<1x128x128xbf16>
    %85 = vector.shape_cast %84 : vector<1x128x128xbf16> to vector<128x128xbf16>
    %cst_44 = arith.constant dense<0.000000e+00> : vector<16x128xf32>
    %86 = tpu.matmul %83, %85, %cst_44 {dimension_numbers = #tpu.dot_dimension_numbers<[1], [0], [0], [1], [0, 0, 1, 1], [], []>} : vector<16x128xbf16>, vector<128x128xbf16>, vector<16x128xf32> -> vector<16x128xf32>
    %87 = arith.truncf %77 : vector<16x128xf32> to vector<16x128xbf16>
    %c4 = arith.constant 4 : index
    %c0_45 = arith.constant 0 : index
    %c0_46 = arith.constant 0 : index
    %88 = vector.load %arg5[%c4, %c0_45, %c0_46] : memref<6x128x128xbf16, #tpu.memory_space<vmem>>, vector<1x128x128xbf16>
    %89 = vector.shape_cast %88 : vector<1x128x128xbf16> to vector<128x128xbf16>
    %cst_47 = arith.constant dense<0.000000e+00> : vector<16x128xf32>
    %90 = tpu.matmul %87, %89, %cst_47 {dimension_numbers = #tpu.dot_dimension_numbers<[1], [0], [0], [1], [0, 0, 1, 1], [], []>} : vector<16x128xbf16>, vector<128x128xbf16>, vector<16x128xf32> -> vector<16x128xf32>
    %91 = arith.addf %86, %90 : vector<16x128xf32>
    %c15_i32_48 = arith.constant 15 : i32
    %92 = tpu.dynamic_rotate %77 by %c15_i32_48 dim 0 : vector<16x128xf32>, i32 -> vector<16x128xf32>
    %93 = vector.broadcast %23 : vector<16x1xf32> to vector<16x128xf32>
    %94 = arith.mulf %92, %93 : vector<16x128xf32>
    %95 = arith.truncf %94 : vector<16x128xf32> to vector<16x128xbf16>
    %c5 = arith.constant 5 : index
    %c0_49 = arith.constant 0 : index
    %c0_50 = arith.constant 0 : index
    %96 = vector.load %arg5[%c5, %c0_49, %c0_50] : memref<6x128x128xbf16, #tpu.memory_space<vmem>>, vector<1x128x128xbf16>
    %97 = vector.shape_cast %96 : vector<1x128x128xbf16> to vector<128x128xbf16>
    %cst_51 = arith.constant dense<0.000000e+00> : vector<16x128xf32>
    %98 = tpu.matmul %95, %97, %cst_51 {dimension_numbers = #tpu.dot_dimension_numbers<[1], [0], [0], [1], [0, 0, 1, 1], [], []>} : vector<16x128xbf16>, vector<128x128xbf16>, vector<16x128xf32> -> vector<16x128xf32>
    %99 = arith.addf %91, %98 : vector<16x128xf32>
    %100 = vector.broadcast %79 : vector<1x128xf32> to vector<16x128xf32>
    %101 = arith.addf %99, %100 : vector<16x128xf32>
    %cst_52 = arith.constant 0.000000e+00 : f32
    %102 = vector.broadcast %cst_52 : f32 to vector<16x128xf32>
    %103 = arith.maximumf %101, %102 : vector<16x128xf32>
    %104 = vector.broadcast %0 : vector<16x1xf32> to vector<16x128xf32>
    %105 = arith.mulf %103, %104 : vector<16x128xf32>
    %106 = arith.addf %105, %51 : vector<16x128xf32>
    %107 = arith.truncf %106 : vector<16x128xf32> to vector<16x128xbf16>
    %c0_53 = arith.constant 0 : index
    %c0_54 = arith.constant 0 : index
    %108 = vector.load %arg7[%c0_53, %c0_54] : memref<128x128xbf16, #tpu.memory_space<vmem>>, vector<128x128xbf16>
    %cst_55 = arith.constant dense<0.000000e+00> : vector<16x128xf32>
    %109 = tpu.matmul %107, %108, %cst_55 {dimension_numbers = #tpu.dot_dimension_numbers<[1], [0], [0], [1], [0, 0, 1, 1], [], []>} : vector<16x128xbf16>, vector<128x128xbf16>, vector<16x128xf32> -> vector<16x128xf32>
    %c0_56 = arith.constant 0 : index
    %c0_57 = arith.constant 0 : index
    %110 = vector.load %arg8[%c0_56, %c0_57] : memref<1x128xf32, #tpu.memory_space<vmem>>, vector<1x128xf32>
    %111 = vector.broadcast %110 : vector<1x128xf32> to vector<16x128xf32>
    %112 = arith.addf %109, %111 : vector<16x128xf32>
    %113 = vector.broadcast %0 : vector<16x1xf32> to vector<16x128xf32>
    %114 = arith.mulf %112, %113 : vector<16x128xf32>
    %c0_58 = arith.constant 0 : index
    %c0_59 = arith.constant 0 : index
    %115 = vector.load %arg9[%c0_58, %c0_59] : memref<16x128xf32, #tpu.memory_space<vmem>>, vector<16x128xf32>
    tpu.vector_store %arg9[%c0_58, %c0_59], %114 {strides = array<i32>} : memref<16x128xf32, #tpu.memory_space<vmem>>, vector<16x128xf32>,
    return
  }
  func.func @transform_0(%arg0: i32) -> (i32, i32) {
    %c0_i32 = arith.constant 0 : i32
    %c0_i32_0 = arith.constant 0 : i32
    return %arg0, %c0_i32 : i32, i32
  }
  func.func @transform_1(%arg0: i32) -> (i32, i32) {
    %c0_i32 = arith.constant 0 : i32
    %c0_i32_0 = arith.constant 0 : i32
    return %arg0, %c0_i32 : i32, i32
  }
  func.func @transform_2(%arg0: i32) -> (i32, i32, i32) {
    %c0_i32 = arith.constant 0 : i32
    %c0_i32_0 = arith.constant 0 : i32
    %c0_i32_1 = arith.constant 0 : i32
    %c0_i32_2 = arith.constant 0 : i32
    return %c0_i32, %c0_i32_0, %c0_i32_1 : i32, i32, i32
  }
  func.func @transform_3(%arg0: i32) -> (i32, i32) {
    %c0_i32 = arith.constant 0 : i32
    %c0_i32_0 = arith.constant 0 : i32
    %c0_i32_1 = arith.constant 0 : i32
    return %c0_i32, %c0_i32_0 : i32, i32
  }
  func.func @transform_4(%arg0: i32) -> (i32, i32, i32) {
    %c0_i32 = arith.constant 0 : i32
    %c0_i32_0 = arith.constant 0 : i32
    %c0_i32_1 = arith.constant 0 : i32
    %c0_i32_2 = arith.constant 0 : i32
    return %c0_i32, %c0_i32_0, %c0_i32_1 : i32, i32, i32
  }
  func.func @transform_5(%arg0: i32) -> (i32, i32, i32) {
    %c0_i32 = arith.constant 0 : i32
    %c0_i32_0 = arith.constant 0 : i32
    %c0_i32_1 = arith.constant 0 : i32
    %c0_i32_2 = arith.constant 0 : i32
    return %c0_i32, %c0_i32_0, %c0_i32_1 : i32, i32, i32
  }
  func.func @transform_6(%arg0: i32) -> (i32, i32) {
    %c0_i32 = arith.constant 0 : i32
    %c0_i32_0 = arith.constant 0 : i32
    %c0_i32_1 = arith.constant 0 : i32
    return %c0_i32, %c0_i32_0 : i32, i32
  }
  func.func @transform_7(%arg0: i32) -> (i32, i32) {
    %c0_i32 = arith.constant 0 : i32
    %c0_i32_0 = arith.constant 0 : i32
    %c0_i32_1 = arith.constant 0 : i32
    return %c0_i32, %c0_i32_0 : i32, i32
  }
  func.func @transform_8(%arg0: i32) -> (i32, i32) {
    %c0_i32 = arith.constant 0 : i32
    %c0_i32_0 = arith.constant 0 : i32
    return %arg0, %c0_i32 : i32, i32
  }
}

module attributes {stable_mosaic.version = 11 : i64} {
  func.func @_layers_kernel(%arg0: i32, %arg1: memref<8x16xf32, #tpu.memory_space<vmem>>, %arg2: memref<8x128xf32, #tpu.memory_space<vmem>>, %arg3: memref<8x1xf32, #tpu.memory_space<vmem>>, %arg4: memref<1x1x8xf32, #tpu.memory_space<vmem>>, %arg5: memref<16x128xbf16, #tpu.memory_space<vmem>>, %arg6: memref<1x128xf32, #tpu.memory_space<vmem>>, %arg7: memref<2x128x256xbf16, #tpu.memory_space<vmem>>, %arg8: memref<2x128x256xbf16, #tpu.memory_space<vmem>>, %arg9: memref<36x128x128xbf16, #tpu.memory_space<vmem>>, %arg10: memref<4x1x128xf32, #tpu.memory_space<vmem>>, %arg11: memref<4x128x128xbf16, #tpu.memory_space<vmem>>, %arg12: memref<4x1x128xf32, #tpu.memory_space<vmem>>, %arg13: memref<4x1x128xf32, #tpu.memory_space<vmem>>, %arg14: memref<4x1x128xf32, #tpu.memory_space<vmem>>, %arg15: memref<128x128xbf16, #tpu.memory_space<vmem>>, %arg16: memref<128x128xbf16, #tpu.memory_space<vmem>>, %arg17: memref<1x128xf32, #tpu.memory_space<vmem>>, %arg18: memref<128x1xbf16, #tpu.memory_space<vmem>>, %arg19: memref<1x1xf32, #tpu.memory_space<vmem>>, %arg20: memref<8x128xf32, #tpu.memory_space<vmem>>) attributes {dimension_semantics = [#tpu.dimension_semantics<parallel>], iteration_bounds = array<i64: 4>, scalar_prefetch = 0 : i64, scratch_operands = 0 : i64, tpu.core_type = #tpu.core_type<tc>, window_params = [{transform_indices = @transform_0, window_bounds = array<i64: 8, 16>}, {transform_indices = @transform_1, window_bounds = array<i64: 8, 128>}, {transform_indices = @transform_2, window_bounds = array<i64: 8, 1>}, {transform_indices = @transform_3, window_bounds = array<i64: 1, 1, 8>}, {pipeline_mode = #tpu.pipeline_mode<synchronous>, transform_indices = @transform_4, window_bounds = array<i64: 16, 128>}, {pipeline_mode = #tpu.pipeline_mode<synchronous>, transform_indices = @transform_5, window_bounds = array<i64: 1, 128>}, {pipeline_mode = #tpu.pipeline_mode<synchronous>, transform_indices = @transform_6, window_bounds = array<i64: 2, 128, 256>}, {pipeline_mode = #tpu.pipeline_mode<synchronous>, transform_indices = @transform_7, window_bounds = array<i64: 2, 128, 256>}, {pipeline_mode = #tpu.pipeline_mode<synchronous>, transform_indices = @transform_8, window_bounds = array<i64: 36, 128, 128>}, {pipeline_mode = #tpu.pipeline_mode<synchronous>, transform_indices = @transform_9, window_bounds = array<i64: 4, 1, 128>}, {pipeline_mode = #tpu.pipeline_mode<synchronous>, transform_indices = @transform_10, window_bounds = array<i64: 4, 128, 128>}, {pipeline_mode = #tpu.pipeline_mode<synchronous>, transform_indices = @transform_11, window_bounds = array<i64: 4, 1, 128>}, {pipeline_mode = #tpu.pipeline_mode<synchronous>, transform_indices = @transform_12, window_bounds = array<i64: 4, 1, 128>}, {pipeline_mode = #tpu.pipeline_mode<synchronous>, transform_indices = @transform_13, window_bounds = array<i64: 4, 1, 128>}, {pipeline_mode = #tpu.pipeline_mode<synchronous>, transform_indices = @transform_14, window_bounds = array<i64: 128, 128>}, {pipeline_mode = #tpu.pipeline_mode<synchronous>, transform_indices = @transform_15, window_bounds = array<i64: 128, 128>}, {pipeline_mode = #tpu.pipeline_mode<synchronous>, transform_indices = @transform_16, window_bounds = array<i64: 1, 128>}, {pipeline_mode = #tpu.pipeline_mode<synchronous>, transform_indices = @transform_17, window_bounds = array<i64: 128, 1>}, {pipeline_mode = #tpu.pipeline_mode<synchronous>, transform_indices = @transform_18, window_bounds = array<i64: 1, 1>}, {transform_indices = @transform_19, window_bounds = array<i64: 8, 128>}]} {
    %c0 = arith.constant 0 : index
    %c0_0 = arith.constant 0 : index
    %0 = vector.load %arg3[%c0, %c0_0] : memref<8x1xf32, #tpu.memory_space<vmem>>, vector<8x1xf32>
    %c0_1 = arith.constant 0 : index
    %c0_2 = arith.constant 0 : index
    %c0_3 = arith.constant 0 : index
    %1 = vector.load %arg4[%c0_1, %c0_2, %c0_3] : memref<1x1x8xf32, #tpu.memory_space<vmem>>, vector<1x1x8xf32>
    %2 = vector.shape_cast %1 : vector<1x1x8xf32> to vector<1x8xf32>
    %cst = arith.constant -1.000000e+09 : f32
    %3 = vector.broadcast %cst : f32 to vector<1x8xf32>
    %4 = arith.mulf %2, %3 : vector<1x8xf32>
    %5 = tpu.iota {dimensions = array<i32: 0>} : vector<8x1xi32>
    %c-4_i32 = arith.constant -4 : i32
    %6 = vector.broadcast %c-4_i32 : i32 to vector<8x1xi32>
    %7 = arith.addi %5, %6 : vector<8x1xi32>
    %c0_i32 = arith.constant 0 : i32
    %8 = vector.broadcast %c0_i32 : i32 to vector<8x1xi32>
    %9 = arith.cmpi sge, %7, %8 : vector<8x1xi32>
    %c-4_i32_4 = arith.constant -4 : i32
    %10 = vector.broadcast %c-4_i32_4 : i32 to vector<8x1xi32>
    %11 = arith.addi %5, %10 : vector<8x1xi32>
    %c8_i32 = arith.constant 8 : i32
    %12 = vector.broadcast %c8_i32 : i32 to vector<8x1xi32>
    %13 = arith.cmpi slt, %11, %12 : vector<8x1xi32>
    %14 = arith.andi %9, %13 : vector<8x1xi1>
    %15 = arith.extui %14 : vector<8x1xi1> to vector<8x1xi32>
    %16 = arith.sitofp %15 : vector<8x1xi32> to vector<8x1xf32>
    %c-3_i32 = arith.constant -3 : i32
    %17 = vector.broadcast %c-3_i32 : i32 to vector<8x1xi32>
    %18 = arith.addi %5, %17 : vector<8x1xi32>
    %c0_i32_5 = arith.constant 0 : i32
    %19 = vector.broadcast %c0_i32_5 : i32 to vector<8x1xi32>
    %20 = arith.cmpi sge, %18, %19 : vector<8x1xi32>
    %c-3_i32_6 = arith.constant -3 : i32
    %21 = vector.broadcast %c-3_i32_6 : i32 to vector<8x1xi32>
    %22 = arith.addi %5, %21 : vector<8x1xi32>
    %c8_i32_7 = arith.constant 8 : i32
    %23 = vector.broadcast %c8_i32_7 : i32 to vector<8x1xi32>
    %24 = arith.cmpi slt, %22, %23 : vector<8x1xi32>
    %25 = arith.andi %20, %24 : vector<8x1xi1>
    %26 = arith.extui %25 : vector<8x1xi1> to vector<8x1xi32>
    %27 = arith.sitofp %26 : vector<8x1xi32> to vector<8x1xf32>
    %c-2_i32 = arith.constant -2 : i32
    %28 = vector.broadcast %c-2_i32 : i32 to vector<8x1xi32>
    %29 = arith.addi %5, %28 : vector<8x1xi32>
    %c0_i32_8 = arith.constant 0 : i32
    %30 = vector.broadcast %c0_i32_8 : i32 to vector<8x1xi32>
    %31 = arith.cmpi sge, %29, %30 : vector<8x1xi32>
    %c-2_i32_9 = arith.constant -2 : i32
    %32 = vector.broadcast %c-2_i32_9 : i32 to vector<8x1xi32>
    %33 = arith.addi %5, %32 : vector<8x1xi32>
    %c8_i32_10 = arith.constant 8 : i32
    %34 = vector.broadcast %c8_i32_10 : i32 to vector<8x1xi32>
    %35 = arith.cmpi slt, %33, %34 : vector<8x1xi32>
    %36 = arith.andi %31, %35 : vector<8x1xi1>
    %37 = arith.extui %36 : vector<8x1xi1> to vector<8x1xi32>
    %38 = arith.sitofp %37 : vector<8x1xi32> to vector<8x1xf32>
    %c-1_i32 = arith.constant -1 : i32
    %39 = vector.broadcast %c-1_i32 : i32 to vector<8x1xi32>
    %40 = arith.addi %5, %39 : vector<8x1xi32>
    %c0_i32_11 = arith.constant 0 : i32
    %41 = vector.broadcast %c0_i32_11 : i32 to vector<8x1xi32>
    %42 = arith.cmpi sge, %40, %41 : vector<8x1xi32>
    %c-1_i32_12 = arith.constant -1 : i32
    %43 = vector.broadcast %c-1_i32_12 : i32 to vector<8x1xi32>
    %44 = arith.addi %5, %43 : vector<8x1xi32>
    %c8_i32_13 = arith.constant 8 : i32
    %45 = vector.broadcast %c8_i32_13 : i32 to vector<8x1xi32>
    %46 = arith.cmpi slt, %44, %45 : vector<8x1xi32>
    %47 = arith.andi %42, %46 : vector<8x1xi1>
    %48 = arith.extui %47 : vector<8x1xi1> to vector<8x1xi32>
    %49 = arith.sitofp %48 : vector<8x1xi32> to vector<8x1xf32>
    %c1_i32 = arith.constant 1 : i32
    %50 = vector.broadcast %c1_i32 : i32 to vector<8x1xi32>
    %51 = arith.addi %5, %50 : vector<8x1xi32>
    %c0_i32_14 = arith.constant 0 : i32
    %52 = vector.broadcast %c0_i32_14 : i32 to vector<8x1xi32>
    %53 = arith.cmpi sge, %51, %52 : vector<8x1xi32>
    %c1_i32_15 = arith.constant 1 : i32
    %54 = vector.broadcast %c1_i32_15 : i32 to vector<8x1xi32>
    %55 = arith.addi %5, %54 : vector<8x1xi32>
    %c8_i32_16 = arith.constant 8 : i32
    %56 = vector.broadcast %c8_i32_16 : i32 to vector<8x1xi32>
    %57 = arith.cmpi slt, %55, %56 : vector<8x1xi32>
    %58 = arith.andi %53, %57 : vector<8x1xi1>
    %59 = arith.extui %58 : vector<8x1xi1> to vector<8x1xi32>
    %60 = arith.sitofp %59 : vector<8x1xi32> to vector<8x1xf32>
    %c2_i32 = arith.constant 2 : i32
    %61 = vector.broadcast %c2_i32 : i32 to vector<8x1xi32>
    %62 = arith.addi %5, %61 : vector<8x1xi32>
    %c0_i32_17 = arith.constant 0 : i32
    %63 = vector.broadcast %c0_i32_17 : i32 to vector<8x1xi32>
    %64 = arith.cmpi sge, %62, %63 : vector<8x1xi32>
    %c2_i32_18 = arith.constant 2 : i32
    %65 = vector.broadcast %c2_i32_18 : i32 to vector<8x1xi32>
    %66 = arith.addi %5, %65 : vector<8x1xi32>
    %c8_i32_19 = arith.constant 8 : i32
    %67 = vector.broadcast %c8_i32_19 : i32 to vector<8x1xi32>
    %68 = arith.cmpi slt, %66, %67 : vector<8x1xi32>
    %69 = arith.andi %64, %68 : vector<8x1xi1>
    %70 = arith.extui %69 : vector<8x1xi1> to vector<8x1xi32>
    %71 = arith.sitofp %70 : vector<8x1xi32> to vector<8x1xf32>
    %c3_i32 = arith.constant 3 : i32
    %72 = vector.broadcast %c3_i32 : i32 to vector<8x1xi32>
    %73 = arith.addi %5, %72 : vector<8x1xi32>
    %c0_i32_20 = arith.constant 0 : i32
    %74 = vector.broadcast %c0_i32_20 : i32 to vector<8x1xi32>
    %75 = arith.cmpi sge, %73, %74 : vector<8x1xi32>
    %c3_i32_21 = arith.constant 3 : i32
    %76 = vector.broadcast %c3_i32_21 : i32 to vector<8x1xi32>
    %77 = arith.addi %5, %76 : vector<8x1xi32>
    %c8_i32_22 = arith.constant 8 : i32
    %78 = vector.broadcast %c8_i32_22 : i32 to vector<8x1xi32>
    %79 = arith.cmpi slt, %77, %78 : vector<8x1xi32>
    %80 = arith.andi %75, %79 : vector<8x1xi1>
    %81 = arith.extui %80 : vector<8x1xi1> to vector<8x1xi32>
    %82 = arith.sitofp %81 : vector<8x1xi32> to vector<8x1xf32>
    %c4_i32 = arith.constant 4 : i32
    %83 = vector.broadcast %c4_i32 : i32 to vector<8x1xi32>
    %84 = arith.addi %5, %83 : vector<8x1xi32>
    %c0_i32_23 = arith.constant 0 : i32
    %85 = vector.broadcast %c0_i32_23 : i32 to vector<8x1xi32>
    %86 = arith.cmpi sge, %84, %85 : vector<8x1xi32>
    %c4_i32_24 = arith.constant 4 : i32
    %87 = vector.broadcast %c4_i32_24 : i32 to vector<8x1xi32>
    %88 = arith.addi %5, %87 : vector<8x1xi32>
    %c8_i32_25 = arith.constant 8 : i32
    %89 = vector.broadcast %c8_i32_25 : i32 to vector<8x1xi32>
    %90 = arith.cmpi slt, %88, %89 : vector<8x1xi32>
    %91 = arith.andi %86, %90 : vector<8x1xi1>
    %92 = arith.extui %91 : vector<8x1xi1> to vector<8x1xi32>
    %93 = arith.sitofp %92 : vector<8x1xi32> to vector<8x1xf32>
    %94 = tpu.iota {dimensions = array<i32: 1>} : vector<1x128xi32>
    %c32_i32 = arith.constant 32 : i32
    %95 = vector.broadcast %c32_i32 : i32 to vector<1x128xi32>
    %96 = arith.cmpi slt, %94, %95 : vector<1x128xi32>
    %97 = arith.extui %96 : vector<1x128xi1> to vector<1x128xi32>
    %98 = arith.sitofp %97 : vector<1x128xi32> to vector<1x128xf32>
    %c0_26 = arith.constant 0 : index
    %c0_27 = arith.constant 0 : index
    %99 = vector.load %arg1[%c0_26, %c0_27] : memref<8x16xf32, #tpu.memory_space<vmem>>, vector<8x16xf32>
    %100 = arith.truncf %99 : vector<8x16xf32> to vector<8x16xbf16>
    %c0_28 = arith.constant 0 : index
    %c0_29 = arith.constant 0 : index
    %101 = vector.load %arg5[%c0_28, %c0_29] : memref<16x128xbf16, #tpu.memory_space<vmem>>, vector<16x128xbf16>
    %cst_30 = arith.constant dense<0.000000e+00> : vector<8x128xf32>
    %102 = tpu.matmul %100, %101, %cst_30 {dimension_numbers = #tpu.dot_dimension_numbers<[1], [0], [0], [1], [0, 0, 1, 1], [], []>} : vector<8x16xbf16>, vector<16x128xbf16>, vector<8x128xf32> -> vector<8x128xf32>
    %c0_31 = arith.constant 0 : index
    %c0_32 = arith.constant 0 : index
    %103 = vector.load %arg6[%c0_31, %c0_32] : memref<1x128xf32, #tpu.memory_space<vmem>>, vector<1x128xf32>
    %104 = vector.broadcast %103 : vector<1x128xf32> to vector<8x128xf32>
    %105 = arith.addf %102, %104 : vector<8x128xf32>
    %106 = vector.broadcast %0 : vector<8x1xf32> to vector<8x128xf32>
    %107 = arith.mulf %105, %106 : vector<8x128xf32>
    %c0_33 = arith.constant 0 : index
    %c0_34 = arith.constant 0 : index
    %108 = vector.load %arg2[%c0_33, %c0_34] : memref<8x128xf32, #tpu.memory_space<vmem>>, vector<8x128xf32>
    %109 = arith.truncf %107 : vector<8x128xf32> to vector<8x128xbf16>
    %c0_35 = arith.constant 0 : index
    %c0_36 = arith.constant 0 : index
    %c0_37 = arith.constant 0 : index
    %110 = vector.load %arg7[%c0_35, %c0_36, %c0_37] : memref<2x128x256xbf16, #tpu.memory_space<vmem>>, vector<1x128x256xbf16>
    %111 = vector.shape_cast %110 : vector<1x128x256xbf16> to vector<128x256xbf16>
    %cst_38 = arith.constant dense<0.000000e+00> : vector<8x256xf32>
    %112 = tpu.matmul %109, %111, %cst_38 {dimension_numbers = #tpu.dot_dimension_numbers<[1], [0], [0], [1], [0, 0, 1, 1], [], []>} : vector<8x128xbf16>, vector<128x256xbf16>, vector<8x256xf32> -> vector<8x256xf32>
    %113 = arith.truncf %108 : vector<8x128xf32> to vector<8x128xbf16>
    %c0_39 = arith.constant 0 : index
    %c0_40 = arith.constant 0 : index
    %c0_41 = arith.constant 0 : index
    %114 = vector.load %arg8[%c0_39, %c0_40, %c0_41] : memref<2x128x256xbf16, #tpu.memory_space<vmem>>, vector<1x128x256xbf16>
    %115 = vector.shape_cast %114 : vector<1x128x256xbf16> to vector<128x256xbf16>
    %cst_42 = arith.constant dense<0.000000e+00> : vector<8x256xf32>
    %116 = tpu.matmul %113, %115, %cst_42 {dimension_numbers = #tpu.dot_dimension_numbers<[1], [0], [0], [1], [0, 0, 1, 1], [], []>} : vector<8x128xbf16>, vector<128x256xbf16>, vector<8x256xf32> -> vector<8x256xf32>
    %117 = vector.extract_strided_slice %112 {offsets = [0, 0], sizes = [8, 128], strides = [1, 1]} : vector<8x256xf32> to vector<8x128xf32>
    %118 = arith.truncf %117 : vector<8x128xf32> to vector<8x128xbf16>
    %119 = vector.extract_strided_slice %112 {offsets = [0, 128], sizes = [8, 128], strides = [1, 1]} : vector<8x256xf32> to vector<8x128xf32>
    %120 = vector.extract_strided_slice %116 {offsets = [0, 0], sizes = [8, 128], strides = [1, 1]} : vector<8x256xf32> to vector<8x128xf32>
    %121 = arith.truncf %120 : vector<8x128xf32> to vector<8x128xbf16>
    %122 = vector.extract_strided_slice %116 {offsets = [0, 128], sizes = [8, 128], strides = [1, 1]} : vector<8x256xf32> to vector<8x128xf32>
    %cst_43 = arith.constant dense<0.000000e+00> : vector<8x8xf32>
    %123 = tpu.matmul %118, %121, %cst_43 {dimension_numbers = #tpu.dot_dimension_numbers<[1], [1], [0], [0], [0, 0, 1, 0], [], []>} : vector<8x128xbf16>, vector<8x128xbf16>, vector<8x8xf32> -> vector<8x8xf32>
    %cst_44 = arith.constant dense<0.000000e+00> : vector<8x8xf32>
    %124 = tpu.matmul %121, %118, %cst_44 {dimension_numbers = #tpu.dot_dimension_numbers<[1], [1], [0], [0], [0, 0, 1, 0], [], []>} : vector<8x128xbf16>, vector<8x128xbf16>, vector<8x8xf32> -> vector<8x8xf32>
    %125 = vector.broadcast %4 : vector<1x8xf32> to vector<8x8xf32>
    %126 = arith.addf %123, %125 : vector<8x8xf32>
    %cst_45 = arith.constant dense<0xFF800000> : vector<8xf32>
    %127 = vector.multi_reduction <maximumf>, %126, %cst_45 [1] : vector<8x8xf32> to vector<8xf32>
    %128 = vector.shape_cast %127 : vector<8xf32> to vector<8x1xf32>
    %129 = vector.broadcast %128 : vector<8x1xf32> to vector<8x8xf32>
    %130 = arith.subf %126, %129 : vector<8x8xf32>
    %131 = math.exp %130 : vector<8x8xf32>
    %cst_46 = arith.constant dense<0.000000e+00> : vector<8xf32>
    %132 = vector.multi_reduction <add>, %131, %cst_46 [1] : vector<8x8xf32> to vector<8xf32>
    %133 = vector.shape_cast %132 : vector<8xf32> to vector<8x1xf32>
    %134 = tpu.reciprocal %133 {approx = true} : vector<8x1xf32> -> vector<8x1xf32>
    %135 = vector.broadcast %134 : vector<8x1xf32> to vector<8x8xf32>
    %136 = arith.mulf %131, %135 : vector<8x8xf32>
    %137 = arith.truncf %136 : vector<8x8xf32> to vector<8x8xbf16>
    %138 = arith.truncf %122 : vector<8x128xf32> to vector<8x128xbf16>
    %cst_47 = arith.constant dense<0.000000e+00> : vector<8x128xf32>
    %139 = tpu.matmul %137, %138, %cst_47 {dimension_numbers = #tpu.dot_dimension_numbers<[1], [0], [0], [1], [0, 0, 1, 1], [], []>} : vector<8x8xbf16>, vector<8x128xbf16>, vector<8x128xf32> -> vector<8x128xf32>
    %140 = vector.broadcast %4 : vector<1x8xf32> to vector<8x8xf32>
    %141 = arith.addf %124, %140 : vector<8x8xf32>
    %cst_48 = arith.constant dense<0xFF800000> : vector<8xf32>
    %142 = vector.multi_reduction <maximumf>, %141, %cst_48 [1] : vector<8x8xf32> to vector<8xf32>
    %143 = vector.shape_cast %142 : vector<8xf32> to vector<8x1xf32>
    %144 = vector.broadcast %143 : vector<8x1xf32> to vector<8x8xf32>
    %145 = arith.subf %141, %144 : vector<8x8xf32>
    %146 = math.exp %145 : vector<8x8xf32>
    %cst_49 = arith.constant dense<0.000000e+00> : vector<8xf32>
    %147 = vector.multi_reduction <add>, %146, %cst_49 [1] : vector<8x8xf32> to vector<8xf32>
    %148 = vector.shape_cast %147 : vector<8xf32> to vector<8x1xf32>
    %149 = tpu.reciprocal %148 {approx = true} : vector<8x1xf32> -> vector<8x1xf32>
    %150 = vector.broadcast %149 : vector<8x1xf32> to vector<8x8xf32>
    %151 = arith.mulf %146, %150 : vector<8x8xf32>
    %152 = arith.truncf %151 : vector<8x8xf32> to vector<8x8xbf16>
    %153 = arith.truncf %119 : vector<8x128xf32> to vector<8x128xbf16>
    %cst_50 = arith.constant dense<0.000000e+00> : vector<8x128xf32>
    %154 = tpu.matmul %152, %153, %cst_50 {dimension_numbers = #tpu.dot_dimension_numbers<[1], [0], [0], [1], [0, 0, 1, 1], [], []>} : vector<8x8xbf16>, vector<8x128xbf16>, vector<8x128xf32> -> vector<8x128xf32>
    %c4_i32_51 = arith.constant 4 : i32
    %155 = tpu.dynamic_rotate %154 by %c4_i32_51 dim 0 : vector<8x128xf32>, i32 -> vector<8x128xf32>
    %156 = vector.broadcast %16 : vector<8x1xf32> to vector<8x128xf32>
    %157 = arith.mulf %155, %156 : vector<8x128xf32>
    %158 = arith.truncf %157 : vector<8x128xf32> to vector<8x128xbf16>
    %c9 = arith.constant 9 : index
    %c0_52 = arith.constant 0 : index
    %c0_53 = arith.constant 0 : index
    %159 = vector.load %arg9[%c9, %c0_52, %c0_53] : memref<36x128x128xbf16, #tpu.memory_space<vmem>>, vector<1x128x128xbf16>
    %160 = vector.shape_cast %159 : vector<1x128x128xbf16> to vector<128x128xbf16>
    %cst_54 = arith.constant dense<0.000000e+00> : vector<8x128xf32>
    %161 = tpu.matmul %158, %160, %cst_54 {dimension_numbers = #tpu.dot_dimension_numbers<[1], [0], [0], [1], [0, 0, 1, 1], [], []>} : vector<8x128xbf16>, vector<128x128xbf16>, vector<8x128xf32> -> vector<8x128xf32>
    %c3_i32_55 = arith.constant 3 : i32
    %162 = tpu.dynamic_rotate %154 by %c3_i32_55 dim 0 : vector<8x128xf32>, i32 -> vector<8x128xf32>
    %163 = vector.broadcast %27 : vector<8x1xf32> to vector<8x128xf32>
    %164 = arith.mulf %162, %163 : vector<8x128xf32>
    %165 = arith.truncf %164 : vector<8x128xf32> to vector<8x128xbf16>
    %c10 = arith.constant 10 : index
    %c0_56 = arith.constant 0 : index
    %c0_57 = arith.constant 0 : index
    %166 = vector.load %arg9[%c10, %c0_56, %c0_57] : memref<36x128x128xbf16, #tpu.memory_space<vmem>>, vector<1x128x128xbf16>
    %167 = vector.shape_cast %166 : vector<1x128x128xbf16> to vector<128x128xbf16>
    %cst_58 = arith.constant dense<0.000000e+00> : vector<8x128xf32>
    %168 = tpu.matmul %165, %167, %cst_58 {dimension_numbers = #tpu.dot_dimension_numbers<[1], [0], [0], [1], [0, 0, 1, 1], [], []>} : vector<8x128xbf16>, vector<128x128xbf16>, vector<8x128xf32> -> vector<8x128xf32>
    %169 = arith.addf %161, %168 : vector<8x128xf32>
    %c2_i32_59 = arith.constant 2 : i32
    %170 = tpu.dynamic_rotate %154 by %c2_i32_59 dim 0 : vector<8x128xf32>, i32 -> vector<8x128xf32>
    %171 = vector.broadcast %38 : vector<8x1xf32> to vector<8x128xf32>
    %172 = arith.mulf %170, %171 : vector<8x128xf32>
    %173 = arith.truncf %172 : vector<8x128xf32> to vector<8x128xbf16>
    %c11 = arith.constant 11 : index
    %c0_60 = arith.constant 0 : index
    %c0_61 = arith.constant 0 : index
    %174 = vector.load %arg9[%c11, %c0_60, %c0_61] : memref<36x128x128xbf16, #tpu.memory_space<vmem>>, vector<1x128x128xbf16>
    %175 = vector.shape_cast %174 : vector<1x128x128xbf16> to vector<128x128xbf16>
    %cst_62 = arith.constant dense<0.000000e+00> : vector<8x128xf32>
    %176 = tpu.matmul %173, %175, %cst_62 {dimension_numbers = #tpu.dot_dimension_numbers<[1], [0], [0], [1], [0, 0, 1, 1], [], []>} : vector<8x128xbf16>, vector<128x128xbf16>, vector<8x128xf32> -> vector<8x128xf32>
    %177 = arith.addf %169, %176 : vector<8x128xf32>
    %c1_i32_63 = arith.constant 1 : i32
    %178 = tpu.dynamic_rotate %154 by %c1_i32_63 dim 0 : vector<8x128xf32>, i32 -> vector<8x128xf32>
    %179 = vector.broadcast %49 : vector<8x1xf32> to vector<8x128xf32>
    %180 = arith.mulf %178, %179 : vector<8x128xf32>
    %181 = arith.truncf %180 : vector<8x128xf32> to vector<8x128xbf16>
    %c12 = arith.constant 12 : index
    %c0_64 = arith.constant 0 : index
    %c0_65 = arith.constant 0 : index
    %182 = vector.load %arg9[%c12, %c0_64, %c0_65] : memref<36x128x128xbf16, #tpu.memory_space<vmem>>, vector<1x128x128xbf16>
    %183 = vector.shape_cast %182 : vector<1x128x128xbf16> to vector<128x128xbf16>
    %cst_66 = arith.constant dense<0.000000e+00> : vector<8x128xf32>
    %184 = tpu.matmul %181, %183, %cst_66 {dimension_numbers = #tpu.dot_dimension_numbers<[1], [0], [0], [1], [0, 0, 1, 1], [], []>} : vector<8x128xbf16>, vector<128x128xbf16>, vector<8x128xf32> -> vector<8x128xf32>
    %185 = arith.addf %177, %184 : vector<8x128xf32>
    %186 = arith.truncf %154 : vector<8x128xf32> to vector<8x128xbf16>
    %c13 = arith.constant 13 : index
    %c0_67 = arith.constant 0 : index
    %c0_68 = arith.constant 0 : index
    %187 = vector.load %arg9[%c13, %c0_67, %c0_68] : memref<36x128x128xbf16, #tpu.memory_space<vmem>>, vector<1x128x128xbf16>
    %188 = vector.shape_cast %187 : vector<1x128x128xbf16> to vector<128x128xbf16>
    %cst_69 = arith.constant dense<0.000000e+00> : vector<8x128xf32>
    %189 = tpu.matmul %186, %188, %cst_69 {dimension_numbers = #tpu.dot_dimension_numbers<[1], [0], [0], [1], [0, 0, 1, 1], [], []>} : vector<8x128xbf16>, vector<128x128xbf16>, vector<8x128xf32> -> vector<8x128xf32>
    %190 = arith.addf %185, %189 : vector<8x128xf32>
    %c7_i32 = arith.constant 7 : i32
    %191 = tpu.dynamic_rotate %154 by %c7_i32 dim 0 : vector<8x128xf32>, i32 -> vector<8x128xf32>
    %192 = vector.broadcast %60 : vector<8x1xf32> to vector<8x128xf32>
    %193 = arith.mulf %191, %192 : vector<8x128xf32>
    %194 = arith.truncf %193 : vector<8x128xf32> to vector<8x128xbf16>
    %c14 = arith.constant 14 : index
    %c0_70 = arith.constant 0 : index
    %c0_71 = arith.constant 0 : index
    %195 = vector.load %arg9[%c14, %c0_70, %c0_71] : memref<36x128x128xbf16, #tpu.memory_space<vmem>>, vector<1x128x128xbf16>
    %196 = vector.shape_cast %195 : vector<1x128x128xbf16> to vector<128x128xbf16>
    %cst_72 = arith.constant dense<0.000000e+00> : vector<8x128xf32>
    %197 = tpu.matmul %194, %196, %cst_72 {dimension_numbers = #tpu.dot_dimension_numbers<[1], [0], [0], [1], [0, 0, 1, 1], [], []>} : vector<8x128xbf16>, vector<128x128xbf16>, vector<8x128xf32> -> vector<8x128xf32>
    %198 = arith.addf %190, %197 : vector<8x128xf32>
    %c6_i32 = arith.constant 6 : i32
    %199 = tpu.dynamic_rotate %154 by %c6_i32 dim 0 : vector<8x128xf32>, i32 -> vector<8x128xf32>
    %200 = vector.broadcast %71 : vector<8x1xf32> to vector<8x128xf32>
    %201 = arith.mulf %199, %200 : vector<8x128xf32>
    %202 = arith.truncf %201 : vector<8x128xf32> to vector<8x128xbf16>
    %c15 = arith.constant 15 : index
    %c0_73 = arith.constant 0 : index
    %c0_74 = arith.constant 0 : index
    %203 = vector.load %arg9[%c15, %c0_73, %c0_74] : memref<36x128x128xbf16, #tpu.memory_space<vmem>>, vector<1x128x128xbf16>
    %204 = vector.shape_cast %203 : vector<1x128x128xbf16> to vector<128x128xbf16>
    %cst_75 = arith.constant dense<0.000000e+00> : vector<8x128xf32>
    %205 = tpu.matmul %202, %204, %cst_75 {dimension_numbers = #tpu.dot_dimension_numbers<[1], [0], [0], [1], [0, 0, 1, 1], [], []>} : vector<8x128xbf16>, vector<128x128xbf16>, vector<8x128xf32> -> vector<8x128xf32>
    %206 = arith.addf %198, %205 : vector<8x128xf32>
    %c5_i32 = arith.constant 5 : i32
    %207 = tpu.dynamic_rotate %154 by %c5_i32 dim 0 : vector<8x128xf32>, i32 -> vector<8x128xf32>
    %208 = vector.broadcast %82 : vector<8x1xf32> to vector<8x128xf32>
    %209 = arith.mulf %207, %208 : vector<8x128xf32>
    %210 = arith.truncf %209 : vector<8x128xf32> to vector<8x128xbf16>
    %c16 = arith.constant 16 : index
    %c0_76 = arith.constant 0 : index
    %c0_77 = arith.constant 0 : index
    %211 = vector.load %arg9[%c16, %c0_76, %c0_77] : memref<36x128x128xbf16, #tpu.memory_space<vmem>>, vector<1x128x128xbf16>
    %212 = vector.shape_cast %211 : vector<1x128x128xbf16> to vector<128x128xbf16>
    %cst_78 = arith.constant dense<0.000000e+00> : vector<8x128xf32>
    %213 = tpu.matmul %210, %212, %cst_78 {dimension_numbers = #tpu.dot_dimension_numbers<[1], [0], [0], [1], [0, 0, 1, 1], [], []>} : vector<8x128xbf16>, vector<128x128xbf16>, vector<8x128xf32> -> vector<8x128xf32>
    %214 = arith.addf %206, %213 : vector<8x128xf32>
    %c4_i32_79 = arith.constant 4 : i32
    %215 = tpu.dynamic_rotate %154 by %c4_i32_79 dim 0 : vector<8x128xf32>, i32 -> vector<8x128xf32>
    %216 = vector.broadcast %93 : vector<8x1xf32> to vector<8x128xf32>
    %217 = arith.mulf %215, %216 : vector<8x128xf32>
    %218 = arith.truncf %217 : vector<8x128xf32> to vector<8x128xbf16>
    %c17 = arith.constant 17 : index
    %c0_80 = arith.constant 0 : index
    %c0_81 = arith.constant 0 : index
    %219 = vector.load %arg9[%c17, %c0_80, %c0_81] : memref<36x128x128xbf16, #tpu.memory_space<vmem>>, vector<1x128x128xbf16>
    %220 = vector.shape_cast %219 : vector<1x128x128xbf16> to vector<128x128xbf16>
    %cst_82 = arith.constant dense<0.000000e+00> : vector<8x128xf32>
    %221 = tpu.matmul %218, %220, %cst_82 {dimension_numbers = #tpu.dot_dimension_numbers<[1], [0], [0], [1], [0, 0, 1, 1], [], []>} : vector<8x128xbf16>, vector<128x128xbf16>, vector<8x128xf32> -> vector<8x128xf32>
    %222 = arith.addf %214, %221 : vector<8x128xf32>
    %c1 = arith.constant 1 : index
    %c0_83 = arith.constant 0 : index
    %c0_84 = arith.constant 0 : index
    %223 = vector.load %arg10[%c1, %c0_83, %c0_84] : memref<4x1x128xf32, #tpu.memory_space<vmem>>, vector<1x1x128xf32>
    %224 = vector.shape_cast %223 : vector<1x1x128xf32> to vector<1x128xf32>
    %225 = vector.broadcast %224 : vector<1x128xf32> to vector<8x128xf32>
    %226 = arith.addf %222, %225 : vector<8x128xf32>
    %cst_85 = arith.constant 0.000000e+00 : f32
    %227 = vector.broadcast %cst_85 : f32 to vector<8x128xf32>
    %228 = arith.maximumf %226, %227 : vector<8x128xf32>
    %229 = arith.truncf %228 : vector<8x128xf32> to vector<8x128xbf16>
    %c1_86 = arith.constant 1 : index
    %c0_87 = arith.constant 0 : index
    %c0_88 = arith.constant 0 : index
    %230 = vector.load %arg11[%c1_86, %c0_87, %c0_88] : memref<4x128x128xbf16, #tpu.memory_space<vmem>>, vector<1x128x128xbf16>
    %231 = vector.shape_cast %230 : vector<1x128x128xbf16> to vector<128x128xbf16>
    %cst_89 = arith.constant dense<0.000000e+00> : vector<8x128xf32>
    %232 = tpu.matmul %229, %231, %cst_89 {dimension_numbers = #tpu.dot_dimension_numbers<[1], [0], [0], [1], [0, 0, 1, 1], [], []>} : vector<8x128xbf16>, vector<128x128xbf16>, vector<8x128xf32> -> vector<8x128xf32>
    %c1_90 = arith.constant 1 : index
    %c0_91 = arith.constant 0 : index
    %c0_92 = arith.constant 0 : index
    %233 = vector.load %arg12[%c1_90, %c0_91, %c0_92] : memref<4x1x128xf32, #tpu.memory_space<vmem>>, vector<1x1x128xf32>
    %234 = vector.shape_cast %233 : vector<1x1x128xf32> to vector<1x128xf32>
    %235 = vector.broadcast %234 : vector<1x128xf32> to vector<8x128xf32>
    %236 = arith.addf %232, %235 : vector<8x128xf32>
    %237 = arith.addf %236, %154 : vector<8x128xf32>
    %238 = vector.broadcast %98 : vector<1x128xf32> to vector<8x128xf32>
    %239 = arith.mulf %237, %238 : vector<8x128xf32>
    %cst_93 = arith.constant dense<0.000000e+00> : vector<8xf32>
    %240 = vector.multi_reduction <add>, %239, %cst_93 [1] : vector<8x128xf32> to vector<8xf32>
    %241 = vector.shape_cast %240 : vector<8xf32> to vector<8x1xf32>
    %cst_94 = arith.constant 3.125000e-02 : f32
    %242 = vector.broadcast %cst_94 : f32 to vector<8x1xf32>
    %243 = arith.mulf %241, %242 : vector<8x1xf32>
    %244 = vector.broadcast %243 : vector<8x1xf32> to vector<8x128xf32>
    %245 = arith.subf %237, %244 : vector<8x128xf32>
    %246 = vector.broadcast %98 : vector<1x128xf32> to vector<8x128xf32>
    %247 = arith.mulf %245, %246 : vector<8x128xf32>
    %248 = arith.mulf %247, %247 : vector<8x128xf32>
    %cst_95 = arith.constant dense<0.000000e+00> : vector<8xf32>
    %249 = vector.multi_reduction <add>, %248, %cst_95 [1] : vector<8x128xf32> to vector<8xf32>
    %250 = vector.shape_cast %249 : vector<8xf32> to vector<8x1xf32>
    %cst_96 = arith.constant 3.125000e-02 : f32
    %251 = vector.broadcast %cst_96 : f32 to vector<8x1xf32>
    %252 = arith.mulf %250, %251 : vector<8x1xf32>
    %cst_97 = arith.constant 9.99999974E-6 : f32
    %253 = vector.broadcast %cst_97 : f32 to vector<8x1xf32>
    %254 = arith.addf %252, %253 : vector<8x1xf32>
    %255 = math.rsqrt %254 : vector<8x1xf32>
    %256 = vector.broadcast %255 : vector<8x1xf32> to vector<8x128xf32>
    %257 = arith.mulf %247, %256 : vector<8x128xf32>
    %c1_98 = arith.constant 1 : index
    %c0_99 = arith.constant 0 : index
    %c0_100 = arith.constant 0 : index
    %258 = vector.load %arg13[%c1_98, %c0_99, %c0_100] : memref<4x1x128xf32, #tpu.memory_space<vmem>>, vector<1x1x128xf32>
    %259 = vector.shape_cast %258 : vector<1x1x128xf32> to vector<1x128xf32>
    %260 = vector.broadcast %259 : vector<1x128xf32> to vector<8x128xf32>
    %261 = arith.mulf %257, %260 : vector<8x128xf32>
    %c1_101 = arith.constant 1 : index
    %c0_102 = arith.constant 0 : index
    %c0_103 = arith.constant 0 : index
    %262 = vector.load %arg14[%c1_101, %c0_102, %c0_103] : memref<4x1x128xf32, #tpu.memory_space<vmem>>, vector<1x1x128xf32>
    %263 = vector.shape_cast %262 : vector<1x1x128xf32> to vector<1x128xf32>
    %264 = vector.broadcast %263 : vector<1x128xf32> to vector<8x128xf32>
    %265 = arith.addf %261, %264 : vector<8x128xf32>
    %266 = arith.addf %265, %108 : vector<8x128xf32>
    %c4_i32_104 = arith.constant 4 : i32
    %267 = tpu.dynamic_rotate %139 by %c4_i32_104 dim 0 : vector<8x128xf32>, i32 -> vector<8x128xf32>
    %268 = vector.broadcast %16 : vector<8x1xf32> to vector<8x128xf32>
    %269 = arith.mulf %267, %268 : vector<8x128xf32>
    %270 = arith.truncf %269 : vector<8x128xf32> to vector<8x128xbf16>
    %c0_105 = arith.constant 0 : index
    %c0_106 = arith.constant 0 : index
    %c0_107 = arith.constant 0 : index
    %271 = vector.load %arg9[%c0_105, %c0_106, %c0_107] : memref<36x128x128xbf16, #tpu.memory_space<vmem>>, vector<1x128x128xbf16>
    %272 = vector.shape_cast %271 : vector<1x128x128xbf16> to vector<128x128xbf16>
    %cst_108 = arith.constant dense<0.000000e+00> : vector<8x128xf32>
    %273 = tpu.matmul %270, %272, %cst_108 {dimension_numbers = #tpu.dot_dimension_numbers<[1], [0], [0], [1], [0, 0, 1, 1], [], []>} : vector<8x128xbf16>, vector<128x128xbf16>, vector<8x128xf32> -> vector<8x128xf32>
    %c3_i32_109 = arith.constant 3 : i32
    %274 = tpu.dynamic_rotate %139 by %c3_i32_109 dim 0 : vector<8x128xf32>, i32 -> vector<8x128xf32>
    %275 = vector.broadcast %27 : vector<8x1xf32> to vector<8x128xf32>
    %276 = arith.mulf %274, %275 : vector<8x128xf32>
    %277 = arith.truncf %276 : vector<8x128xf32> to vector<8x128xbf16>
    %c1_110 = arith.constant 1 : index
    %c0_111 = arith.constant 0 : index
    %c0_112 = arith.constant 0 : index
    %278 = vector.load %arg9[%c1_110, %c0_111, %c0_112] : memref<36x128x128xbf16, #tpu.memory_space<vmem>>, vector<1x128x128xbf16>
    %279 = vector.shape_cast %278 : vector<1x128x128xbf16> to vector<128x128xbf16>
    %cst_113 = arith.constant dense<0.000000e+00> : vector<8x128xf32>
    %280 = tpu.matmul %277, %279, %cst_113 {dimension_numbers = #tpu.dot_dimension_numbers<[1], [0], [0], [1], [0, 0, 1, 1], [], []>} : vector<8x128xbf16>, vector<128x128xbf16>, vector<8x128xf32> -> vector<8x128xf32>
    %281 = arith.addf %273, %280 : vector<8x128xf32>
    %c2_i32_114 = arith.constant 2 : i32
    %282 = tpu.dynamic_rotate %139 by %c2_i32_114 dim 0 : vector<8x128xf32>, i32 -> vector<8x128xf32>
    %283 = vector.broadcast %38 : vector<8x1xf32> to vector<8x128xf32>
    %284 = arith.mulf %282, %283 : vector<8x128xf32>
    %285 = arith.truncf %284 : vector<8x128xf32> to vector<8x128xbf16>
    %c2 = arith.constant 2 : index
    %c0_115 = arith.constant 0 : index
    %c0_116 = arith.constant 0 : index
    %286 = vector.load %arg9[%c2, %c0_115, %c0_116] : memref<36x128x128xbf16, #tpu.memory_space<vmem>>, vector<1x128x128xbf16>
    %287 = vector.shape_cast %286 : vector<1x128x128xbf16> to vector<128x128xbf16>
    %cst_117 = arith.constant dense<0.000000e+00> : vector<8x128xf32>
    %288 = tpu.matmul %285, %287, %cst_117 {dimension_numbers = #tpu.dot_dimension_numbers<[1], [0], [0], [1], [0, 0, 1, 1], [], []>} : vector<8x128xbf16>, vector<128x128xbf16>, vector<8x128xf32> -> vector<8x128xf32>
    %289 = arith.addf %281, %288 : vector<8x128xf32>
    %c1_i32_118 = arith.constant 1 : i32
    %290 = tpu.dynamic_rotate %139 by %c1_i32_118 dim 0 : vector<8x128xf32>, i32 -> vector<8x128xf32>
    %291 = vector.broadcast %49 : vector<8x1xf32> to vector<8x128xf32>
    %292 = arith.mulf %290, %291 : vector<8x128xf32>
    %293 = arith.truncf %292 : vector<8x128xf32> to vector<8x128xbf16>
    %c3 = arith.constant 3 : index
    %c0_119 = arith.constant 0 : index
    %c0_120 = arith.constant 0 : index
    %294 = vector.load %arg9[%c3, %c0_119, %c0_120] : memref<36x128x128xbf16, #tpu.memory_space<vmem>>, vector<1x128x128xbf16>
    %295 = vector.shape_cast %294 : vector<1x128x128xbf16> to vector<128x128xbf16>
    %cst_121 = arith.constant dense<0.000000e+00> : vector<8x128xf32>
    %296 = tpu.matmul %293, %295, %cst_121 {dimension_numbers = #tpu.dot_dimension_numbers<[1], [0], [0], [1], [0, 0, 1, 1], [], []>} : vector<8x128xbf16>, vector<128x128xbf16>, vector<8x128xf32> -> vector<8x128xf32>
    %297 = arith.addf %289, %296 : vector<8x128xf32>
    %298 = arith.truncf %139 : vector<8x128xf32> to vector<8x128xbf16>
    %c4 = arith.constant 4 : index
    %c0_122 = arith.constant 0 : index
    %c0_123 = arith.constant 0 : index
    %299 = vector.load %arg9[%c4, %c0_122, %c0_123] : memref<36x128x128xbf16, #tpu.memory_space<vmem>>, vector<1x128x128xbf16>
    %300 = vector.shape_cast %299 : vector<1x128x128xbf16> to vector<128x128xbf16>
    %cst_124 = arith.constant dense<0.000000e+00> : vector<8x128xf32>
    %301 = tpu.matmul %298, %300, %cst_124 {dimension_numbers = #tpu.dot_dimension_numbers<[1], [0], [0], [1], [0, 0, 1, 1], [], []>} : vector<8x128xbf16>, vector<128x128xbf16>, vector<8x128xf32> -> vector<8x128xf32>
    %302 = arith.addf %297, %301 : vector<8x128xf32>
    %c7_i32_125 = arith.constant 7 : i32
    %303 = tpu.dynamic_rotate %139 by %c7_i32_125 dim 0 : vector<8x128xf32>, i32 -> vector<8x128xf32>
    %304 = vector.broadcast %60 : vector<8x1xf32> to vector<8x128xf32>
    %305 = arith.mulf %303, %304 : vector<8x128xf32>
    %306 = arith.truncf %305 : vector<8x128xf32> to vector<8x128xbf16>
    %c5 = arith.constant 5 : index
    %c0_126 = arith.constant 0 : index
    %c0_127 = arith.constant 0 : index
    %307 = vector.load %arg9[%c5, %c0_126, %c0_127] : memref<36x128x128xbf16, #tpu.memory_space<vmem>>, vector<1x128x128xbf16>
    %308 = vector.shape_cast %307 : vector<1x128x128xbf16> to vector<128x128xbf16>
    %cst_128 = arith.constant dense<0.000000e+00> : vector<8x128xf32>
    %309 = tpu.matmul %306, %308, %cst_128 {dimension_numbers = #tpu.dot_dimension_numbers<[1], [0], [0], [1], [0, 0, 1, 1], [], []>} : vector<8x128xbf16>, vector<128x128xbf16>, vector<8x128xf32> -> vector<8x128xf32>
    %310 = arith.addf %302, %309 : vector<8x128xf32>
    %c6_i32_129 = arith.constant 6 : i32
    %311 = tpu.dynamic_rotate %139 by %c6_i32_129 dim 0 : vector<8x128xf32>, i32 -> vector<8x128xf32>
    %312 = vector.broadcast %71 : vector<8x1xf32> to vector<8x128xf32>
    %313 = arith.mulf %311, %312 : vector<8x128xf32>
    %314 = arith.truncf %313 : vector<8x128xf32> to vector<8x128xbf16>
    %c6 = arith.constant 6 : index
    %c0_130 = arith.constant 0 : index
    %c0_131 = arith.constant 0 : index
    %315 = vector.load %arg9[%c6, %c0_130, %c0_131] : memref<36x128x128xbf16, #tpu.memory_space<vmem>>, vector<1x128x128xbf16>
    %316 = vector.shape_cast %315 : vector<1x128x128xbf16> to vector<128x128xbf16>
    %cst_132 = arith.constant dense<0.000000e+00> : vector<8x128xf32>
    %317 = tpu.matmul %314, %316, %cst_132 {dimension_numbers = #tpu.dot_dimension_numbers<[1], [0], [0], [1], [0, 0, 1, 1], [], []>} : vector<8x128xbf16>, vector<128x128xbf16>, vector<8x128xf32> -> vector<8x128xf32>
    %318 = arith.addf %310, %317 : vector<8x128xf32>
    %c5_i32_133 = arith.constant 5 : i32
    %319 = tpu.dynamic_rotate %139 by %c5_i32_133 dim 0 : vector<8x128xf32>, i32 -> vector<8x128xf32>
    %320 = vector.broadcast %82 : vector<8x1xf32> to vector<8x128xf32>
    %321 = arith.mulf %319, %320 : vector<8x128xf32>
    %322 = arith.truncf %321 : vector<8x128xf32> to vector<8x128xbf16>
    %c7 = arith.constant 7 : index
    %c0_134 = arith.constant 0 : index
    %c0_135 = arith.constant 0 : index
    %323 = vector.load %arg9[%c7, %c0_134, %c0_135] : memref<36x128x128xbf16, #tpu.memory_space<vmem>>, vector<1x128x128xbf16>
    %324 = vector.shape_cast %323 : vector<1x128x128xbf16> to vector<128x128xbf16>
    %cst_136 = arith.constant dense<0.000000e+00> : vector<8x128xf32>
    %325 = tpu.matmul %322, %324, %cst_136 {dimension_numbers = #tpu.dot_dimension_numbers<[1], [0], [0], [1], [0, 0, 1, 1], [], []>} : vector<8x128xbf16>, vector<128x128xbf16>, vector<8x128xf32> -> vector<8x128xf32>
    %326 = arith.addf %318, %325 : vector<8x128xf32>
    %c4_i32_137 = arith.constant 4 : i32
    %327 = tpu.dynamic_rotate %139 by %c4_i32_137 dim 0 : vector<8x128xf32>, i32 -> vector<8x128xf32>
    %328 = vector.broadcast %93 : vector<8x1xf32> to vector<8x128xf32>
    %329 = arith.mulf %327, %328 : vector<8x128xf32>
    %330 = arith.truncf %329 : vector<8x128xf32> to vector<8x128xbf16>
    %c8 = arith.constant 8 : index
    %c0_138 = arith.constant 0 : index
    %c0_139 = arith.constant 0 : index
    %331 = vector.load %arg9[%c8, %c0_138, %c0_139] : memref<36x128x128xbf16, #tpu.memory_space<vmem>>, vector<1x128x128xbf16>
    %332 = vector.shape_cast %331 : vector<1x128x128xbf16> to vector<128x128xbf16>
    %cst_140 = arith.constant dense<0.000000e+00> : vector<8x128xf32>
    %333 = tpu.matmul %330, %332, %cst_140 {dimension_numbers = #tpu.dot_dimension_numbers<[1], [0], [0], [1], [0, 0, 1, 1], [], []>} : vector<8x128xbf16>, vector<128x128xbf16>, vector<8x128xf32> -> vector<8x128xf32>
    %334 = arith.addf %326, %333 : vector<8x128xf32>
    %c0_141 = arith.constant 0 : index
    %c0_142 = arith.constant 0 : index
    %c0_143 = arith.constant 0 : index
    %335 = vector.load %arg10[%c0_141, %c0_142, %c0_143] : memref<4x1x128xf32, #tpu.memory_space<vmem>>, vector<1x1x128xf32>
    %336 = vector.shape_cast %335 : vector<1x1x128xf32> to vector<1x128xf32>
    %337 = vector.broadcast %336 : vector<1x128xf32> to vector<8x128xf32>
    %338 = arith.addf %334, %337 : vector<8x128xf32>
    %cst_144 = arith.constant 0.000000e+00 : f32
    %339 = vector.broadcast %cst_144 : f32 to vector<8x128xf32>
    %340 = arith.maximumf %338, %339 : vector<8x128xf32>
    %341 = arith.truncf %340 : vector<8x128xf32> to vector<8x128xbf16>
    %c0_145 = arith.constant 0 : index
    %c0_146 = arith.constant 0 : index
    %c0_147 = arith.constant 0 : index
    %342 = vector.load %arg11[%c0_145, %c0_146, %c0_147] : memref<4x128x128xbf16, #tpu.memory_space<vmem>>, vector<1x128x128xbf16>
    %343 = vector.shape_cast %342 : vector<1x128x128xbf16> to vector<128x128xbf16>
    %cst_148 = arith.constant dense<0.000000e+00> : vector<8x128xf32>
    %344 = tpu.matmul %341, %343, %cst_148 {dimension_numbers = #tpu.dot_dimension_numbers<[1], [0], [0], [1], [0, 0, 1, 1], [], []>} : vector<8x128xbf16>, vector<128x128xbf16>, vector<8x128xf32> -> vector<8x128xf32>
    %c0_149 = arith.constant 0 : index
    %c0_150 = arith.constant 0 : index
    %c0_151 = arith.constant 0 : index
    %345 = vector.load %arg12[%c0_149, %c0_150, %c0_151] : memref<4x1x128xf32, #tpu.memory_space<vmem>>, vector<1x1x128xf32>
    %346 = vector.shape_cast %345 : vector<1x1x128xf32> to vector<1x128xf32>
    %347 = vector.broadcast %346 : vector<1x128xf32> to vector<8x128xf32>
    %348 = arith.addf %344, %347 : vector<8x128xf32>
    %349 = arith.addf %348, %139 : vector<8x128xf32>
    %350 = vector.broadcast %98 : vector<1x128xf32> to vector<8x128xf32>
    %351 = arith.mulf %349, %350 : vector<8x128xf32>
    %cst_152 = arith.constant dense<0.000000e+00> : vector<8xf32>
    %352 = vector.multi_reduction <add>, %351, %cst_152 [1] : vector<8x128xf32> to vector<8xf32>
    %353 = vector.shape_cast %352 : vector<8xf32> to vector<8x1xf32>
    %cst_153 = arith.constant 3.125000e-02 : f32
    %354 = vector.broadcast %cst_153 : f32 to vector<8x1xf32>
    %355 = arith.mulf %353, %354 : vector<8x1xf32>
    %356 = vector.broadcast %355 : vector<8x1xf32> to vector<8x128xf32>
    %357 = arith.subf %349, %356 : vector<8x128xf32>
    %358 = vector.broadcast %98 : vector<1x128xf32> to vector<8x128xf32>
    %359 = arith.mulf %357, %358 : vector<8x128xf32>
    %360 = arith.mulf %359, %359 : vector<8x128xf32>
    %cst_154 = arith.constant dense<0.000000e+00> : vector<8xf32>
    %361 = vector.multi_reduction <add>, %360, %cst_154 [1] : vector<8x128xf32> to vector<8xf32>
    %362 = vector.shape_cast %361 : vector<8xf32> to vector<8x1xf32>
    %cst_155 = arith.constant 3.125000e-02 : f32
    %363 = vector.broadcast %cst_155 : f32 to vector<8x1xf32>
    %364 = arith.mulf %362, %363 : vector<8x1xf32>
    %cst_156 = arith.constant 9.99999974E-6 : f32
    %365 = vector.broadcast %cst_156 : f32 to vector<8x1xf32>
    %366 = arith.addf %364, %365 : vector<8x1xf32>
    %367 = math.rsqrt %366 : vector<8x1xf32>
    %368 = vector.broadcast %367 : vector<8x1xf32> to vector<8x128xf32>
    %369 = arith.mulf %359, %368 : vector<8x128xf32>
    %c0_157 = arith.constant 0 : index
    %c0_158 = arith.constant 0 : index
    %c0_159 = arith.constant 0 : index
    %370 = vector.load %arg13[%c0_157, %c0_158, %c0_159] : memref<4x1x128xf32, #tpu.memory_space<vmem>>, vector<1x1x128xf32>
    %371 = vector.shape_cast %370 : vector<1x1x128xf32> to vector<1x128xf32>
    %372 = vector.broadcast %371 : vector<1x128xf32> to vector<8x128xf32>
    %373 = arith.mulf %369, %372 : vector<8x128xf32>
    %c0_160 = arith.constant 0 : index
    %c0_161 = arith.constant 0 : index
    %c0_162 = arith.constant 0 : index
    %374 = vector.load %arg14[%c0_160, %c0_161, %c0_162] : memref<4x1x128xf32, #tpu.memory_space<vmem>>, vector<1x1x128xf32>
    %375 = vector.shape_cast %374 : vector<1x1x128xf32> to vector<1x128xf32>
    %376 = vector.broadcast %375 : vector<1x128xf32> to vector<8x128xf32>
    %377 = arith.addf %373, %376 : vector<8x128xf32>
    %378 = arith.addf %377, %107 : vector<8x128xf32>
    %379 = arith.truncf %378 : vector<8x128xf32> to vector<8x128xbf16>
    %c1_163 = arith.constant 1 : index
    %c0_164 = arith.constant 0 : index
    %c0_165 = arith.constant 0 : index
    %380 = vector.load %arg7[%c1_163, %c0_164, %c0_165] : memref<2x128x256xbf16, #tpu.memory_space<vmem>>, vector<1x128x256xbf16>
    %381 = vector.shape_cast %380 : vector<1x128x256xbf16> to vector<128x256xbf16>
    %cst_166 = arith.constant dense<0.000000e+00> : vector<8x256xf32>
    %382 = tpu.matmul %379, %381, %cst_166 {dimension_numbers = #tpu.dot_dimension_numbers<[1], [0], [0], [1], [0, 0, 1, 1], [], []>} : vector<8x128xbf16>, vector<128x256xbf16>, vector<8x256xf32> -> vector<8x256xf32>
    %383 = arith.truncf %266 : vector<8x128xf32> to vector<8x128xbf16>
    %c1_167 = arith.constant 1 : index
    %c0_168 = arith.constant 0 : index
    %c0_169 = arith.constant 0 : index
    %384 = vector.load %arg8[%c1_167, %c0_168, %c0_169] : memref<2x128x256xbf16, #tpu.memory_space<vmem>>, vector<1x128x256xbf16>
    %385 = vector.shape_cast %384 : vector<1x128x256xbf16> to vector<128x256xbf16>
    %cst_170 = arith.constant dense<0.000000e+00> : vector<8x256xf32>
    %386 = tpu.matmul %383, %385, %cst_170 {dimension_numbers = #tpu.dot_dimension_numbers<[1], [0], [0], [1], [0, 0, 1, 1], [], []>} : vector<8x128xbf16>, vector<128x256xbf16>, vector<8x256xf32> -> vector<8x256xf32>
    %387 = vector.extract_strided_slice %382 {offsets = [0, 0], sizes = [8, 128], strides = [1, 1]} : vector<8x256xf32> to vector<8x128xf32>
    %388 = arith.truncf %387 : vector<8x128xf32> to vector<8x128xbf16>
    %389 = vector.extract_strided_slice %382 {offsets = [0, 128], sizes = [8, 128], strides = [1, 1]} : vector<8x256xf32> to vector<8x128xf32>
    %390 = vector.extract_strided_slice %386 {offsets = [0, 0], sizes = [8, 128], strides = [1, 1]} : vector<8x256xf32> to vector<8x128xf32>
    %391 = arith.truncf %390 : vector<8x128xf32> to vector<8x128xbf16>
    %392 = vector.extract_strided_slice %386 {offsets = [0, 128], sizes = [8, 128], strides = [1, 1]} : vector<8x256xf32> to vector<8x128xf32>
    %cst_171 = arith.constant dense<0.000000e+00> : vector<8x8xf32>
    %393 = tpu.matmul %388, %391, %cst_171 {dimension_numbers = #tpu.dot_dimension_numbers<[1], [1], [0], [0], [0, 0, 1, 0], [], []>} : vector<8x128xbf16>, vector<8x128xbf16>, vector<8x8xf32> -> vector<8x8xf32>
    %cst_172 = arith.constant dense<0.000000e+00> : vector<8x8xf32>
    %394 = tpu.matmul %391, %388, %cst_172 {dimension_numbers = #tpu.dot_dimension_numbers<[1], [1], [0], [0], [0, 0, 1, 0], [], []>} : vector<8x128xbf16>, vector<8x128xbf16>, vector<8x8xf32> -> vector<8x8xf32>
    %395 = vector.broadcast %4 : vector<1x8xf32> to vector<8x8xf32>
    %396 = arith.addf %393, %395 : vector<8x8xf32>
    %cst_173 = arith.constant dense<0xFF800000> : vector<8xf32>
    %397 = vector.multi_reduction <maximumf>, %396, %cst_173 [1] : vector<8x8xf32> to vector<8xf32>
    %398 = vector.shape_cast %397 : vector<8xf32> to vector<8x1xf32>
    %399 = vector.broadcast %398 : vector<8x1xf32> to vector<8x8xf32>
    %400 = arith.subf %396, %399 : vector<8x8xf32>
    %401 = math.exp %400 : vector<8x8xf32>
    %cst_174 = arith.constant dense<0.000000e+00> : vector<8xf32>
    %402 = vector.multi_reduction <add>, %401, %cst_174 [1] : vector<8x8xf32> to vector<8xf32>
    %403 = vector.shape_cast %402 : vector<8xf32> to vector<8x1xf32>
    %404 = tpu.reciprocal %403 {approx = true} : vector<8x1xf32> -> vector<8x1xf32>
    %405 = vector.broadcast %404 : vector<8x1xf32> to vector<8x8xf32>
    %406 = arith.mulf %401, %405 : vector<8x8xf32>
    %407 = arith.truncf %406 : vector<8x8xf32> to vector<8x8xbf16>
    %408 = arith.truncf %392 : vector<8x128xf32> to vector<8x128xbf16>
    %cst_175 = arith.constant dense<0.000000e+00> : vector<8x128xf32>
    %409 = tpu.matmul %407, %408, %cst_175 {dimension_numbers = #tpu.dot_dimension_numbers<[1], [0], [0], [1], [0, 0, 1, 1], [], []>} : vector<8x8xbf16>, vector<8x128xbf16>, vector<8x128xf32> -> vector<8x128xf32>
    %410 = vector.broadcast %4 : vector<1x8xf32> to vector<8x8xf32>
    %411 = arith.addf %394, %410 : vector<8x8xf32>
    %cst_176 = arith.constant dense<0xFF800000> : vector<8xf32>
    %412 = vector.multi_reduction <maximumf>, %411, %cst_176 [1] : vector<8x8xf32> to vector<8xf32>
    %413 = vector.shape_cast %412 : vector<8xf32> to vector<8x1xf32>
    %414 = vector.broadcast %413 : vector<8x1xf32> to vector<8x8xf32>
    %415 = arith.subf %411, %414 : vector<8x8xf32>
    %416 = math.exp %415 : vector<8x8xf32>
    %cst_177 = arith.constant dense<0.000000e+00> : vector<8xf32>
    %417 = vector.multi_reduction <add>, %416, %cst_177 [1] : vector<8x8xf32> to vector<8xf32>
    %418 = vector.shape_cast %417 : vector<8xf32> to vector<8x1xf32>
    %419 = tpu.reciprocal %418 {approx = true} : vector<8x1xf32> -> vector<8x1xf32>
    %420 = vector.broadcast %419 : vector<8x1xf32> to vector<8x8xf32>
    %421 = arith.mulf %416, %420 : vector<8x8xf32>
    %422 = arith.truncf %421 : vector<8x8xf32> to vector<8x8xbf16>
    %423 = arith.truncf %389 : vector<8x128xf32> to vector<8x128xbf16>
    %cst_178 = arith.constant dense<0.000000e+00> : vector<8x128xf32>
    %424 = tpu.matmul %422, %423, %cst_178 {dimension_numbers = #tpu.dot_dimension_numbers<[1], [0], [0], [1], [0, 0, 1, 1], [], []>} : vector<8x8xbf16>, vector<8x128xbf16>, vector<8x128xf32> -> vector<8x128xf32>
    %c4_i32_179 = arith.constant 4 : i32
    %425 = tpu.dynamic_rotate %424 by %c4_i32_179 dim 0 : vector<8x128xf32>, i32 -> vector<8x128xf32>
    %426 = vector.broadcast %16 : vector<8x1xf32> to vector<8x128xf32>
    %427 = arith.mulf %425, %426 : vector<8x128xf32>
    %428 = arith.truncf %427 : vector<8x128xf32> to vector<8x128xbf16>
    %c27 = arith.constant 27 : index
    %c0_180 = arith.constant 0 : index
    %c0_181 = arith.constant 0 : index
    %429 = vector.load %arg9[%c27, %c0_180, %c0_181] : memref<36x128x128xbf16, #tpu.memory_space<vmem>>, vector<1x128x128xbf16>
    %430 = vector.shape_cast %429 : vector<1x128x128xbf16> to vector<128x128xbf16>
    %cst_182 = arith.constant dense<0.000000e+00> : vector<8x128xf32>
    %431 = tpu.matmul %428, %430, %cst_182 {dimension_numbers = #tpu.dot_dimension_numbers<[1], [0], [0], [1], [0, 0, 1, 1], [], []>} : vector<8x128xbf16>, vector<128x128xbf16>, vector<8x128xf32> -> vector<8x128xf32>
    %c3_i32_183 = arith.constant 3 : i32
    %432 = tpu.dynamic_rotate %424 by %c3_i32_183 dim 0 : vector<8x128xf32>, i32 -> vector<8x128xf32>
    %433 = vector.broadcast %27 : vector<8x1xf32> to vector<8x128xf32>
    %434 = arith.mulf %432, %433 : vector<8x128xf32>
    %435 = arith.truncf %434 : vector<8x128xf32> to vector<8x128xbf16>
    %c28 = arith.constant 28 : index
    %c0_184 = arith.constant 0 : index
    %c0_185 = arith.constant 0 : index
    %436 = vector.load %arg9[%c28, %c0_184, %c0_185] : memref<36x128x128xbf16, #tpu.memory_space<vmem>>, vector<1x128x128xbf16>
    %437 = vector.shape_cast %436 : vector<1x128x128xbf16> to vector<128x128xbf16>
    %cst_186 = arith.constant dense<0.000000e+00> : vector<8x128xf32>
    %438 = tpu.matmul %435, %437, %cst_186 {dimension_numbers = #tpu.dot_dimension_numbers<[1], [0], [0], [1], [0, 0, 1, 1], [], []>} : vector<8x128xbf16>, vector<128x128xbf16>, vector<8x128xf32> -> vector<8x128xf32>
    %439 = arith.addf %431, %438 : vector<8x128xf32>
    %c2_i32_187 = arith.constant 2 : i32
    %440 = tpu.dynamic_rotate %424 by %c2_i32_187 dim 0 : vector<8x128xf32>, i32 -> vector<8x128xf32>
    %441 = vector.broadcast %38 : vector<8x1xf32> to vector<8x128xf32>
    %442 = arith.mulf %440, %441 : vector<8x128xf32>
    %443 = arith.truncf %442 : vector<8x128xf32> to vector<8x128xbf16>
    %c29 = arith.constant 29 : index
    %c0_188 = arith.constant 0 : index
    %c0_189 = arith.constant 0 : index
    %444 = vector.load %arg9[%c29, %c0_188, %c0_189] : memref<36x128x128xbf16, #tpu.memory_space<vmem>>, vector<1x128x128xbf16>
    %445 = vector.shape_cast %444 : vector<1x128x128xbf16> to vector<128x128xbf16>
    %cst_190 = arith.constant dense<0.000000e+00> : vector<8x128xf32>
    %446 = tpu.matmul %443, %445, %cst_190 {dimension_numbers = #tpu.dot_dimension_numbers<[1], [0], [0], [1], [0, 0, 1, 1], [], []>} : vector<8x128xbf16>, vector<128x128xbf16>, vector<8x128xf32> -> vector<8x128xf32>
    %447 = arith.addf %439, %446 : vector<8x128xf32>
    %c1_i32_191 = arith.constant 1 : i32
    %448 = tpu.dynamic_rotate %424 by %c1_i32_191 dim 0 : vector<8x128xf32>, i32 -> vector<8x128xf32>
    %449 = vector.broadcast %49 : vector<8x1xf32> to vector<8x128xf32>
    %450 = arith.mulf %448, %449 : vector<8x128xf32>
    %451 = arith.truncf %450 : vector<8x128xf32> to vector<8x128xbf16>
    %c30 = arith.constant 30 : index
    %c0_192 = arith.constant 0 : index
    %c0_193 = arith.constant 0 : index
    %452 = vector.load %arg9[%c30, %c0_192, %c0_193] : memref<36x128x128xbf16, #tpu.memory_space<vmem>>, vector<1x128x128xbf16>
    %453 = vector.shape_cast %452 : vector<1x128x128xbf16> to vector<128x128xbf16>
    %cst_194 = arith.constant dense<0.000000e+00> : vector<8x128xf32>
    %454 = tpu.matmul %451, %453, %cst_194 {dimension_numbers = #tpu.dot_dimension_numbers<[1], [0], [0], [1], [0, 0, 1, 1], [], []>} : vector<8x128xbf16>, vector<128x128xbf16>, vector<8x128xf32> -> vector<8x128xf32>
    %455 = arith.addf %447, %454 : vector<8x128xf32>
    %456 = arith.truncf %424 : vector<8x128xf32> to vector<8x128xbf16>
    %c31 = arith.constant 31 : index
    %c0_195 = arith.constant 0 : index
    %c0_196 = arith.constant 0 : index
    %457 = vector.load %arg9[%c31, %c0_195, %c0_196] : memref<36x128x128xbf16, #tpu.memory_space<vmem>>, vector<1x128x128xbf16>
    %458 = vector.shape_cast %457 : vector<1x128x128xbf16> to vector<128x128xbf16>
    %cst_197 = arith.constant dense<0.000000e+00> : vector<8x128xf32>
    %459 = tpu.matmul %456, %458, %cst_197 {dimension_numbers = #tpu.dot_dimension_numbers<[1], [0], [0], [1], [0, 0, 1, 1], [], []>} : vector<8x128xbf16>, vector<128x128xbf16>, vector<8x128xf32> -> vector<8x128xf32>
    %460 = arith.addf %455, %459 : vector<8x128xf32>
    %c7_i32_198 = arith.constant 7 : i32
    %461 = tpu.dynamic_rotate %424 by %c7_i32_198 dim 0 : vector<8x128xf32>, i32 -> vector<8x128xf32>
    %462 = vector.broadcast %60 : vector<8x1xf32> to vector<8x128xf32>
    %463 = arith.mulf %461, %462 : vector<8x128xf32>
    %464 = arith.truncf %463 : vector<8x128xf32> to vector<8x128xbf16>
    %c32 = arith.constant 32 : index
    %c0_199 = arith.constant 0 : index
    %c0_200 = arith.constant 0 : index
    %465 = vector.load %arg9[%c32, %c0_199, %c0_200] : memref<36x128x128xbf16, #tpu.memory_space<vmem>>, vector<1x128x128xbf16>
    %466 = vector.shape_cast %465 : vector<1x128x128xbf16> to vector<128x128xbf16>
    %cst_201 = arith.constant dense<0.000000e+00> : vector<8x128xf32>
    %467 = tpu.matmul %464, %466, %cst_201 {dimension_numbers = #tpu.dot_dimension_numbers<[1], [0], [0], [1], [0, 0, 1, 1], [], []>} : vector<8x128xbf16>, vector<128x128xbf16>, vector<8x128xf32> -> vector<8x128xf32>
    %468 = arith.addf %460, %467 : vector<8x128xf32>
    %c6_i32_202 = arith.constant 6 : i32
    %469 = tpu.dynamic_rotate %424 by %c6_i32_202 dim 0 : vector<8x128xf32>, i32 -> vector<8x128xf32>
    %470 = vector.broadcast %71 : vector<8x1xf32> to vector<8x128xf32>
    %471 = arith.mulf %469, %470 : vector<8x128xf32>
    %472 = arith.truncf %471 : vector<8x128xf32> to vector<8x128xbf16>
    %c33 = arith.constant 33 : index
    %c0_203 = arith.constant 0 : index
    %c0_204 = arith.constant 0 : index
    %473 = vector.load %arg9[%c33, %c0_203, %c0_204] : memref<36x128x128xbf16, #tpu.memory_space<vmem>>, vector<1x128x128xbf16>
    %474 = vector.shape_cast %473 : vector<1x128x128xbf16> to vector<128x128xbf16>
    %cst_205 = arith.constant dense<0.000000e+00> : vector<8x128xf32>
    %475 = tpu.matmul %472, %474, %cst_205 {dimension_numbers = #tpu.dot_dimension_numbers<[1], [0], [0], [1], [0, 0, 1, 1], [], []>} : vector<8x128xbf16>, vector<128x128xbf16>, vector<8x128xf32> -> vector<8x128xf32>
    %476 = arith.addf %468, %475 : vector<8x128xf32>
    %c5_i32_206 = arith.constant 5 : i32
    %477 = tpu.dynamic_rotate %424 by %c5_i32_206 dim 0 : vector<8x128xf32>, i32 -> vector<8x128xf32>
    %478 = vector.broadcast %82 : vector<8x1xf32> to vector<8x128xf32>
    %479 = arith.mulf %477, %478 : vector<8x128xf32>
    %480 = arith.truncf %479 : vector<8x128xf32> to vector<8x128xbf16>
    %c34 = arith.constant 34 : index
    %c0_207 = arith.constant 0 : index
    %c0_208 = arith.constant 0 : index
    %481 = vector.load %arg9[%c34, %c0_207, %c0_208] : memref<36x128x128xbf16, #tpu.memory_space<vmem>>, vector<1x128x128xbf16>
    %482 = vector.shape_cast %481 : vector<1x128x128xbf16> to vector<128x128xbf16>
    %cst_209 = arith.constant dense<0.000000e+00> : vector<8x128xf32>
    %483 = tpu.matmul %480, %482, %cst_209 {dimension_numbers = #tpu.dot_dimension_numbers<[1], [0], [0], [1], [0, 0, 1, 1], [], []>} : vector<8x128xbf16>, vector<128x128xbf16>, vector<8x128xf32> -> vector<8x128xf32>
    %484 = arith.addf %476, %483 : vector<8x128xf32>
    %c4_i32_210 = arith.constant 4 : i32
    %485 = tpu.dynamic_rotate %424 by %c4_i32_210 dim 0 : vector<8x128xf32>, i32 -> vector<8x128xf32>
    %486 = vector.broadcast %93 : vector<8x1xf32> to vector<8x128xf32>
    %487 = arith.mulf %485, %486 : vector<8x128xf32>
    %488 = arith.truncf %487 : vector<8x128xf32> to vector<8x128xbf16>
    %c35 = arith.constant 35 : index
    %c0_211 = arith.constant 0 : index
    %c0_212 = arith.constant 0 : index
    %489 = vector.load %arg9[%c35, %c0_211, %c0_212] : memref<36x128x128xbf16, #tpu.memory_space<vmem>>, vector<1x128x128xbf16>
    %490 = vector.shape_cast %489 : vector<1x128x128xbf16> to vector<128x128xbf16>
    %cst_213 = arith.constant dense<0.000000e+00> : vector<8x128xf32>
    %491 = tpu.matmul %488, %490, %cst_213 {dimension_numbers = #tpu.dot_dimension_numbers<[1], [0], [0], [1], [0, 0, 1, 1], [], []>} : vector<8x128xbf16>, vector<128x128xbf16>, vector<8x128xf32> -> vector<8x128xf32>
    %492 = arith.addf %484, %491 : vector<8x128xf32>
    %c3_214 = arith.constant 3 : index
    %c0_215 = arith.constant 0 : index
    %c0_216 = arith.constant 0 : index
    %493 = vector.load %arg10[%c3_214, %c0_215, %c0_216] : memref<4x1x128xf32, #tpu.memory_space<vmem>>, vector<1x1x128xf32>
    %494 = vector.shape_cast %493 : vector<1x1x128xf32> to vector<1x128xf32>
    %495 = vector.broadcast %494 : vector<1x128xf32> to vector<8x128xf32>
    %496 = arith.addf %492, %495 : vector<8x128xf32>
    %cst_217 = arith.constant 0.000000e+00 : f32
    %497 = vector.broadcast %cst_217 : f32 to vector<8x128xf32>
    %498 = arith.maximumf %496, %497 : vector<8x128xf32>
    %499 = arith.truncf %498 : vector<8x128xf32> to vector<8x128xbf16>
    %c3_218 = arith.constant 3 : index
    %c0_219 = arith.constant 0 : index
    %c0_220 = arith.constant 0 : index
    %500 = vector.load %arg11[%c3_218, %c0_219, %c0_220] : memref<4x128x128xbf16, #tpu.memory_space<vmem>>, vector<1x128x128xbf16>
    %501 = vector.shape_cast %500 : vector<1x128x128xbf16> to vector<128x128xbf16>
    %cst_221 = arith.constant dense<0.000000e+00> : vector<8x128xf32>
    %502 = tpu.matmul %499, %501, %cst_221 {dimension_numbers = #tpu.dot_dimension_numbers<[1], [0], [0], [1], [0, 0, 1, 1], [], []>} : vector<8x128xbf16>, vector<128x128xbf16>, vector<8x128xf32> -> vector<8x128xf32>
    %c3_222 = arith.constant 3 : index
    %c0_223 = arith.constant 0 : index
    %c0_224 = arith.constant 0 : index
    %503 = vector.load %arg12[%c3_222, %c0_223, %c0_224] : memref<4x1x128xf32, #tpu.memory_space<vmem>>, vector<1x1x128xf32>
    %504 = vector.shape_cast %503 : vector<1x1x128xf32> to vector<1x128xf32>
    %505 = vector.broadcast %504 : vector<1x128xf32> to vector<8x128xf32>
    %506 = arith.addf %502, %505 : vector<8x128xf32>
    %507 = arith.addf %506, %424 : vector<8x128xf32>
    %508 = vector.broadcast %98 : vector<1x128xf32> to vector<8x128xf32>
    %509 = arith.mulf %507, %508 : vector<8x128xf32>
    %cst_225 = arith.constant dense<0.000000e+00> : vector<8xf32>
    %510 = vector.multi_reduction <add>, %509, %cst_225 [1] : vector<8x128xf32> to vector<8xf32>
    %511 = vector.shape_cast %510 : vector<8xf32> to vector<8x1xf32>
    %cst_226 = arith.constant 3.125000e-02 : f32
    %512 = vector.broadcast %cst_226 : f32 to vector<8x1xf32>
    %513 = arith.mulf %511, %512 : vector<8x1xf32>
    %514 = vector.broadcast %513 : vector<8x1xf32> to vector<8x128xf32>
    %515 = arith.subf %507, %514 : vector<8x128xf32>
    %516 = vector.broadcast %98 : vector<1x128xf32> to vector<8x128xf32>
    %517 = arith.mulf %515, %516 : vector<8x128xf32>
    %518 = arith.mulf %517, %517 : vector<8x128xf32>
    %cst_227 = arith.constant dense<0.000000e+00> : vector<8xf32>
    %519 = vector.multi_reduction <add>, %518, %cst_227 [1] : vector<8x128xf32> to vector<8xf32>
    %520 = vector.shape_cast %519 : vector<8xf32> to vector<8x1xf32>
    %cst_228 = arith.constant 3.125000e-02 : f32
    %521 = vector.broadcast %cst_228 : f32 to vector<8x1xf32>
    %522 = arith.mulf %520, %521 : vector<8x1xf32>
    %cst_229 = arith.constant 9.99999974E-6 : f32
    %523 = vector.broadcast %cst_229 : f32 to vector<8x1xf32>
    %524 = arith.addf %522, %523 : vector<8x1xf32>
    %525 = math.rsqrt %524 : vector<8x1xf32>
    %526 = vector.broadcast %525 : vector<8x1xf32> to vector<8x128xf32>
    %527 = arith.mulf %517, %526 : vector<8x128xf32>
    %c3_230 = arith.constant 3 : index
    %c0_231 = arith.constant 0 : index
    %c0_232 = arith.constant 0 : index
    %528 = vector.load %arg13[%c3_230, %c0_231, %c0_232] : memref<4x1x128xf32, #tpu.memory_space<vmem>>, vector<1x1x128xf32>
    %529 = vector.shape_cast %528 : vector<1x1x128xf32> to vector<1x128xf32>
    %530 = vector.broadcast %529 : vector<1x128xf32> to vector<8x128xf32>
    %531 = arith.mulf %527, %530 : vector<8x128xf32>
    %c3_233 = arith.constant 3 : index
    %c0_234 = arith.constant 0 : index
    %c0_235 = arith.constant 0 : index
    %532 = vector.load %arg14[%c3_233, %c0_234, %c0_235] : memref<4x1x128xf32, #tpu.memory_space<vmem>>, vector<1x1x128xf32>
    %533 = vector.shape_cast %532 : vector<1x1x128xf32> to vector<1x128xf32>
    %534 = vector.broadcast %533 : vector<1x128xf32> to vector<8x128xf32>
    %535 = arith.addf %531, %534 : vector<8x128xf32>
    %536 = arith.addf %535, %266 : vector<8x128xf32>
    %c4_i32_236 = arith.constant 4 : i32
    %537 = tpu.dynamic_rotate %409 by %c4_i32_236 dim 0 : vector<8x128xf32>, i32 -> vector<8x128xf32>
    %538 = vector.broadcast %16 : vector<8x1xf32> to vector<8x128xf32>
    %539 = arith.mulf %537, %538 : vector<8x128xf32>
    %540 = arith.truncf %539 : vector<8x128xf32> to vector<8x128xbf16>
    %c18 = arith.constant 18 : index
    %c0_237 = arith.constant 0 : index
    %c0_238 = arith.constant 0 : index
    %541 = vector.load %arg9[%c18, %c0_237, %c0_238] : memref<36x128x128xbf16, #tpu.memory_space<vmem>>, vector<1x128x128xbf16>
    %542 = vector.shape_cast %541 : vector<1x128x128xbf16> to vector<128x128xbf16>
    %cst_239 = arith.constant dense<0.000000e+00> : vector<8x128xf32>
    %543 = tpu.matmul %540, %542, %cst_239 {dimension_numbers = #tpu.dot_dimension_numbers<[1], [0], [0], [1], [0, 0, 1, 1], [], []>} : vector<8x128xbf16>, vector<128x128xbf16>, vector<8x128xf32> -> vector<8x128xf32>
    %c3_i32_240 = arith.constant 3 : i32
    %544 = tpu.dynamic_rotate %409 by %c3_i32_240 dim 0 : vector<8x128xf32>, i32 -> vector<8x128xf32>
    %545 = vector.broadcast %27 : vector<8x1xf32> to vector<8x128xf32>
    %546 = arith.mulf %544, %545 : vector<8x128xf32>
    %547 = arith.truncf %546 : vector<8x128xf32> to vector<8x128xbf16>
    %c19 = arith.constant 19 : index
    %c0_241 = arith.constant 0 : index
    %c0_242 = arith.constant 0 : index
    %548 = vector.load %arg9[%c19, %c0_241, %c0_242] : memref<36x128x128xbf16, #tpu.memory_space<vmem>>, vector<1x128x128xbf16>
    %549 = vector.shape_cast %548 : vector<1x128x128xbf16> to vector<128x128xbf16>
    %cst_243 = arith.constant dense<0.000000e+00> : vector<8x128xf32>
    %550 = tpu.matmul %547, %549, %cst_243 {dimension_numbers = #tpu.dot_dimension_numbers<[1], [0], [0], [1], [0, 0, 1, 1], [], []>} : vector<8x128xbf16>, vector<128x128xbf16>, vector<8x128xf32> -> vector<8x128xf32>
    %551 = arith.addf %543, %550 : vector<8x128xf32>
    %c2_i32_244 = arith.constant 2 : i32
    %552 = tpu.dynamic_rotate %409 by %c2_i32_244 dim 0 : vector<8x128xf32>, i32 -> vector<8x128xf32>
    %553 = vector.broadcast %38 : vector<8x1xf32> to vector<8x128xf32>
    %554 = arith.mulf %552, %553 : vector<8x128xf32>
    %555 = arith.truncf %554 : vector<8x128xf32> to vector<8x128xbf16>
    %c20 = arith.constant 20 : index
    %c0_245 = arith.constant 0 : index
    %c0_246 = arith.constant 0 : index
    %556 = vector.load %arg9[%c20, %c0_245, %c0_246] : memref<36x128x128xbf16, #tpu.memory_space<vmem>>, vector<1x128x128xbf16>
    %557 = vector.shape_cast %556 : vector<1x128x128xbf16> to vector<128x128xbf16>
    %cst_247 = arith.constant dense<0.000000e+00> : vector<8x128xf32>
    %558 = tpu.matmul %555, %557, %cst_247 {dimension_numbers = #tpu.dot_dimension_numbers<[1], [0], [0], [1], [0, 0, 1, 1], [], []>} : vector<8x128xbf16>, vector<128x128xbf16>, vector<8x128xf32> -> vector<8x128xf32>
    %559 = arith.addf %551, %558 : vector<8x128xf32>
    %c1_i32_248 = arith.constant 1 : i32
    %560 = tpu.dynamic_rotate %409 by %c1_i32_248 dim 0 : vector<8x128xf32>, i32 -> vector<8x128xf32>
    %561 = vector.broadcast %49 : vector<8x1xf32> to vector<8x128xf32>
    %562 = arith.mulf %560, %561 : vector<8x128xf32>
    %563 = arith.truncf %562 : vector<8x128xf32> to vector<8x128xbf16>
    %c21 = arith.constant 21 : index
    %c0_249 = arith.constant 0 : index
    %c0_250 = arith.constant 0 : index
    %564 = vector.load %arg9[%c21, %c0_249, %c0_250] : memref<36x128x128xbf16, #tpu.memory_space<vmem>>, vector<1x128x128xbf16>
    %565 = vector.shape_cast %564 : vector<1x128x128xbf16> to vector<128x128xbf16>
    %cst_251 = arith.constant dense<0.000000e+00> : vector<8x128xf32>
    %566 = tpu.matmul %563, %565, %cst_251 {dimension_numbers = #tpu.dot_dimension_numbers<[1], [0], [0], [1], [0, 0, 1, 1], [], []>} : vector<8x128xbf16>, vector<128x128xbf16>, vector<8x128xf32> -> vector<8x128xf32>
    %567 = arith.addf %559, %566 : vector<8x128xf32>
    %568 = arith.truncf %409 : vector<8x128xf32> to vector<8x128xbf16>
    %c22 = arith.constant 22 : index
    %c0_252 = arith.constant 0 : index
    %c0_253 = arith.constant 0 : index
    %569 = vector.load %arg9[%c22, %c0_252, %c0_253] : memref<36x128x128xbf16, #tpu.memory_space<vmem>>, vector<1x128x128xbf16>
    %570 = vector.shape_cast %569 : vector<1x128x128xbf16> to vector<128x128xbf16>
    %cst_254 = arith.constant dense<0.000000e+00> : vector<8x128xf32>
    %571 = tpu.matmul %568, %570, %cst_254 {dimension_numbers = #tpu.dot_dimension_numbers<[1], [0], [0], [1], [0, 0, 1, 1], [], []>} : vector<8x128xbf16>, vector<128x128xbf16>, vector<8x128xf32> -> vector<8x128xf32>
    %572 = arith.addf %567, %571 : vector<8x128xf32>
    %c7_i32_255 = arith.constant 7 : i32
    %573 = tpu.dynamic_rotate %409 by %c7_i32_255 dim 0 : vector<8x128xf32>, i32 -> vector<8x128xf32>
    %574 = vector.broadcast %60 : vector<8x1xf32> to vector<8x128xf32>
    %575 = arith.mulf %573, %574 : vector<8x128xf32>
    %576 = arith.truncf %575 : vector<8x128xf32> to vector<8x128xbf16>
    %c23 = arith.constant 23 : index
    %c0_256 = arith.constant 0 : index
    %c0_257 = arith.constant 0 : index
    %577 = vector.load %arg9[%c23, %c0_256, %c0_257] : memref<36x128x128xbf16, #tpu.memory_space<vmem>>, vector<1x128x128xbf16>
    %578 = vector.shape_cast %577 : vector<1x128x128xbf16> to vector<128x128xbf16>
    %cst_258 = arith.constant dense<0.000000e+00> : vector<8x128xf32>
    %579 = tpu.matmul %576, %578, %cst_258 {dimension_numbers = #tpu.dot_dimension_numbers<[1], [0], [0], [1], [0, 0, 1, 1], [], []>} : vector<8x128xbf16>, vector<128x128xbf16>, vector<8x128xf32> -> vector<8x128xf32>
    %580 = arith.addf %572, %579 : vector<8x128xf32>
    %c6_i32_259 = arith.constant 6 : i32
    %581 = tpu.dynamic_rotate %409 by %c6_i32_259 dim 0 : vector<8x128xf32>, i32 -> vector<8x128xf32>
    %582 = vector.broadcast %71 : vector<8x1xf32> to vector<8x128xf32>
    %583 = arith.mulf %581, %582 : vector<8x128xf32>
    %584 = arith.truncf %583 : vector<8x128xf32> to vector<8x128xbf16>
    %c24 = arith.constant 24 : index
    %c0_260 = arith.constant 0 : index
    %c0_261 = arith.constant 0 : index
    %585 = vector.load %arg9[%c24, %c0_260, %c0_261] : memref<36x128x128xbf16, #tpu.memory_space<vmem>>, vector<1x128x128xbf16>
    %586 = vector.shape_cast %585 : vector<1x128x128xbf16> to vector<128x128xbf16>
    %cst_262 = arith.constant dense<0.000000e+00> : vector<8x128xf32>
    %587 = tpu.matmul %584, %586, %cst_262 {dimension_numbers = #tpu.dot_dimension_numbers<[1], [0], [0], [1], [0, 0, 1, 1], [], []>} : vector<8x128xbf16>, vector<128x128xbf16>, vector<8x128xf32> -> vector<8x128xf32>
    %588 = arith.addf %580, %587 : vector<8x128xf32>
    %c5_i32_263 = arith.constant 5 : i32
    %589 = tpu.dynamic_rotate %409 by %c5_i32_263 dim 0 : vector<8x128xf32>, i32 -> vector<8x128xf32>
    %590 = vector.broadcast %82 : vector<8x1xf32> to vector<8x128xf32>
    %591 = arith.mulf %589, %590 : vector<8x128xf32>
    %592 = arith.truncf %591 : vector<8x128xf32> to vector<8x128xbf16>
    %c25 = arith.constant 25 : index
    %c0_264 = arith.constant 0 : index
    %c0_265 = arith.constant 0 : index
    %593 = vector.load %arg9[%c25, %c0_264, %c0_265] : memref<36x128x128xbf16, #tpu.memory_space<vmem>>, vector<1x128x128xbf16>
    %594 = vector.shape_cast %593 : vector<1x128x128xbf16> to vector<128x128xbf16>
    %cst_266 = arith.constant dense<0.000000e+00> : vector<8x128xf32>
    %595 = tpu.matmul %592, %594, %cst_266 {dimension_numbers = #tpu.dot_dimension_numbers<[1], [0], [0], [1], [0, 0, 1, 1], [], []>} : vector<8x128xbf16>, vector<128x128xbf16>, vector<8x128xf32> -> vector<8x128xf32>
    %596 = arith.addf %588, %595 : vector<8x128xf32>
    %c4_i32_267 = arith.constant 4 : i32
    %597 = tpu.dynamic_rotate %409 by %c4_i32_267 dim 0 : vector<8x128xf32>, i32 -> vector<8x128xf32>
    %598 = vector.broadcast %93 : vector<8x1xf32> to vector<8x128xf32>
    %599 = arith.mulf %597, %598 : vector<8x128xf32>
    %600 = arith.truncf %599 : vector<8x128xf32> to vector<8x128xbf16>
    %c26 = arith.constant 26 : index
    %c0_268 = arith.constant 0 : index
    %c0_269 = arith.constant 0 : index
    %601 = vector.load %arg9[%c26, %c0_268, %c0_269] : memref<36x128x128xbf16, #tpu.memory_space<vmem>>, vector<1x128x128xbf16>
    %602 = vector.shape_cast %601 : vector<1x128x128xbf16> to vector<128x128xbf16>
    %cst_270 = arith.constant dense<0.000000e+00> : vector<8x128xf32>
    %603 = tpu.matmul %600, %602, %cst_270 {dimension_numbers = #tpu.dot_dimension_numbers<[1], [0], [0], [1], [0, 0, 1, 1], [], []>} : vector<8x128xbf16>, vector<128x128xbf16>, vector<8x128xf32> -> vector<8x128xf32>
    %604 = arith.addf %596, %603 : vector<8x128xf32>
    %c2_271 = arith.constant 2 : index
    %c0_272 = arith.constant 0 : index
    %c0_273 = arith.constant 0 : index
    %605 = vector.load %arg10[%c2_271, %c0_272, %c0_273] : memref<4x1x128xf32, #tpu.memory_space<vmem>>, vector<1x1x128xf32>
    %606 = vector.shape_cast %605 : vector<1x1x128xf32> to vector<1x128xf32>
    %607 = vector.broadcast %606 : vector<1x128xf32> to vector<8x128xf32>
    %608 = arith.addf %604, %607 : vector<8x128xf32>
    %cst_274 = arith.constant 0.000000e+00 : f32
    %609 = vector.broadcast %cst_274 : f32 to vector<8x128xf32>
    %610 = arith.maximumf %608, %609 : vector<8x128xf32>
    %611 = arith.truncf %610 : vector<8x128xf32> to vector<8x128xbf16>
    %c2_275 = arith.constant 2 : index
    %c0_276 = arith.constant 0 : index
    %c0_277 = arith.constant 0 : index
    %612 = vector.load %arg11[%c2_275, %c0_276, %c0_277] : memref<4x128x128xbf16, #tpu.memory_space<vmem>>, vector<1x128x128xbf16>
    %613 = vector.shape_cast %612 : vector<1x128x128xbf16> to vector<128x128xbf16>
    %cst_278 = arith.constant dense<0.000000e+00> : vector<8x128xf32>
    %614 = tpu.matmul %611, %613, %cst_278 {dimension_numbers = #tpu.dot_dimension_numbers<[1], [0], [0], [1], [0, 0, 1, 1], [], []>} : vector<8x128xbf16>, vector<128x128xbf16>, vector<8x128xf32> -> vector<8x128xf32>
    %c2_279 = arith.constant 2 : index
    %c0_280 = arith.constant 0 : index
    %c0_281 = arith.constant 0 : index
    %615 = vector.load %arg12[%c2_279, %c0_280, %c0_281] : memref<4x1x128xf32, #tpu.memory_space<vmem>>, vector<1x1x128xf32>
    %616 = vector.shape_cast %615 : vector<1x1x128xf32> to vector<1x128xf32>
    %617 = vector.broadcast %616 : vector<1x128xf32> to vector<8x128xf32>
    %618 = arith.addf %614, %617 : vector<8x128xf32>
    %619 = arith.addf %618, %409 : vector<8x128xf32>
    %620 = vector.broadcast %98 : vector<1x128xf32> to vector<8x128xf32>
    %621 = arith.mulf %619, %620 : vector<8x128xf32>
    %cst_282 = arith.constant dense<0.000000e+00> : vector<8xf32>
    %622 = vector.multi_reduction <add>, %621, %cst_282 [1] : vector<8x128xf32> to vector<8xf32>
    %623 = vector.shape_cast %622 : vector<8xf32> to vector<8x1xf32>
    %cst_283 = arith.constant 3.125000e-02 : f32
    %624 = vector.broadcast %cst_283 : f32 to vector<8x1xf32>
    %625 = arith.mulf %623, %624 : vector<8x1xf32>
    %626 = vector.broadcast %625 : vector<8x1xf32> to vector<8x128xf32>
    %627 = arith.subf %619, %626 : vector<8x128xf32>
    %628 = vector.broadcast %98 : vector<1x128xf32> to vector<8x128xf32>
    %629 = arith.mulf %627, %628 : vector<8x128xf32>
    %630 = arith.mulf %629, %629 : vector<8x128xf32>
    %cst_284 = arith.constant dense<0.000000e+00> : vector<8xf32>
    %631 = vector.multi_reduction <add>, %630, %cst_284 [1] : vector<8x128xf32> to vector<8xf32>
    %632 = vector.shape_cast %631 : vector<8xf32> to vector<8x1xf32>
    %cst_285 = arith.constant 3.125000e-02 : f32
    %633 = vector.broadcast %cst_285 : f32 to vector<8x1xf32>
    %634 = arith.mulf %632, %633 : vector<8x1xf32>
    %cst_286 = arith.constant 9.99999974E-6 : f32
    %635 = vector.broadcast %cst_286 : f32 to vector<8x1xf32>
    %636 = arith.addf %634, %635 : vector<8x1xf32>
    %637 = math.rsqrt %636 : vector<8x1xf32>
    %638 = vector.broadcast %637 : vector<8x1xf32> to vector<8x128xf32>
    %639 = arith.mulf %629, %638 : vector<8x128xf32>
    %c2_287 = arith.constant 2 : index
    %c0_288 = arith.constant 0 : index
    %c0_289 = arith.constant 0 : index
    %640 = vector.load %arg13[%c2_287, %c0_288, %c0_289] : memref<4x1x128xf32, #tpu.memory_space<vmem>>, vector<1x1x128xf32>
    %641 = vector.shape_cast %640 : vector<1x1x128xf32> to vector<1x128xf32>
    %642 = vector.broadcast %641 : vector<1x128xf32> to vector<8x128xf32>
    %643 = arith.mulf %639, %642 : vector<8x128xf32>
    %c2_290 = arith.constant 2 : index
    %c0_291 = arith.constant 0 : index
    %c0_292 = arith.constant 0 : index
    %644 = vector.load %arg14[%c2_290, %c0_291, %c0_292] : memref<4x1x128xf32, #tpu.memory_space<vmem>>, vector<1x1x128xf32>
    %645 = vector.shape_cast %644 : vector<1x1x128xf32> to vector<1x128xf32>
    %646 = vector.broadcast %645 : vector<1x128xf32> to vector<8x128xf32>
    %647 = arith.addf %643, %646 : vector<8x128xf32>
    %648 = arith.addf %647, %378 : vector<8x128xf32>
    %649 = arith.truncf %648 : vector<8x128xf32> to vector<8x128xbf16>
    %c0_293 = arith.constant 0 : index
    %c0_294 = arith.constant 0 : index
    %650 = vector.load %arg15[%c0_293, %c0_294] : memref<128x128xbf16, #tpu.memory_space<vmem>>, vector<128x128xbf16>
    %cst_295 = arith.constant dense<0.000000e+00> : vector<8x128xf32>
    %651 = tpu.matmul %649, %650, %cst_295 {dimension_numbers = #tpu.dot_dimension_numbers<[1], [0], [0], [1], [0, 0, 1, 1], [], []>} : vector<8x128xbf16>, vector<128x128xbf16>, vector<8x128xf32> -> vector<8x128xf32>
    %652 = arith.truncf %536 : vector<8x128xf32> to vector<8x128xbf16>
    %c0_296 = arith.constant 0 : index
    %c0_297 = arith.constant 0 : index
    %653 = vector.load %arg16[%c0_296, %c0_297] : memref<128x128xbf16, #tpu.memory_space<vmem>>, vector<128x128xbf16>
    %cst_298 = arith.constant dense<0.000000e+00> : vector<8x128xf32>
    %654 = tpu.matmul %652, %653, %cst_298 {dimension_numbers = #tpu.dot_dimension_numbers<[1], [0], [0], [1], [0, 0, 1, 1], [], []>} : vector<8x128xbf16>, vector<128x128xbf16>, vector<8x128xf32> -> vector<8x128xf32>
    %655 = arith.addf %651, %654 : vector<8x128xf32>
    %c0_299 = arith.constant 0 : index
    %c0_300 = arith.constant 0 : index
    %656 = vector.load %arg17[%c0_299, %c0_300] : memref<1x128xf32, #tpu.memory_space<vmem>>, vector<1x128xf32>
    %657 = vector.broadcast %656 : vector<1x128xf32> to vector<8x128xf32>
    %658 = arith.addf %655, %657 : vector<8x128xf32>
    %cst_301 = arith.constant 0.000000e+00 : f32
    %659 = vector.broadcast %cst_301 : f32 to vector<8x128xf32>
    %660 = arith.maximumf %658, %659 : vector<8x128xf32>
    %661 = arith.truncf %660 : vector<8x128xf32> to vector<8x128xbf16>
    %c0_302 = arith.constant 0 : index
    %c0_303 = arith.constant 0 : index
    %662 = vector.load %arg18[%c0_302, %c0_303] : memref<128x1xbf16, #tpu.memory_space<vmem>>, vector<128x1xbf16>
    %cst_304 = arith.constant dense<0.000000e+00> : vector<8x1xf32>
    %663 = tpu.matmul %661, %662, %cst_304 {dimension_numbers = #tpu.dot_dimension_numbers<[1], [0], [0], [1], [0, 0, 1, 1], [], []>} : vector<8x128xbf16>, vector<128x1xbf16>, vector<8x1xf32> -> vector<8x1xf32>
    %c0_305 = arith.constant 0 : index
    %c0_306 = arith.constant 0 : index
    %664 = vector.load %arg19[%c0_305, %c0_306] : memref<1x1xf32, #tpu.memory_space<vmem>>, vector<1x1xf32>
    %665 = vector.broadcast %664 : vector<1x1xf32> to vector<8x1xf32>
    %666 = arith.addf %663, %665 : vector<8x1xf32>
    %cst_307 = arith.constant 0.000000e+00 : f32
    %667 = vector.broadcast %cst_307 : f32 to vector<8x1xf32>
    %668 = arith.subf %667, %666 : vector<8x1xf32>
    %669 = math.exp %668 : vector<8x1xf32>
    %cst_308 = arith.constant 1.000000e+00 : f32
    %670 = vector.broadcast %cst_308 : f32 to vector<8x1xf32>
    %671 = arith.addf %670, %669 : vector<8x1xf32>
    %cst_309 = arith.constant 1.000000e+00 : f32
    %672 = vector.broadcast %cst_309 : f32 to vector<8x1xf32>
    %673 = arith.divf %672, %671 : vector<8x1xf32>
    %674 = vector.broadcast %673 : vector<8x1xf32> to vector<8x128xf32>
    %675 = arith.mulf %674, %648 : vector<8x128xf32>
    %cst_310 = arith.constant 1.000000e+00 : f32
    %676 = vector.broadcast %cst_310 : f32 to vector<8x1xf32>
    %677 = arith.subf %676, %673 : vector<8x1xf32>
    %678 = vector.broadcast %677 : vector<8x1xf32> to vector<8x128xf32>
    %679 = arith.mulf %678, %536 : vector<8x128xf32>
    %680 = arith.addf %675, %679 : vector<8x128xf32>
    %c0_311 = arith.constant 0 : index
    %c0_312 = arith.constant 0 : index
    %681 = vector.load %arg20[%c0_311, %c0_312] : memref<8x128xf32, #tpu.memory_space<vmem>>, vector<8x128xf32>
    tpu.vector_store %arg20[%c0_311, %c0_312], %680 {strides = array<i32>} : memref<8x128xf32, #tpu.memory_space<vmem>>, vector<8x128xf32>,
    return
  }
  func.func @transform_0(%arg0: i32) -> (i32, i32) {
    %c0_i32 = arith.constant 0 : i32
    %c0_i32_0 = arith.constant 0 : i32
    return %arg0, %c0_i32 : i32, i32
  }
  func.func @transform_1(%arg0: i32) -> (i32, i32) {
    %c0_i32 = arith.constant 0 : i32
    %c0_i32_0 = arith.constant 0 : i32
    return %arg0, %c0_i32 : i32, i32
  }
  func.func @transform_2(%arg0: i32) -> (i32, i32) {
    %c0_i32 = arith.constant 0 : i32
    %c0_i32_0 = arith.constant 0 : i32
    return %arg0, %c0_i32 : i32, i32
  }
  func.func @transform_3(%arg0: i32) -> (i32, i32, i32) {
    %c0_i32 = arith.constant 0 : i32
    %c0_i32_0 = arith.constant 0 : i32
    %c0_i32_1 = arith.constant 0 : i32
    return %arg0, %c0_i32, %c0_i32_0 : i32, i32, i32
  }
  func.func @transform_4(%arg0: i32) -> (i32, i32) {
    %c0_i32 = arith.constant 0 : i32
    %c0_i32_0 = arith.constant 0 : i32
    %c0_i32_1 = arith.constant 0 : i32
    return %c0_i32, %c0_i32_0 : i32, i32
  }
  func.func @transform_5(%arg0: i32) -> (i32, i32) {
    %c0_i32 = arith.constant 0 : i32
    %c0_i32_0 = arith.constant 0 : i32
    %c0_i32_1 = arith.constant 0 : i32
    return %c0_i32, %c0_i32_0 : i32, i32
  }
  func.func @transform_6(%arg0: i32) -> (i32, i32, i32) {
    %c0_i32 = arith.constant 0 : i32
    %c0_i32_0 = arith.constant 0 : i32
    %c0_i32_1 = arith.constant 0 : i32
    %c0_i32_2 = arith.constant 0 : i32
    return %c0_i32, %c0_i32_0, %c0_i32_1 : i32, i32, i32
  }
  func.func @transform_7(%arg0: i32) -> (i32, i32, i32) {
    %c0_i32 = arith.constant 0 : i32
    %c0_i32_0 = arith.constant 0 : i32
    %c0_i32_1 = arith.constant 0 : i32
    %c0_i32_2 = arith.constant 0 : i32
    return %c0_i32, %c0_i32_0, %c0_i32_1 : i32, i32, i32
  }
  func.func @transform_8(%arg0: i32) -> (i32, i32, i32) {
    %c0_i32 = arith.constant 0 : i32
    %c0_i32_0 = arith.constant 0 : i32
    %c0_i32_1 = arith.constant 0 : i32
    %c0_i32_2 = arith.constant 0 : i32
    return %c0_i32, %c0_i32_0, %c0_i32_1 : i32, i32, i32
  }
  func.func @transform_9(%arg0: i32) -> (i32, i32, i32) {
    %c0_i32 = arith.constant 0 : i32
    %c0_i32_0 = arith.constant 0 : i32
    %c0_i32_1 = arith.constant 0 : i32
    %c0_i32_2 = arith.constant 0 : i32
    return %c0_i32, %c0_i32_0, %c0_i32_1 : i32, i32, i32
  }
  func.func @transform_10(%arg0: i32) -> (i32, i32, i32) {
    %c0_i32 = arith.constant 0 : i32
    %c0_i32_0 = arith.constant 0 : i32
    %c0_i32_1 = arith.constant 0 : i32
    %c0_i32_2 = arith.constant 0 : i32
    return %c0_i32, %c0_i32_0, %c0_i32_1 : i32, i32, i32
  }
  func.func @transform_11(%arg0: i32) -> (i32, i32, i32) {
    %c0_i32 = arith.constant 0 : i32
    %c0_i32_0 = arith.constant 0 : i32
    %c0_i32_1 = arith.constant 0 : i32
    %c0_i32_2 = arith.constant 0 : i32
    return %c0_i32, %c0_i32_0, %c0_i32_1 : i32, i32, i32
  }
  func.func @transform_12(%arg0: i32) -> (i32, i32, i32) {
    %c0_i32 = arith.constant 0 : i32
    %c0_i32_0 = arith.constant 0 : i32
    %c0_i32_1 = arith.constant 0 : i32
    %c0_i32_2 = arith.constant 0 : i32
    return %c0_i32, %c0_i32_0, %c0_i32_1 : i32, i32, i32
  }
  func.func @transform_13(%arg0: i32) -> (i32, i32, i32) {
    %c0_i32 = arith.constant 0 : i32
    %c0_i32_0 = arith.constant 0 : i32
    %c0_i32_1 = arith.constant 0 : i32
    %c0_i32_2 = arith.constant 0 : i32
    return %c0_i32, %c0_i32_0, %c0_i32_1 : i32, i32, i32
  }
  func.func @transform_14(%arg0: i32) -> (i32, i32) {
    %c0_i32 = arith.constant 0 : i32
    %c0_i32_0 = arith.constant 0 : i32
    %c0_i32_1 = arith.constant 0 : i32
    return %c0_i32, %c0_i32_0 : i32, i32
  }
  func.func @transform_15(%arg0: i32) -> (i32, i32) {
    %c0_i32 = arith.constant 0 : i32
    %c0_i32_0 = arith.constant 0 : i32
    %c0_i32_1 = arith.constant 0 : i32
    return %c0_i32, %c0_i32_0 : i32, i32
  }
  func.func @transform_16(%arg0: i32) -> (i32, i32) {
    %c0_i32 = arith.constant 0 : i32
    %c0_i32_0 = arith.constant 0 : i32
    %c0_i32_1 = arith.constant 0 : i32
    return %c0_i32, %c0_i32_0 : i32, i32
  }
  func.func @transform_17(%arg0: i32) -> (i32, i32) {
    %c0_i32 = arith.constant 0 : i32
    %c0_i32_0 = arith.constant 0 : i32
    %c0_i32_1 = arith.constant 0 : i32
    return %c0_i32, %c0_i32_0 : i32, i32
  }
  func.func @transform_18(%arg0: i32) -> (i32, i32) {
    %c0_i32 = arith.constant 0 : i32
    %c0_i32_0 = arith.constant 0 : i32
    %c0_i32_1 = arith.constant 0 : i32
    return %c0_i32, %c0_i32_0 : i32, i32
  }
  func.func @transform_19(%arg0: i32) -> (i32, i32) {
    %c0_i32 = arith.constant 0 : i32
    %c0_i32_0 = arith.constant 0 : i32
    return %arg0, %c0_i32 : i32, i32
  }
}

</mosaic_0001>

<bundles_post_ra>
// kernel: local_feature_extractor_fwd.2
= control target key start
LH: loop header
LB: loop body
LE: loop exit
PB: predicated region body
PF: predicated region fallthrough
CT: control target
= control target key end

     0   :  { %13 = vsyncpa [#allocation3], 0  ;;  %s2549_s0 = inlined_call_operand.vmem [shape: f32[64,8], index: 0, kind: input, shape index: {}]   ;;  %s2550_s1 = inlined_call_operand.vmem [shape: f32[64,1], index: 1, kind: input, shape index: {}]   ;;  %s2551_s2 = inlined_call_operand.hbm [shape: bf16[3,8,128], index: 2, kind: input, shape index: {}]   ;;  %s2552_s3 = inlined_call_operand.hbm [shape: f32[1,128], index: 3, kind: input, shape index: {}]   ;;  %s2553_s4 = inlined_call_operand.hbm [shape: bf16[6,128,128], index: 4, kind: input, shape index: {}]   ;;  %s2554_s5 = inlined_call_operand.hbm [shape: f32[2,1,128], index: 5, kind: input, shape index: {}]   ;;  %s2555_s6 = inlined_call_operand.hbm [shape: bf16[128,128], index: 6, kind: input, shape index: {}]   ;;  %s2556_s7 = inlined_call_operand.hbm [shape: f32[1,128], index: 7, kind: input, shape index: {}]   ;;  %s2557_s8 = inlined_call_operand.vmem [shape: f32[64,128], index: 8, kind: output, shape index: {}]  }
   0x1   :  { %14 = vsyncpa [#allocation5], 0 }
   0x2   :  { %15 = vsyncpa [#allocation8], 0 }
   0x3   :  { %16 = vsyncpa [#allocation11], 0  ;;  %s2266_s27 = smov 0  }
   0x4 LB: > { %s2208_s28 = smov [#allocation4]   ;;  %s1578_s30 = sadd.s32 4294967295, %s2206_s27   ;;  %s2206_s27 = sphi %s2266_s27, %s22_s27  }
   0x5   : > { %s257_s29 = sshll.u32 %s2208_s28, 4  ;;  %p1580_p0 = scmp.ge.s32.totalorder %s2206_s27, 1  ;;  %s258_s29 = int_to_ptr.vmem [resolvable:$true] %s257_s29 }
   0x6   : > { %p231_p1 = scmp.lt.s32.totalorder %s2206_s27, 5  ;;  %p2276_p2 = scmp.eq.s32.totalorder %s1578_s30, 0 }
   0x7   : > { %s2209_s11 = smov [#allocation7]   ;;  %s2210_s14 = smov [#allocation2]  }
   0x8   : > { %p2280_p3 = pnand %p1580_p0, %p231_p1  ;;  %s280_s12 = sshll.u32 %s2209_s11, 4  ;;  %s2286_s12 = int_to_ptr.vmem [resolvable:$true] %s280_s12 }
   0x9   : > { %s243_s15 = sshll.u32 %s2210_s14, 4  ;;  %s2039_s17 = scalar_lea.vmem %s258_s29, 16  ;;  %s2294_s15 = int_to_ptr.vmem [resolvable:$true] %s243_s15 }
   0xa   : > { %p1919_p4 = pneg %p2280_p3  ;;  %p2040_p7 = scmp.ne.s32.totalorder %s258_s29, %s2039_s17 }
   0xb   : > { %s2046_s18 = scalar_lea.vmem %s258_s29, 32  ;;  %p2047_p10 = scmp.lt.s32.totalorder %s258_s29, %s258_s29 }
   0xc   : > { %p2290_p5 = pnand %p2276_p2, %p1919_p4  ;;  %p2048_p11 = scmp.lt.s32.totalorder %s2046_s18, %s2039_s17 }
   0xe   : > { %p2298_p6 = pneg %p2290_p5  ;;  %p2049_p12 = por %p2048_p11, %p2047_p10 }
  0x10   : > { %p2042_p8 = pnand %p2040_p7, %p2298_p6 }
  0x12   : > { %p2043_p9 = pneg %p2042_p8 }
  0x14   : > { %p2050_p13 = pnand %p2049_p12, %p2043_p9 }
  0x16   : > { %2053 = shalt.err (!%p2050_p13)
}
  0x17   : > { %1925 = dma.hbm_to_vmem [thread:$0]  (!%p2290_p5), %s2552_s3, 16, %s258_s29, [#allocation5]  }
  0x18   : > { %s2065_s21 = scalar_lea.vmem %s2286_s12, 32  ;;  %p2073_p7 = scmp.lt.s32.totalorder %s2286_s12, %s2286_s12 }
  0x19   : > { %p2066_p0 = scmp.ne.s32.totalorder %s2286_s12, %s2065_s21  ;;  %p2074_p8 = scmp.lt.s32.totalorder %s2065_s21, %s2065_s21 }
  0x1b   : > { %p2068_p1 = pnand %p2066_p0, %p2298_p6  ;;  %p2075_p9 = por %p2074_p8, %p2073_p7 }
  0x1d   : > { %p2069_p4 = pneg %p2068_p1 }
  0x1f   : > { %p2076_p10 = pnand %p2075_p9, %p2069_p4 }
  0x21   : > { %2079 = shalt.err (!%p2076_p10)
}
  0x22   : > { %s2211_s22 = smov 16   ;;  %s2212_s23 = smov 1  }
  0x23   : > { %1931 = dma.hbm_to_vmem [thread:$0]  (!%p2290_p5), %s2554_s5, 32, %s2286_s12, [#allocation8], %s2211_s22, %s2211_s22, %s2212_s23  }
  0x24   : > { %s2091_s26 = scalar_lea.vmem %s2294_s15, 192  ;;  %p2099_p0 = scmp.lt.s32.totalorder %s2294_s15, %s2294_s15 }
  0x25   : > { %p2092_p11 = scmp.ne.s32.totalorder %s2294_s15, %s2091_s26  ;;  %p2100_p1 = scmp.lt.s32.totalorder %s2091_s26, %s2091_s26 }
  0x27   : > { %p2094_p12 = pnand %p2092_p11, %p2298_p6  ;;  %p2101_p4 = por %p2100_p1, %p2099_p0 }
  0x29   : > { %p2095_p13 = pneg %p2094_p12 }
  0x2b   : > { %p2102_p7 = pnand %p2101_p4, %p2095_p13 }
  0x2d   : > { %2105 = shalt.err (!%p2102_p7)
}
  0x2e   : > { %s2213_s28 = smov 64   ;;  %s2214_s29 = smov 4  }
  0x2f   : > { %1922 = dma.hbm_to_vmem [thread:$0]  (!%p2290_p5), %s2551_s2, 192, %s2294_s15, [#allocation3], %s2213_s28, %s2213_s28, %s2214_s29  }
  0x30   : > { %s2215_s14 = smov [#allocation6]   ;;  %s2216_s18 = smov [#allocation9]  }
  0x31   : > { %s267_s17 = sshll.u32 %s2215_s14, 4  ;;  %s293_s19 = sshll.u32 %s2216_s18, 4  ;;  %s268_s17 = int_to_ptr.vmem [resolvable:$true] %s267_s17  ;;  %s294_s19 = int_to_ptr.vmem [resolvable:$true] %s293_s19 }
  0x32   : > { %s2117_s20 = scalar_lea.vmem %s268_s17, 6144  ;;  %p2125_p11 = scmp.lt.s32.totalorder %s268_s17, %s268_s17 }
  0x33   : > { %p2118_p8 = scmp.ne.s32.totalorder %s268_s17, %s2117_s20  ;;  %p2126_p12 = scmp.lt.s32.totalorder %s2117_s20, %s2117_s20 }
  0x35   : > { %p2120_p9 = pnand %p2118_p8, %p2298_p6  ;;  %p2127_p13 = por %p2126_p12, %p2125_p11 }
  0x37   : > { %p2121_p10 = pneg %p2120_p9 }
  0x39   : > { %p2128_p0 = pnand %p2127_p13, %p2121_p10 }
  0x3b   : > { %2131 = shalt.err (!%p2128_p0)
}
  0x3c   : > { %1928 = dma.hbm_to_vmem [thread:$0]  (!%p2290_p5), %s2553_s4, 6144, %s268_s17, [#allocation5], %s2213_s28, %s2213_s28, %s2214_s29  }
  0x3d   : > { %s2143_s22 = scalar_lea.vmem %s294_s19, 1024  ;;  %p2151_p8 = scmp.lt.s32.totalorder %s294_s19, %s294_s19 }
  0x3e   : > { %p2144_p1 = scmp.ne.s32.totalorder %s294_s19, %s2143_s22  ;;  %p2152_p9 = scmp.lt.s32.totalorder %s2143_s22, %s2143_s22 }
  0x40   : > { %p2146_p4 = pnand %p2144_p1, %p2298_p6  ;;  %p2153_p11 = por %p2152_p9, %p2151_p8 }
  0x42   : > { %p2147_p7 = pneg %p2146_p4 }
  0x44   : > { %p2154_p10 = pnand %p2153_p11, %p2147_p7 }
  0x46   : > { %2157 = shalt.err (!%p2154_p10)
}
  0x47   : > { %1934 = dma.hbm_to_vmem [thread:$0]  (!%p2290_p5), %s2555_s6, 1024, %s294_s19, [#allocation8], %s2213_s28, %s2213_s28, %s2214_s29  }
  0x48   : > { %s2217_s25 = smov [#allocation10]  }
  0x49   : > { %s307_s26 = sshll.u32 %s2217_s25, 4  ;;  %s308_s26 = int_to_ptr.vmem [resolvable:$true] %s307_s26 }
  0x4a   : > { %s2169_s11 = scalar_lea.vmem %s308_s26, 16  ;;  %s2176_s12 = scalar_lea.vmem %s308_s26, 32 }
  0x4b   : > { %p2170_p12 = scmp.ne.s32.totalorder %s308_s26, %s2169_s11  ;;  %p2177_p1 = scmp.lt.s32.totalorder %s308_s26, %s308_s26 }
  0x4c   : > { %p2178_p4 = scmp.lt.s32.totalorder %s2176_s12, %s2169_s11 }
  0x4d   : > { %p2172_p13 = pnand %p2170_p12, %p2298_p6 }
  0x4e   : > { %p2179_p7 = por %p2178_p4, %p2177_p1 }
  0x4f   : > { %p2173_p0 = pneg %p2172_p13 }
  0x51   : > { %p2180_p8 = pnand %p2179_p7, %p2173_p0 }
  0x53   : > { %2183 = shalt.err (!%p2180_p8)
}
  0x54   : > { %1937 = dma.hbm_to_vmem [thread:$0]  (!%p2290_p5), %s2556_s7, 16, %s308_s26, [#allocation11]  }
  0x55   : > { %338 = sbr.rel (%p2280_p3) target bundleno = 1009 (0x3f1), region = 52 }
  0x5a   : > { %2189 = dma.done.wait (%p2276_p2), [#allocation3], 192  }
  0x5b   : > { %2191 = vsyncadd (%p2276_p2), [#allocation3], 4294967104 }
  0x5c   : > { %2193 = dma.done.wait (%p2276_p2), [#allocation5], 6160  }
  0x5d   : > { %2195 = vsyncadd (%p2276_p2), [#allocation5], 4294961136 }
  0x5e   : > { %2197 = dma.done.wait (%p2276_p2), [#allocation8], 1056  }
  0x5f   : > { %2199 = vsyncadd (%p2276_p2), [#allocation8], 4294966240 }
  0x60   : > { %2201 = dma.done.wait (%p2276_p2), [#allocation11], 16  }
  0x61   : > { %2203 = vsyncadd (%p2276_p2), [#allocation11], 4294967280  ;;  %s1595_s10 = sshll.u32 %s1578_s30, 1  ;;  %v418_v0 = vlaneseq  ;;  %v2218_v1 = vmov 0.0   ;;  %vm2219_vm0 = vmmov 0   ;;  %v2220_v3 = vmov 0  }
  0x62   : > { %1737 = vmatprep.subr.bf16.mxu0 %v2218_v1  ;;  %1739 = vmatprep.mubr.msk.bf16.mxu0 %vm2219_vm0, %v2218_v1  ;;  %p398_p3 = scmp.lt.s32.totalorder %s1595_s10, 7  ;;  %vm464_vm1 = vcmask 1043456   ;;  %vm460_vm2 = vcmask 64512   ;;  %v459_v7 = vld [vmem:[#allocation2 + $0x4] sm:$0xf]  ;;  %v1975_v35 = vld [vmem:[#allocation6 + $0x68] sm:$0xff]  }
  0x63   : > { %v2386_v2 = vshrl.u32 %v418_v0, 7  ;;  %1971 = vset.pattern.permute.xlu0 %v2220_v3  ;;  %1755 = vmatprep.subr.bf16.mxu1 %v2218_v1  ;;  %v466_v11 = vsel %vm464_vm1, %v459_v7, 0  ;;  %v456_v15 = vld [vmem:[#allocation2] sm:$0xf]  ;;  %v565_v20 = vld [vmem:[#allocation2 + $0x8] sm:$0xf] }
  0x64   : > { %s2563_s10 = smov (!%p398_p3, %s1595_s10), 7  ;;  %1771 = vmatprep.mubr.msk.bf16.mxu1 %vm2219_vm0, %v2218_v1  ;;  %1738 = vmatpush3.bf16.msra.mxu0 %v466_v11  ;;  %v513_v19 = vsel %vm464_vm1, %v456_v15, 0  ;;  %v570_v22 = vsel %vm464_vm1, %v565_v20, 0  ;;  %v1972_v25 = vld [vmem:[#allocation6 + $0x78] sm:$0xff]   ;;  %v1973_v33 = vld [vmem:[#allocation6 + $0x70] sm:$0xff]   ;;  %v1977_v37 = vld [vmem:[#allocation6 + $0x60] sm:$0xff]  }
  0x65   : > { %v421_v4 = vadd.s32 4294967295, %v2386_v2  ;;  %v420_v5 = vadd.s32 8, %v2386_v2  ;;  %s2393_s30 = sshll.u32 %s2563_s10, 3  ;;  %vm450_vm4 = vcmp.lt.s32.totalorder %v2386_v2, 1  ;;  %vm558_vm5 = vcmp.lt.s32.totalorder %v2386_v2, 7  ;;  %1743 = vmatprep.subr.bf16.mxu0 %v2218_v1  ;;  %1756 = vmatpush3.bf16.msra.mxu1 %v1972_v25  ;;  %v1974_v34 = vld [vmem:[#allocation6 + $0x38] sm:$0xff]  }
  0x66   : > { %s401_s16 = scalar_lea.vmem %s2549_s0, %s2393_s30  ;;  %s407_s18 = scalar_lea.vmem %s2550_s1, %s2393_s30  ;;  %1757 = vmatprep.subr.bf16.mxu1 %v2218_v1  ;;  %v1976_v36 = vld [vmem:[#allocation6 + $0x30] sm:$0xff]   ;;  %v1978_v38 = vld [vmem:[#allocation6 + $0x28] sm:$0xff]   ;;  %v1979_v39 = vld [vmem:[#allocation6 + $0x58] sm:$0xff]  }
  0x67   : > { %vm423_vm3 = vcmp.ge.s32.totalorder %v421_v4, 0  ;;  %v434_v6 = vadd.s32 1, %v420_v5  ;;  %v445_v8 = vld [vmem:[%s401_s16] sm:$0xff]  ;;  %v446_v9 = vld [vmem:[%s401_s16 + $0x8] sm:$0xff]  ;;  %v1983_v43 = vld [vmem:[#allocation6 + $0x48] sm:$0xff]   ;;  %s413_s15 = scalar_lea.vmem %s2557_s8, %s2393_s30 }
  0x68   : > { %v2405_v10 = vsel %vm423_vm3, 1.0, %v2218_v1  ;;  %v448_v12 = vrot.slane %v445_v8, 7  ;;  %v449_v13 = vrot.slane %v446_v9, 7  ;;  %v457_v14 = vpack.c.bf16 %v446_v9, %v445_v8  ;;  %v416_v16 = vld [vmem:[%s407_s18] sm:$0xff]  ;;  %v417_v24 = vld [vmem:[%s407_s18 + $0x8] sm:$0xff]  ;;  %v1986_v46 = vld [vmem:[#allocation6 + $0x8] sm:$0xff]  }
  0x69   : > { %v556_v17 = vrot.slane %v445_v8, 1  ;;  %v557_v18 = vrot.slane %v446_v9, 1  ;;  %vm438_vm6 = vcmp.lt.s32.totalorder %v434_v6, 16  ;;  %627 = vperm.xlu0 %1971, %v416_v16   ;;  %1758 = vmatpush3.bf16.msra.mxu1 %v1973_v33  ;;  %v1980_v40 = vld [vmem:[#allocation6 + $0x20] sm:$0xff]   ;;  %v1981_v41 = vld [vmem:[#allocation6 + $0x50] sm:$0xff]   ;;  %v1982_v42 = vld [vmem:[#allocation6 + $0x18] sm:$0xff]  }
  0x6a   : > { %v452_v21 = vsel %vm450_vm4, %v449_v13, %v448_v12  ;;  %v2415_v23 = vsel %vm438_vm6, 1.0, %v2218_v1  ;;  %1740 = vmatmul.mubr.msk.bf16.vlgmr.msra.gmra.mxu0 %vm460_vm2, %v457_v14  ;;  %v451_v27 = vsel %vm450_vm4, %v448_v12, %v449_v13  ;;  %1759 = vmatprep.subr.bf16.mxu1 %v2218_v1  ;;  %v1984_v44 = vld [vmem:[#allocation6 + $0x10] sm:$0xff]   ;;  %v1985_v45 = vld [vmem:[#allocation6 + $0x40] sm:$0xff]   ;;  %v1606_v57 = vld [vmem:[#allocation4] ss:$0 sm:$0xff] }
  0x6b   : > { %v453_v26 = vmul.f32 %v2405_v10, %v452_v21  ;;  %1744 = vmatpush3.bf16.msra.mxu0 %v513_v19  ;;  %1745 = vmatprep.mubr.msk.bf16.mxu0 %vm2219_vm0, %v2218_v1  ;;  %v560_v29 = vsel %vm558_vm5, %v557_v18, %v556_v17  ;;  %v559_v31 = vsel %vm558_vm5, %v556_v17, %v557_v18  ;;  %v1988_v47 = vld [vmem:[#allocation6] sm:$0xff]   ;;  %v1987_v12 = vld [vmem:[#allocation6 + $0xb8] sm:$0xff]   ;;  %v1989_v17 = vld [vmem:[#allocation6 + $0xb0] sm:$0xff]  }
  0x6c   : > { %1749 = vmatprep.subr.bf16.mxu0 %v2218_v1  ;;  %v562_v30 = vmul.f32 %v2415_v23, %v560_v29  ;;  %v1990_v21 = vld [vmem:[#allocation6 + $0xa8] sm:$0xff]   ;;  %v1993_v25 = vld [vmem:[#allocation6 + $0x90] sm:$0xff]   ;;  %v2024_v2 = vld [vmem:[#allocation9 + $0x18] sm:$0xff]  }
  0x6d   : > { %632 = vperm.xlu0 %1971, %v417_v24   ;;  %v455_v28 = vpack.c.bf16 %v451_v27, %v453_v26  ;;  %1760 = vmatpush3.bf16.msra.mxu1 %v1975_v35  ;;  %v1992_v24 = vld [vmem:[#allocation6 + $0x98] sm:$0xff]  }
  0x6e   : > { %v563_v32 = vpack.c.bf16 %v562_v30, %v559_v31  ;;  %1761 = vmatprep.subr.bf16.mxu1 %v2218_v1  ;;  %v1995_v30 = vld [vmem:[#allocation6 + $0x80] sm:$0xff]   ;;  %v1998_v35 = vld [vmem:[#allocation6 + $0xf8] sm:$0xff]  }
  0x71   : > { %1762 = vmatpush3.bf16.msra.mxu1 %v1977_v37  ;;  %v2000_v37 = vld [vmem:[#allocation6 + $0xf0] sm:$0xff]  }
  0x72   : > { %1746 = vmatmul.mubr.msk.bf16.vlgmr.msra.gmra.mxu0 %vm460_vm2, %v455_v28  ;;  %1763 = vmatprep.subr.bf16.mxu1 %v2218_v1  ;;  %v1994_v28 = vld [vmem:[#allocation6 + $0x88] sm:$0xff]  }
  0x73   : > { %1750 = vmatpush3.bf16.msra.mxu0 %v570_v22  ;;  %1751 = vmatprep.mubr.msk.bf16.mxu0 %vm2219_vm0, %v2218_v1  ;;  %v1991_v22 = vld [vmem:[#allocation6 + $0xa0] sm:$0xff]  }
  0x74   : > { %1775 = vmatprep.subr.bf16.mxu0 %v2218_v1 }
  0x75   : > { %1764 = vmatpush3.bf16.msra.mxu1 %v1979_v39  ;;  %v2002_v39 = vld [vmem:[#allocation6 + $0xe8] sm:$0xff]  }
  0x76   : > { %1765 = vmatprep.subr.bf16.mxu1 %v2218_v1 }
  0x79   : > { %1766 = vmatpush3.bf16.msra.mxu1 %v1981_v41  ;;  %v2004_v41 = vld [vmem:[#allocation6 + $0xe0] sm:$0xff]  }
  0x7a   : > { %1752 = vmatmul.mubr.msk.bf16.vlgmr.msra.gmra.mxu0 %vm460_vm2, %v563_v32  ;;  %1767 = vmatprep.subr.bf16.mxu1 %v2218_v1 }
  0x7b   : > { %1791 = vmatprep.mubr.msk.bf16.mxu0 %vm2219_vm0, %v2218_v1  ;;  %1776 = vmatpush3.bf16.msra.mxu0 %v1974_v34  ;;  %v1996_v34 = vld [vmem:[#allocation6 + $0x138] sm:$0xff]  }
  0x7c   : > { %1777 = vmatprep.subr.bf16.mxu0 %v2218_v1 }
  0x7d   : > { %1768 = vmatpush3.bf16.msra.mxu1 %v1983_v43  ;;  %v2005_v43 = vld [vmem:[#allocation6 + $0x110] sm:$0xff]  }
  0x7e   : > { %1769 = vmatprep.subr.bf16.mxu1 %v2218_v1 }
  0x7f   : > { %1778 = vmatpush3.bf16.msra.mxu0 %v1976_v36  ;;  %v1997_v36 = vld [vmem:[#allocation6 + $0x130] sm:$0xff]  }
  0x80   : > { %1779 = vmatprep.subr.bf16.mxu0 %v2218_v1 }
  0x81   : > { %1770 = vmatpush3.bf16.msra.mxu1 %v1985_v45  ;;  %v2007_v45 = vld [vmem:[#allocation6 + $0x108] sm:$0xff]  }
  0x82   : > { %1795 = vmatprep.subr.bf16.mxu1 %v2218_v1 }
  0x83   : > { %1780 = vmatpush3.bf16.msra.mxu0 %v1978_v38  ;;  %v1999_v38 = vld [vmem:[#allocation6 + $0x128] sm:$0xff]  }
  0x84   : > { %1781 = vmatprep.subr.bf16.mxu0 %v2218_v1 }
  0x87   : > { %1782 = vmatpush3.bf16.msra.mxu0 %v1980_v40  ;;  %v2001_v40 = vld [vmem:[#allocation6 + $0x120] sm:$0xff]  }
  0x88   : > { %1783 = vmatprep.subr.bf16.mxu0 %v2218_v1 }
  0x8b   : > { %1784 = vmatpush3.bf16.msra.mxu0 %v1982_v42  ;;  %v2003_v42 = vld [vmem:[#allocation6 + $0x118] sm:$0xff]  }
  0x8c   : > { %1785 = vmatprep.subr.bf16.mxu0 %v2218_v1 }
  0x8f   : > { %1786 = vmatpush3.bf16.msra.mxu0 %v1984_v44  ;;  %v2006_v44 = vld [vmem:[#allocation6 + $0xd8] sm:$0xff]  }
  0x90   : > { %1787 = vmatprep.subr.bf16.mxu0 %v2218_v1 }
  0x93   : > { %1788 = vmatpush3.bf16.msra.mxu0 %v1986_v46  ;;  %v2008_v46 = vld [vmem:[#allocation6 + $0xd0] sm:$0xff]  }
  0x94   : > { %1789 = vmatprep.subr.bf16.mxu0 %v2218_v1 }
  0x97   : > { %1790 = vmatpush3.bf16.msra.mxu0 %v1988_v47  ;;  %v2009_v47 = vld [vmem:[#allocation6 + $0x100] sm:$0xff]  }
  0x98   : > { %1815 = vmatprep.subr.bf16.mxu0 %v2218_v1 }
  0xe4   : > { %v2452_v63 = vpop.permute.xlu0 %627 }
  0xe8   : > { %v2457_v9 = vpop.permute.xlu0 %632 }
 0x12a   : > { %v502_v48 = vpop.f32.mrf.mxu0 }
 0x12c   : > { %v1741_v49 = vpop.f32.mrf.mxu0 }
 0x12d   : > { %v2012_v49 = vld [vmem:[#allocation6 + $0xc0] sm:$0xff]  }
 0x12e   : > { %v505_v50 = vpop.f32.mrf.mxu0 }
 0x130   : > { %v1742_v51 = vpop.f32.mrf.mxu0 }
 0x132   : > { %v549_v52 = vpop.f32.mrf.mxu0 }
 0x133   : > { %v550_v56 = vadd.f32 %v549_v52, %v502_v48  ;;  %v2010_v48 = vld [vmem:[#allocation6 + $0xc8] sm:$0xff]  }
 0x134   : > { %v1747_v53 = vpop.f32.mrf.mxu0 }
 0x136   : > { %v552_v54 = vpop.f32.mrf.mxu0 }
 0x137   : > { %v553_v61 = vadd.f32 %v552_v54, %v505_v50 }
 0x138   : > { %v1748_v55 = vpop.f32.mrf.mxu0 }
 0x13a   : > { %v606_v58 = vpop.f32.mrf.mxu0 }
 0x13b   : > { %v613_v59 = vadd.f32 %v606_v58, %v550_v56 }
 0x13c   : > { %v1753_v60 = vpop.f32.mrf.mxu0 }
 0x13d   : > { %v621_v62 = vadd.f32 %v1606_v57, %v613_v59  ;;  %v1631_v59 = vld [vmem:[#allocation7] ss:$0 sm:$0xff] }
 0x13e   : > { %v609_v0 = vpop.f32.mrf.mxu0 }
 0x13f   : > { %v623_v3 = vmax.f32 %v621_v62, 0.0  ;;  %v614_v4 = vadd.f32 %v609_v0, %v553_v61 }
 0x140   : > { %v1754_v5 = vpop.f32.mrf.mxu0 }
 0x141   : > { %v622_v6 = vadd.f32 %v1606_v57, %v614_v4  ;;  %v2455_v7 = vmul.f32 %v2452_v63, %v623_v3 }
 0x143   : > { %v624_v8 = vmax.f32 %v622_v6, 0.0  ;;  %v638_v13 = vrot.slane %v2455_v7, 7  ;;  %v857_v27 = vrot.slane %v2455_v7, 1 }
 0x145   : > { %v2460_v11 = vmul.f32 %v2457_v9, %v624_v8 }
 0x147   : > { %v639_v14 = vrot.slane %v2460_v11, 7  ;;  %v661_v15 = vpack.c.bf16 %v2460_v11, %v2455_v7  ;;  %v858_v26 = vrot.slane %v2460_v11, 1 }
 0x149   : > { %1772 = vmatmul.mubr.bf16.vlgmr.msra.gmra.mxu1 %v661_v15  ;;  %v641_v16 = vsel %vm450_vm4, %v639_v14, %v638_v13  ;;  %v640_v19 = vsel %vm450_vm4, %v638_v13, %v639_v14  ;;  %v860_v29 = vsel %vm558_vm5, %v858_v26, %v857_v27  ;;  %v859_v32 = vsel %vm558_vm5, %v857_v27, %v858_v26  ;;  %v2011_v14 = vld [vmem:[#allocation6 + $0x178] sm:$0xff]   ;;  %v2017_v26 = vld [vmem:[#allocation6 + $0x150] sm:$0xff]  }
 0x14a   : > { %1796 = vmatpush3.bf16.msra.mxu1 %v1987_v12  ;;  %v642_v18 = vmul.f32 %v2405_v10, %v641_v16  ;;  %1811 = vmatprep.mubr.msk.bf16.mxu1 %vm2219_vm0, %v2218_v1  ;;  %v862_v31 = vmul.f32 %v2415_v23, %v860_v29  ;;  %v2018_v29 = vld [vmem:[#allocation6 + $0x148] sm:$0xff]  }
 0x14b   : > { %1797 = vmatprep.subr.bf16.mxu1 %v2218_v1 }
 0x14c   : > { %v644_v20 = vpack.c.bf16 %v640_v19, %v642_v18  ;;  %v863_v33 = vpack.c.bf16 %v862_v31, %v859_v32  ;;  %v2013_v19 = vld [vmem:[#allocation6 + $0x170] sm:$0xff]   ;;  %v2019_v31 = vld [vmem:[#allocation6 + $0x140] sm:$0xff]  }
 0x14e   : > { %1798 = vmatpush3.bf16.msra.mxu1 %v1989_v17  ;;  %1792 = vmatmul.mubr.bf16.vlgmr.msra.gmra.mxu0 %v644_v20 }
 0x14f   : > { %1799 = vmatprep.subr.bf16.mxu1 %v2218_v1  ;;  %1831 = vmatprep.mubr.msk.bf16.mxu0 %vm2219_vm0, %v2218_v1 }
 0x150   : > { %1816 = vmatpush3.bf16.msra.mxu0 %v1996_v34 }
 0x151   : > { %1817 = vmatprep.subr.bf16.mxu0 %v2218_v1 }
 0x152   : > { %1800 = vmatpush3.bf16.msra.mxu1 %v1990_v21 }
 0x153   : > { %1801 = vmatprep.subr.bf16.mxu1 %v2218_v1 }
 0x154   : > { %1818 = vmatpush3.bf16.msra.mxu0 %v1997_v36  ;;  %v2021_v36 = vld [vmem:[#allocation9 + $0x30] sm:$0xff]  }
 0x155   : > { %1819 = vmatprep.subr.bf16.mxu0 %v2218_v1 }
 0x156   : > { %1802 = vmatpush3.bf16.msra.mxu1 %v1991_v22 }
 0x157   : > { %1803 = vmatprep.subr.bf16.mxu1 %v2218_v1 }
 0x158   : > { %1820 = vmatpush3.bf16.msra.mxu0 %v1999_v38  ;;  %v2023_v38 = vld [vmem:[#allocation9 + $0x20] sm:$0xff]  }
 0x159   : > { %1821 = vmatprep.subr.bf16.mxu0 %v2218_v1 }
 0x15a   : > { %1804 = vmatpush3.bf16.msra.mxu1 %v1992_v24  ;;  %v2014_v24 = vld [vmem:[#allocation6 + $0x168] sm:$0xff]  }
 0x15b   : > { %1805 = vmatprep.subr.bf16.mxu1 %v2218_v1 }
 0x15c   : > { %1822 = vmatpush3.bf16.msra.mxu0 %v2001_v40  ;;  %v2027_v40 = vld [vmem:[#allocation9] sm:$0xff]  }
 0x15d   : > { %1823 = vmatprep.subr.bf16.mxu0 %v2218_v1 }
 0x15e   : > { %1806 = vmatpush3.bf16.msra.mxu1 %v1993_v25  ;;  %v2015_v25 = vld [vmem:[#allocation6 + $0x160] sm:$0xff]  }
 0x15f   : > { %1807 = vmatprep.subr.bf16.mxu1 %v2218_v1 }
 0x160   : > { %1824 = vmatpush3.bf16.msra.mxu0 %v2003_v42 }
 0x161   : > { %1825 = vmatprep.subr.bf16.mxu0 %v2218_v1 }
 0x162   : > { %1808 = vmatpush3.bf16.msra.mxu1 %v1994_v28 }
 0x163   : > { %1809 = vmatprep.subr.bf16.mxu1 %v2218_v1 }
 0x164   : > { %1826 = vmatpush3.bf16.msra.mxu0 %v2005_v43 }
 0x165   : > { %1827 = vmatprep.subr.bf16.mxu0 %v2218_v1 }
 0x166   : > { %1810 = vmatpush3.bf16.msra.mxu1 %v1995_v30 }
 0x167   : > { %1835 = vmatprep.subr.bf16.mxu1 %v2218_v1 }
 0x168   : > { %1828 = vmatpush3.bf16.msra.mxu0 %v2007_v45 }
 0x169   : > { %1812 = vmatmul.mubr.bf16.vlgmr.msra.gmra.mxu1 %v863_v33  ;;  %1829 = vmatprep.subr.bf16.mxu0 %v2218_v1 }
 0x16a   : > { %1851 = vmatprep.mubr.msk.bf16.mxu1 %vm2219_vm0, %v2218_v1  ;;  %1836 = vmatpush3.bf16.msra.mxu1 %v1998_v35  ;;  %v2020_v35 = vld [vmem:[#allocation9 + $0x38] sm:$0xff]  }
 0x16b   : > { %1837 = vmatprep.subr.bf16.mxu1 %v2218_v1 }
 0x16c   : > { %1830 = vmatpush3.bf16.msra.mxu0 %v2009_v47 }
 0x16d   : > { %1855 = vmatprep.subr.bf16.mxu0 %v2218_v1 }
 0x16e   : > { %1838 = vmatpush3.bf16.msra.mxu1 %v2000_v37  ;;  %v2022_v37 = vld [vmem:[#allocation9 + $0x28] sm:$0xff]  }
 0x16f   : > { %1839 = vmatprep.subr.bf16.mxu1 %v2218_v1 }
 0x172   : > { %1840 = vmatpush3.bf16.msra.mxu1 %v2002_v39  ;;  %v2026_v39 = vld [vmem:[#allocation9 + $0x8] sm:$0xff]  }
 0x173   : > { %1841 = vmatprep.subr.bf16.mxu1 %v2218_v1 }
 0x176   : > { %1842 = vmatpush3.bf16.msra.mxu1 %v2004_v41 }
 0x177   : > { %1843 = vmatprep.subr.bf16.mxu1 %v2218_v1 }
 0x17a   : > { %1844 = vmatpush3.bf16.msra.mxu1 %v2006_v44 }
 0x17b   : > { %1845 = vmatprep.subr.bf16.mxu1 %v2218_v1 }
 0x17e   : > { %1846 = vmatpush3.bf16.msra.mxu1 %v2008_v46 }
 0x17f   : > { %1847 = vmatprep.subr.bf16.mxu1 %v2218_v1 }
 0x182   : > { %1848 = vmatpush3.bf16.msra.mxu1 %v2010_v48 }
 0x183   : > { %1849 = vmatprep.subr.bf16.mxu1 %v2218_v1 }
 0x186   : > { %1850 = vmatpush3.bf16.msra.mxu1 %v2012_v49 }
 0x187   : > { %1875 = vmatprep.subr.bf16.mxu1 %v2218_v1 }
 0x209   : > { %v761_v50 = vpop.f32.mrf.mxu1 }
 0x20b   : > { %v1773_v51 = vpop.f32.mrf.mxu1 }
 0x20d   : > { %v764_v52 = vpop.f32.mrf.mxu1 }
 0x20e   : > { %v850_v53 = vpop.f32.mrf.mxu0 }
 0x20f   : > { %v1774_v54 = vpop.f32.mrf.mxu1  ;;  %v851_v58 = vadd.f32 %v850_v53, %v761_v50  ;;  %v1656_v50 = vld [vmem:[#allocation7 + $0x1] ss:$0 sm:$0xff] }
 0x210   : > { %v1793_v55 = vpop.f32.mrf.mxu0 }
 0x212   : > { %v853_v56 = vpop.f32.mrf.mxu0 }
 0x213   : > { %v854_v0 = vadd.f32 %v853_v56, %v764_v52 }
 0x214   : > { %v1794_v57 = vpop.f32.mrf.mxu0 }
 0x229   : > { %v963_v60 = vpop.f32.mrf.mxu1 }
 0x22a   : > { %v970_v61 = vadd.f32 %v963_v60, %v851_v58 }
 0x22b   : > { %v1813_v62 = vpop.f32.mrf.mxu1 }
 0x22c   : > { %v978_v3 = vadd.f32 %v1631_v59, %v970_v61 }
 0x22d   : > { %v966_v4 = vpop.f32.mrf.mxu1 }
 0x22e   : > { %v971_v5 = vadd.f32 %v966_v4, %v854_v0  ;;  %v980_v8 = vmax.f32 %v978_v3, 0.0 }
 0x22f   : > { %v1814_v6 = vpop.f32.mrf.mxu1 }
 0x230   : > { %v979_v12 = vadd.f32 %v1631_v59, %v971_v5  ;;  %v984_v15 = vrot.slane %v980_v8, 7  ;;  %v1204_v28 = vrot.slane %v980_v8, 1  ;;  %v1657_v5 = vld [vmem:[#allocation10] ss:$0 sm:$0xff] }
 0x232   : > { %v981_v13 = vmax.f32 %v979_v12, 0.0 }
 0x234   : > { %v985_v16 = vrot.slane %v981_v13, 7  ;;  %v1008_v17 = vpack.c.bf16 %v981_v13, %v980_v8  ;;  %v1205_v27 = vrot.slane %v981_v13, 1 }
 0x236   : > { %1832 = vmatmul.mubr.bf16.vlgmr.msra.gmra.mxu0 %v1008_v17  ;;  %v987_v18 = vsel %vm450_vm4, %v985_v16, %v984_v15  ;;  %v986_v21 = vsel %vm450_vm4, %v984_v15, %v985_v16  ;;  %v1207_v30 = vsel %vm558_vm5, %v1205_v27, %v1204_v28  ;;  %v1206_v33 = vsel %vm558_vm5, %v1204_v28, %v1205_v27 }
 0x237   : > { %1856 = vmatpush3.bf16.msra.mxu0 %v2011_v14  ;;  %v988_v20 = vmul.f32 %v2405_v10, %v987_v18  ;;  %1871 = vmatprep.mubr.msk.bf16.mxu0 %vm2219_vm0, %v2218_v1  ;;  %v2016_v10 = vld [vmem:[#allocation6 + $0x158] sm:$0xff]   ;;  %v1209_v32 = vmul.f32 %v2415_v23, %v1207_v30 }
 0x238   : > { %1857 = vmatprep.subr.bf16.mxu0 %v2218_v1  ;;  %v2025_v23 = vld [vmem:[#allocation9 + $0x10] sm:$0xff]  }
 0x239   : > { %v990_v22 = vpack.c.bf16 %v986_v21, %v988_v20  ;;  %v1210_v34 = vpack.c.bf16 %v1209_v32, %v1206_v33 }
 0x23b   : > { %1858 = vmatpush3.bf16.msra.mxu0 %v2013_v19  ;;  %1852 = vmatmul.mubr.bf16.vlgmr.msra.gmra.mxu1 %v990_v22 }
 0x23c   : > { %1859 = vmatprep.subr.bf16.mxu0 %v2218_v1  ;;  %1891 = vmatprep.mubr.msk.bf16.mxu1 %vm2219_vm0, %v2218_v1 }
 0x23d   : > { %1876 = vmatpush3.bf16.msra.mxu1 %v2020_v35 }
 0x23e   : > { %1877 = vmatprep.subr.bf16.mxu1 %v2218_v1 }
 0x23f   : > { %1860 = vmatpush3.bf16.msra.mxu0 %v2014_v24 }
 0x240   : > { %1861 = vmatprep.subr.bf16.mxu0 %v2218_v1 }
 0x241   : > { %1878 = vmatpush3.bf16.msra.mxu1 %v2021_v36 }
 0x242   : > { %1879 = vmatprep.subr.bf16.mxu1 %v2218_v1 }
 0x243   : > { %1862 = vmatpush3.bf16.msra.mxu0 %v2015_v25 }
 0x244   : > { %1863 = vmatprep.subr.bf16.mxu0 %v2218_v1 }
 0x245   : > { %1880 = vmatpush3.bf16.msra.mxu1 %v2022_v37 }
 0x246   : > { %1881 = vmatprep.subr.bf16.mxu1 %v2218_v1 }
 0x247   : > { %1864 = vmatpush3.bf16.msra.mxu0 %v2016_v10 }
 0x248   : > { %1865 = vmatprep.subr.bf16.mxu0 %v2218_v1 }
 0x249   : > { %1882 = vmatpush3.bf16.msra.mxu1 %v2023_v38 }
 0x24a   : > { %1883 = vmatprep.subr.bf16.mxu1 %v2218_v1 }
 0x24b   : > { %1866 = vmatpush3.bf16.msra.mxu0 %v2017_v26 }
 0x24c   : > { %1867 = vmatprep.subr.bf16.mxu0 %v2218_v1 }
 0x24d   : > { %1884 = vmatpush3.bf16.msra.mxu1 %v2024_v2 }
 0x24e   : > { %1885 = vmatprep.subr.bf16.mxu1 %v2218_v1 }
 0x24f   : > { %1868 = vmatpush3.bf16.msra.mxu0 %v2018_v29 }
 0x250   : > { %1869 = vmatprep.subr.bf16.mxu0 %v2218_v1 }
 0x251   : > { %1886 = vmatpush3.bf16.msra.mxu1 %v2025_v23 }
 0x252   : > { %1887 = vmatprep.subr.bf16.mxu1 %v2218_v1 }
 0x253   : > { %1870 = vmatpush3.bf16.msra.mxu0 %v2019_v31 }
 0x255   : > { %1888 = vmatpush3.bf16.msra.mxu1 %v2026_v39 }
 0x256   : > { %1872 = vmatmul.mubr.bf16.vlgmr.msra.gmra.mxu0 %v1210_v34  ;;  %1889 = vmatprep.subr.bf16.mxu1 %v2218_v1 }
 0x259   : > { %1890 = vmatpush3.bf16.msra.mxu1 %v2027_v40 }
 0x2f6   : > { %v1108_v41 = vpop.f32.mrf.mxu0 }
 0x2f8   : > { %v1833_v42 = vpop.f32.mrf.mxu0 }
 0x2fa   : > { %v1111_v43 = vpop.f32.mrf.mxu0 }
 0x2fb   : > { %v1197_v44 = vpop.f32.mrf.mxu1 }
 0x2fc   : > { %v1834_v45 = vpop.f32.mrf.mxu0  ;;  %v1198_v49 = vadd.f32 %v1197_v44, %v1108_v41 }
 0x2fd   : > { %v1853_v46 = vpop.f32.mrf.mxu1 }
 0x2ff   : > { %v1200_v47 = vpop.f32.mrf.mxu1 }
 0x300   : > { %v1201_v54 = vadd.f32 %v1200_v47, %v1111_v43 }
 0x301   : > { %v1854_v48 = vpop.f32.mrf.mxu1 }
 0x316   : > { %v1310_v51 = vpop.f32.mrf.mxu0 }
 0x317   : > { %v1317_v52 = vadd.f32 %v1310_v51, %v1198_v49 }
 0x318   : > { %v1873_v53 = vpop.f32.mrf.mxu0 }
 0x319   : > { %v1325_v55 = vadd.f32 %v1656_v50, %v1317_v52 }
 0x31a   : > { %v1313_v56 = vpop.f32.mrf.mxu0 }
 0x31b   : > { %v1327_v1 = vmax.f32 %v1325_v55, 0.0  ;;  %v1318_v57 = vadd.f32 %v1313_v56, %v1201_v54 }
 0x31c   : > { %v1874_v58 = vpop.f32.mrf.mxu0 }
 0x31d   : > { %v1326_v59 = vadd.f32 %v1656_v50, %v1318_v57  ;;  %v1329_v60 = vmul.f32 %v1327_v1, %v2452_v63 }
 0x31f   : > { %v1328_v61 = vmax.f32 %v1326_v59, 0.0  ;;  %v1331_v0 = vadd.f32 %v1329_v60, %v2455_v7 }
 0x321   : > { %v1330_v62 = vmul.f32 %v1328_v61, %v2457_v9 }
 0x323   : > { %v1332_v3 = vadd.f32 %v1330_v62, %v2460_v11 }
 0x325   : > { %v1333_v4 = vpack.c.bf16 %v1332_v3, %v1331_v0 }
 0x327   : > { %1892 = vmatmul.mubr.bf16.vlgmr.msra.gmra.mxu1 %v1333_v4 }
 0x3e7   : > { %v1439_v6 = vpop.f32.mrf.mxu1 }
 0x3e8   : > { %v1440_v8 = vadd.f32 %v1657_v5, %v1439_v6 }
 0x3e9   : > { %v1893_v12 = vpop.f32.mrf.mxu1 }
 0x3ea   : > { %v1446_v13 = vmul.f32 %v1440_v8, %v2452_v63 }
 0x3eb   : > { %v1442_v14 = vpop.f32.mrf.mxu1 }
 0x3ec   : > { %1448 = vst [vmem:[%s413_s15] sm:$0xff] %v1446_v13  ;;  %v1443_v15 = vadd.f32 %v1657_v5, %v1442_v14 }
 0x3ed   : > { %v1894_v16 = vpop.f32.mrf.mxu1 }
 0x3ee   : > { %v1447_v7 = vmul.f32 %v1443_v15, %v2457_v9 }
 0x3f0   : > { %1449 = vst [vmem:[%s413_s15 + $0x8] sm:$0xff] %v1447_v7 }
 0x3f1 PF: > { %s22_s27 = sadd.s32 1, %s2206_s27  }
 0x3f2   : > { %p19_p2 = scmp.ge.s32.totalorder %s22_s27, 6  }
 0x3f4   :  { %21 = sbr.rel (!%p19_p2) target bundleno = 4 (0x4), region = 118 }
 0x3f9   :  { %1472 = vsyncpa [#allocation3], 1 }
 0x3fa   :  { %1474 = vsyncpa [#allocation3 + $0x1], 1 }
 0x3fb   :  { %1475 = vsyncpa [#allocation5], 1 }
 0x3fc   :  { %1476 = vsyncpa [#allocation8], 1 }
 0x3fd   :  { %1477 = vsyncpa [#allocation11], 1 }

// kernel: local_feature_extractor_fwd.3
= control target key start
LH: loop header
LB: loop body
LE: loop exit
PB: predicated region body
PF: predicated region fallthrough
CT: control target
= control target key end

     0   :  { %s11890_s0 = inlined_call_operand.vmem [shape: f32[32,16], index: 0, kind: input, shape index: {}]   ;;  %s11891_s1 = inlined_call_operand.vmem [shape: f32[32,128], index: 1, kind: input, shape index: {}]   ;;  %s11892_s2 = inlined_call_operand.vmem [shape: f32[32,1], index: 2, kind: input, shape index: {}]   ;;  %s11893_s3 = inlined_call_operand.vmem [shape: f32[4,1,8], index: 3, kind: input, shape index: {}]   ;;  %s11894_s4 = inlined_call_operand.vmem [shape: bf16[16,128], index: 4, kind: input, shape index: {}]   ;;  %s11895_s5 = inlined_call_operand.vmem [shape: f32[1,128], index: 5, kind: input, shape index: {}]   ;;  %s11896_s6 = inlined_call_operand.vmem [shape: bf16[2,128,256], index: 6, kind: input, shape index: {}]   ;;  %s11897_s7 = inlined_call_operand.vmem [shape: bf16[2,128,256], index: 7, kind: input, shape index: {}]   ;;  %s11898_s8 = inlined_call_operand.vmem [shape: bf16[36,128,128], index: 8, kind: input, shape index: {}]   ;;  %s11899_s9 = inlined_call_operand.vmem [shape: f32[4,1,128], index: 9, kind: input, shape index: {}]   ;;  %s11900_s10 = inlined_call_operand.vmem [shape: bf16[4,128,128], index: 10, kind: input, shape index: {}]   ;;  %s11901_s11 = inlined_call_operand.vmem [shape: f32[4,1,128], index: 11, kind: input, shape index: {}]   ;;  %s11902_s12 = inlined_call_operand.vmem [shape: f32[4,1,128], index: 12, kind: input, shape index: {}]   ;;  %s11903_s13 = inlined_call_operand.vmem [shape: f32[4,1,128], index: 13, kind: input, shape index: {}]   ;;  %s11904_s14 = inlined_call_operand.vmem [shape: bf16[128,128], index: 14, kind: input, shape index: {}]   ;;  %s11905_s15 = inlined_call_operand.vmem [shape: bf16[128,128], index: 15, kind: input, shape index: {}]   ;;  %s11906_s16 = inlined_call_operand.vmem [shape: f32[1,128], index: 16, kind: input, shape index: {}]   ;;  %s11907_s17 = inlined_call_operand.vmem [shape: bf16[128,1], index: 17, kind: input, shape index: {}]   ;;  %s11908_s18 = inlined_call_operand.<no memory space> [shape: f32[1,1], index: 18, kind: input, shape index: {}]   ;;  %s11909_s19 = inlined_call_operand.hbm [shape: f32[32,128], index: 19, kind: output, shape index: {}]  }
   0x1   :  { %11916 = sst [smem:[#allocation12_spill]] %s11890_s0  ;;  %v24_v0 = vstv %s11908_s18 }
   0x2   :  { %11917 = sst [smem:[#allocation13_spill]] %s11891_s1  ;;  %25 = vst [vmem:[#allocation2] sm:$0x1] %v24_v0 }
   0x3   :  { %11918 = sst [smem:[#allocation14_spill]] %s11892_s2 }
   0x4   :  { %11919 = sst [smem:[#allocation15_spill]] %s11893_s3 }
   0x5   :  { %11920 = sst [smem:[#allocation16_spill]] %s11894_s4 }
   0x6   :  { %26 = vsyncpa [#allocation4], 0 }
   0x7   :  { %28 = vsyncpa [#allocation4 + $0x1], 0  ;;  %s9829_s20 = smov 0   ;;  %s9831_s21 = smov 0  }
   0x8   :  { %s9833_s1 = smov 0   ;;  %s9835_s22 = smov 0  }
   0x9 LB: > { %11921 = sst [smem:[#allocation6_spill]] %s9708_s20  ;;  %s9850_s18 = sadd.s32 4294967295, %s9720_s22   ;;  %s9720_s22 = sphi %s9835_s22, %s11937_s22   ;;  %s9716_s1 = sphi %s9833_s1, %s11939_s1   ;;  %s9712_s21 = sphi %s9831_s21, %s11941_s21   ;;  %s9708_s20 = sphi %s9829_s20, %s11940_s20  }
   0xa   : > { %11922 = sst [smem:[#allocation7_spill]] %s9716_s1  ;;  %s6721_s2 = sadd.s32 4294967294, %s9720_s22  }
   0xb   : > { %11923 = sst [smem:[#allocation8_spill]] %s9720_s22  ;;  %s9854_s23 = sadd.s32 1, %s9720_s22  }
   0xc   : > { %11924 = sst [smem:[#allocation9_spill]] %s9854_s23  ;;  %s460_s24 = sadd.s32 1, %s9716_s1 }
   0xd   : > { %s457_s25 = ssub.s32 %s9720_s22, %s9854_s23  ;;  %p470_p0 = scmp.ne.s32.totalorder %s9716_s1, %s9712_s21 }
   0xe   : > { %p458_p1 = scmp.eq.s32.totalorder %s457_s25, 0  ;;  %p471_p2 = scmp.eq.s32.totalorder %s9850_s18, 3 }
   0xf   : > { %p476_p3 = scmp.ne.s32.totalorder %s9712_s21, %s9708_s20  ;;  %p477_p4 = scmp.eq.s32.totalorder %s6721_s2, 3 }
  0x10   : > { %s9865_s3 = scalar_select %p458_p1, %s9716_s1, %s460_s24  }
  0x11   : > { %p9867_p5 = por %p471_p2, %p470_p0  ;;  %p9871_p6 = por %p477_p4, %p476_p3 }
  0x12   : > { %11925 = sst [smem:[#allocation10_spill]] %s9865_s3  ;;  %p6724_p7 = scmp.ge.s32.totalorder %s9720_s22, 1 }
  0x13   : > { %s11927_s27 = scalar_select %p9871_p6, 1, 0 }
  0x14   : > { %p567_p8 = scmp.lt.s32.totalorder %s9720_s22, 5 }
  0x15   : > { %11928 = sst [smem:[#allocation11_spill]] %s11927_s27 }
  0x16   : > { %p568_p9 = pnand %p6724_p7, %p567_p8 }
  0x17   : > { %s11929_s4 = sld [smem:[#allocation16_spill]] (!%p568_p9)  ;;  %p633_p10 = scmp.lt.s32.totalorder (!%p568_p9), %s9850_s18, 3 }
  0x18   : > { %571 = sbr.rel (%p568_p9) target bundleno = 5481 (0x1569), region = 96  ;;  %s11930_s29 = sld [smem:[#allocation12_spill]] (!%p568_p9) }
  0x19   : > { %s11931_s3 = sld [smem:[#allocation14_spill]] (!%p568_p9)  ;;  %s630_s27 = sand.u32 (!%p568_p9), 1, %s9712_s21  }
  0x1a   : > { %s11933_s20 = sld [smem:[#allocation15_spill]] (!%p568_p9)  ;;  %s7824_s30 = sshll.u32 (!%p568_p9), %s9850_s18, 7 }
  0x1d   : > { %v9190_v1 = vld [vmem:[%s11929_s4] sm:$0xff]   ;;  %v9722_v2 = vmov 0.0   ;;  %vm9723_vm0 = vmmov 0   ;;  %v9193_v3 = vld [vmem:[%s11897_s7 + $0x74] ss:$8 sps:$4 sm:$0xff]   ;;  %s9888_s2 = scalar_select %p633_p10, %s9850_s18, 3  ;;  %v652_v62 = vlaneseq }
  0x1e   : > { %8232 = vmatprep.subr.bf16.mxu0 %v9722_v2  ;;  %8234 = vmatprep.mubr.msk.bf16.mxu0 %vm9723_vm0, %v9722_v2  ;;  %v9724_v4 = vmov 0   ;;  %v9191_v5 = vld [vmem:[%s11897_s7 + $0x70] ss:$8 sps:$4 sm:$0xff]   ;;  %v9196_v6 = vld [vmem:[%s11897_s7 + $0x64] ss:$8 sps:$4 sm:$0xff]   ;;  %vm724_vm1 = vcmask 130048  }
  0x1f   : > { %8233 = vmatpush3.bf16.msra.mxu0 %v9190_v1  ;;  %9188 = vset.pattern.permute.xlu0 %v9724_v4  ;;  %s9894_s24 = sshll.u32 %s9888_s2, 3  ;;  %v9203_v10 = vld [vmem:[%s11896_s6 + $0x74] ss:$8 sps:$4 sm:$0xff]   ;;  %v9205_v11 = vld [vmem:[%s11896_s6 + $0x70] ss:$8 sps:$4 sm:$0xff]   ;;  %vm1116_vm2 = vcmask 1043456  }
  0x20   : > { %904 = vmatprep.mubr.bf16.mxu1 %v9724_v4  ;;  %1010 = vmatprep.subr.bf16.mxu0 %v9193_v3  ;;  %s636_s0 = scalar_lea.vmem %s11930_s29, %s9894_s24  ;;  %s644_s1 = scalar_lea.vmem %s11931_s3, %s9894_s24  ;;  %v9194_v12 = vld [vmem:[%s11897_s7 + $0x60] ss:$8 sps:$4 sm:$0xff]   ;;  %v9209_v13 = vld [vmem:[%s11896_s6 + $0x64] ss:$8 sps:$4 sm:$0xff]   ;;  %v9199_v15 = vld [vmem:[%s11897_s7 + $0x54] ss:$8 sps:$4 sm:$0xff]  }
  0x21   : > { %9189 = vset.pattern.permute.xlu1 %v9724_v4  ;;  %v707_v7 = vld [vmem:[%s636_s0] sm:$0xff]  ;;  %872 = vmatprep.subr.bf16.mxu1 %v9203_v10  ;;  %v9215_v16 = vld [vmem:[%s11896_s6 + $0x54] ss:$8 sps:$4 sm:$0xff]   ;;  %v9197_v17 = vld [vmem:[%s11897_s7 + $0x50] ss:$8 sps:$4 sm:$0xff]   ;;  %s11932_s3 = sld [smem:[#allocation13_spill]]  ;;  %s647_s22 = scalar_lea.vmem %s11933_s20, %s9888_s2 }
  0x22   : > { %v649_v8 = vld [vmem:[%s644_s1] sm:$0xff]  ;;  %v708_v9 = vpack.c.bf16 %v707_v7, %v707_v7  ;;  %873 = vmatpush1.bf16.msra.mxu1 %v9205_v11  ;;  %v9217_v18 = vld [vmem:[%s11896_s6 + $0x50] ss:$8 sps:$4 sm:$0xff]   ;;  %v9208_v23 = vld [vmem:[%s11897_s7 + $0x34] ss:$8 sps:$4 sm:$0xff]   ;;  %v10028_v63 = vshrl.u32 %v652_v62, 7 }
  0x23   : > { %770 = vperm.xlu0 %9188, %v649_v8   ;;  %v9211_v14 = vld [vmem:[%s11896_s6 + $0x60] ss:$8 sps:$4 sm:$0xff]   ;;  %874 = vmatprep.subr.bf16.mxu1 %v9209_v13  ;;  %v9202_v19 = vld [vmem:[%s11897_s7 + $0x44] ss:$8 sps:$4 sm:$0xff]   ;;  %v9227_v24 = vld [vmem:[%s11896_s6 + $0x34] ss:$8 sps:$4 sm:$0xff]  }
  0x24   : > { %8235 = vmatmul.mubr.msk.bf16.vlgmr.msra.gmra.mxu0 %vm724_vm1, %v708_v9  ;;  %v9221_v20 = vld [vmem:[%s11896_s6 + $0x44] ss:$8 sps:$4 sm:$0xff]   ;;  %v9200_v21 = vld [vmem:[%s11897_s7 + $0x40] ss:$8 sps:$4 sm:$0xff]   ;;  %v9206_v25 = vld [vmem:[%s11897_s7 + $0x30] ss:$8 sps:$4 sm:$0xff]  }
  0x25   : > { %1011 = vmatpush1.bf16.msra.mxu0 %v9191_v5  ;;  %1042 = vmatprep.mubr.bf16.mxu0 %v9724_v4  ;;  %v9223_v22 = vld [vmem:[%s11896_s6 + $0x40] ss:$8 sps:$4 sm:$0xff]   ;;  %v9229_v26 = vld [vmem:[%s11896_s6 + $0x30] ss:$8 sps:$4 sm:$0xff]   ;;  %v9214_v27 = vld [vmem:[%s11897_s7 + $0x24] ss:$8 sps:$4 sm:$0xff]  }
  0x26   : > { %1012 = vmatprep.subr.bf16.mxu0 %v9196_v6  ;;  %875 = vmatpush1.bf16.msra.mxu1 %v9211_v14  ;;  %v9230_v28 = vld [vmem:[%s11896_s6 + $0x24] ss:$8 sps:$4 sm:$0xff]   ;;  %v9212_v29 = vld [vmem:[%s11897_s7 + $0x20] ss:$8 sps:$4 sm:$0xff]   ;;  %v9220_v31 = vld [vmem:[%s11897_s7 + $0x14] ss:$8 sps:$4 sm:$0xff]  }
  0x27   : > { %876 = vmatprep.subr.bf16.mxu1 %v9215_v16  ;;  %v9232_v30 = vld [vmem:[%s11896_s6 + $0x20] ss:$8 sps:$4 sm:$0xff]   ;;  %v9233_v32 = vld [vmem:[%s11896_s6 + $0x14] ss:$8 sps:$4 sm:$0xff]   ;;  %v9218_v33 = vld [vmem:[%s11897_s7 + $0x10] ss:$8 sps:$4 sm:$0xff]   ;;  %s9990_s23 = scalar_lea.vmem %s11932_s3, %s9894_s24  ;;  %s6627_s3 = scalar_lea.hbm %s11909_s19, %s7824_s30 }
  0x28   : > { %v9226_v34 = vld [vmem:[%s11897_s7 + $0x4] ss:$8 sps:$4 sm:$0xff]   ;;  %v9224_v35 = vld [vmem:[%s11897_s7] ss:$8 sps:$4 sm:$0xff]   ;;  %v9235_v38 = vld [vmem:[%s11896_s6 + $0x10] ss:$8 sps:$4 sm:$0xff]  }
  0x29   : > { %1013 = vmatpush1.bf16.msra.mxu0 %v9194_v12  ;;  %v774_v36 = vld [vmem:[%s9990_s23] sm:$0xff]  ;;  %v1056_v3 = vsub.s32 0, %v10028_v63  ;;  %vm1099_vm3 = vcmask 64512   ;;  %s6725_s0 = sshll.u32 %s630_s27, 3  ;;  %s6616_s20 = scalar_lea.sflag [#allocation4], %s630_s27 }
  0x2a   : > { %1014 = vmatprep.subr.bf16.mxu0 %v9199_v15  ;;  %877 = vmatpush1.bf16.msra.mxu1 %v9217_v18  ;;  %v913_v37 = vpack.c.bf16 %v774_v36, %v774_v36  ;;  %v9236_v39 = vld [vmem:[%s11896_s6 + $0x4] ss:$8 sps:$4 sm:$0xff]   ;;  %v9238_v40 = vld [vmem:[%s11896_s6] ss:$8 sps:$4 sm:$0xff]   ;;  %s632_s25 = scalar_lea.vmem [#allocation3], %s6725_s0 }
  0x2b   : > { %878 = vmatprep.subr.bf16.mxu1 %v9221_v20  ;;  %v6738_v41 = vld [vmem:[%s11895_s5] ss:$0 sm:$0xff]  ;;  %s6629_s28 = sshll.u32 %s632_s25, 4  ;;  %s6630_s28 = int_to_ptr.vmem [resolvable:$true] %s6629_s28 }
  0x2c   : > { %v650_v0 = vld [vmem:[%s647_s22] sm:$0x1]  ;;  %s9660_s22 = scalar_lea.vmem %s6630_s28, 128 }
  0x2d   : > { %1015 = vmatpush1.bf16.msra.mxu0 %v9197_v17  ;;  %v651_v1 = vmul.f32 -1e+09, %v650_v0  ;;  %p9661_p11 = scmp.ne.s32.totalorder %s6630_s28, %s9660_s22 }
  0x2e   : > { %1016 = vmatprep.subr.bf16.mxu0 %v9202_v19  ;;  %879 = vmatpush1.bf16.msra.mxu1 %v9223_v22 }
  0x2f   : > { %880 = vmatprep.subr.bf16.mxu1 %v9227_v24  ;;  %v10031_v5 = vrot.slane %v651_v1, %v1056_v3  ;;  %p9662_p12 = pnand %p9661_p11, %p9867_p5 }
  0x31   : > { %1017 = vmatpush1.bf16.msra.mxu0 %v9200_v21  ;;  %p9663_p13 = pneg %p9662_p12 }
  0x32   : > { %1018 = vmatprep.subr.bf16.mxu0 %v9208_v23  ;;  %881 = vmatpush1.bf16.msra.mxu1 %v9229_v26 }
  0x33   : > { %882 = vmatprep.subr.bf16.mxu1 %v9230_v28 }
  0x35   : > { %1019 = vmatpush1.bf16.msra.mxu0 %v9206_v25 }
  0x36   : > { %1020 = vmatprep.subr.bf16.mxu0 %v9214_v27  ;;  %883 = vmatpush1.bf16.msra.mxu1 %v9232_v30 }
  0x37   : > { %884 = vmatprep.subr.bf16.mxu1 %v9233_v32 }
  0x39   : > { %1021 = vmatpush1.bf16.msra.mxu0 %v9212_v29 }
  0x3a   : > { %1022 = vmatprep.subr.bf16.mxu0 %v9220_v31  ;;  %885 = vmatpush1.bf16.msra.mxu1 %v9235_v38  ;;  %v9239_v38 = vld [vmem:[%s11898_s8 + $0x2b8] sm:$0xff]  }
  0x3b   : > { %886 = vmatprep.subr.bf16.mxu1 %v9236_v39  ;;  %v9241_v39 = vld [vmem:[%s11898_s8 + $0x2b0] sm:$0xff]  }
  0x3d   : > { %1023 = vmatpush1.bf16.msra.mxu0 %v9218_v33 }
  0x3e   : > { %1024 = vmatprep.subr.bf16.mxu0 %v9226_v34  ;;  %887 = vmatpush1.bf16.msra.mxu1 %v9238_v40  ;;  %v9243_v40 = vld [vmem:[%s11898_s8 + $0x2a8] sm:$0xff]  }
  0x3f   : > { %8262 = vmatprep.subr.bf16.mxu1 %v9722_v2 }
  0x41   : > { %1025 = vmatpush1.bf16.msra.mxu0 %v9224_v35 }
  0x42   : > { %8238 = vmatprep.subr.bf16.mxu0 %v9722_v2 }
  0x44   : > { %1043 = vmatmul.mubr.bf16.vlgmr.msra.gmra.mxu0 %v913_v37 }
  0x45   : > { %8240 = vmatprep.mubr.msk.bf16.mxu0 %vm9723_vm0, %v9722_v2 }
  0x9e   : > { %v771_v43 = vpop.permute.xlu0 %770 }
  0xe4   : > { %v762_v42 = vpop.f32.mrf.mxu0 }
  0xe5   : > { %v763_v44 = vadd.f32 %v6738_v41, %v762_v42  ;;  %v9245_v41 = vld [vmem:[%s11898_s8 + $0x2a0] sm:$0xff]   ;;  %v9247_v42 = vld [vmem:[%s11898_s8 + $0x298] sm:$0xff]  }
  0xe6   : > { %v8236_v45 = vpop.f32.mrf.mxu0 }
  0xe7   : > { %v10012_v46 = vmul.f32 %v771_v43, %v763_v44  ;;  %v9249_v43 = vld [vmem:[%s11898_s8 + $0x290] sm:$0xff]   ;;  %v9251_v44 = vld [vmem:[%s11898_s8 + $0x288] sm:$0xff]  }
  0xe8   : > { %v765_v47 = vpop.f32.mrf.mxu0 }
  0xe9   : > { %v775_v48 = vpack.c.bf16 %v10012_v46, %v10012_v46 }
  0xea   : > { %v8237_v49 = vpop.f32.mrf.mxu0 }
  0xeb   : > { %905 = vmatmul.mubr.bf16.vlgmr.msra.gmra.mxu1 %v775_v48  ;;  %v9240_v49 = vld [vmem:[%s11898_s8 + $0x278] sm:$0xff]  }
  0xec   : > { %8278 = vmatprep.mubr.msk.bf16.mxu1 %vm9723_vm0, %v9722_v2  ;;  %8263 = vmatpush3.bf16.msra.mxu1 %v9239_v38 }
  0xed   : > { %8264 = vmatprep.subr.bf16.mxu1 %v9722_v2 }
  0xf0   : > { %8265 = vmatpush3.bf16.msra.mxu1 %v9241_v39  ;;  %v9271_v39 = vld [vmem:[%s11898_s8 + $0x378] sm:$0xff]  }
  0xf1   : > { %8266 = vmatprep.subr.bf16.mxu1 %v9722_v2 }
  0xf4   : > { %8267 = vmatpush3.bf16.msra.mxu1 %v9243_v40  ;;  %v9272_v40 = vld [vmem:[%s11898_s8 + $0x3b8] sm:$0xff]  }
  0xf5   : > { %8268 = vmatprep.subr.bf16.mxu1 %v9722_v2 }
  0xf8   : > { %8269 = vmatpush3.bf16.msra.mxu1 %v9245_v41 }
  0xf9   : > { %8270 = vmatprep.subr.bf16.mxu1 %v9722_v2 }
  0xfc   : > { %8271 = vmatpush3.bf16.msra.mxu1 %v9247_v42 }
  0xfd   : > { %8272 = vmatprep.subr.bf16.mxu1 %v9722_v2 }
 0x100   : > { %8273 = vmatpush3.bf16.msra.mxu1 %v9249_v43  ;;  %v9273_v43 = vld [vmem:[%s11898_s8 + $0x370] sm:$0xff]  }
 0x101   : > { %8274 = vmatprep.subr.bf16.mxu1 %v9722_v2 }
 0x104   : > { %v1044_v50 = vpop.f32.mrf.mxu0  ;;  %8275 = vmatpush3.bf16.msra.mxu1 %v9251_v44  ;;  %v9274_v44 = vld [vmem:[%s11898_s8 + $0x3b0] sm:$0xff]  }
 0x105   : > { %v1052_v51 = vpack.c.bf16 %v1044_v50, %v1044_v50  ;;  %8276 = vmatprep.subr.bf16.mxu1 %v9722_v2 }
 0x106   : > { %v1046_v52 = vpop.f32.mrf.mxu0 }
 0x107   : > { %8239 = vmatpush3.bf16.xpose.msra.mxu0 %v1052_v51  ;;  %v1112_v55 = vpack.c.bf16 %v1046_v52, %v1046_v52  ;;  %v9244_v52 = vld [vmem:[%s11898_s8 + $0x268] sm:$0xff]  }
 0x108   : > { %v1048_v53 = vpop.f32.mrf.mxu0  ;;  %8244 = vmatprep.subr.bf16.mxu0 %v9722_v2 }
 0x109   : > { %v1118_v59 = vsel %vm1116_vm2, %v1112_v55, 0  ;;  %v9246_v53 = vld [vmem:[%s11898_s8 + $0x260] sm:$0xff]   ;;  %v9250_v55 = vld [vmem:[%s11898_s8 + $0x250] sm:$0xff]  }
 0x10a   : > { %v1049_v54 = vpop.f32.mrf.mxu0 }
 0x10b   : > { %v9248_v54 = vld [vmem:[%s11898_s8 + $0x258] sm:$0xff]  }
 0x1ab   : > { %v906_v56 = vpop.f32.mrf.mxu1 }
 0x1ac   : > { %v1051_v57 = vpack.c.bf16 %v906_v56, %v906_v56  ;;  %v9252_v56 = vld [vmem:[%s11898_s8 + $0x248] sm:$0xff]  }
 0x1ad   : > { %v908_v58 = vpop.f32.mrf.mxu1 }
 0x1ae   : > { %8241 = vmatmul.mubr.bf16.vlgmr.msra.gmra.mxu0 %v1051_v57  ;;  %v1212_v21 = vpack.c.bf16 %v908_v58, %v908_v58  ;;  %v9254_v58 = vld [vmem:[%s11898_s8 + $0x240] sm:$0xff]  }
 0x1af   : > { %8245 = vmatpush3.bf16.msra.mxu0 %v1118_v59  ;;  %v910_v60 = vpop.f32.mrf.mxu1  ;;  %8246 = vmatprep.mubr.msk.bf16.mxu0 %vm9723_vm0, %v9722_v2  ;;  %v660_v59 = vadd.s32 4294967293, %v10028_v63 }
 0x1b0   : > { %8250 = vmatprep.subr.bf16.mxu0 %v9722_v2  ;;  %v1217_v22 = vsel %vm1116_vm2, %v1212_v21, 0  ;;  %v654_v60 = vadd.s32 4294967292, %v10028_v63  ;;  %v9262_v21 = vld [vmem:[%s11898_s8 + $0x320] sm:$0xff]  }
 0x1b1   : > { %v911_v61 = vpop.f32.mrf.mxu1  ;;  %vm661_vm4 = vcmp.ge.s32.totalorder %v660_v59, 0  ;;  %v9286_v59 = vld [vmem:[%s11898_s8 + $0x380] sm:$0xff]  }
 0x1b2   : > { %vm655_vm5 = vcmp.ge.s32.totalorder %v654_v60, 0 }
 0x26e   : > { %v1093_v6 = vpop.f32.mrf.mxu0 }
 0x26f   : > { %v1094_v7 = vadd.f32 %v1093_v6, %v10031_v5  ;;  %v10123_v6 = vsel %vm661_vm4, 1.0, %v9722_v2 }
 0x270   : > { %v8242_v8 = vpop.f32.mrf.mxu0 }
 0x271   : > { %v1100_v9 = vsel %vm1099_vm3, %v1094_v7, -inf }
 0x272   : > { %1101 = vmax.xlane.f32.xlu0 %v1100_v9  ;;  %v1096_v10 = vpop.f32.mrf.mxu0 }
 0x274   : > { %v8243_v11 = vpop.f32.mrf.mxu0 }
 0x275   : > { %v9255_v11 = vld [vmem:[%s11898_s8 + $0x2f8] sm:$0xff]  }
 0x2fb   : > { %v1102_v12 = vpop.xlane.xlu0 %1101 }
 0x2fc   : > { %v1103_v13 = vsub.f32 %v1094_v7, %v1102_v12  ;;  %v10126_v7 = vsel %vm655_vm5, 1.0, %v9722_v2  ;;  %v9256_v12 = vld [vmem:[%s11898_s8 + $0x338] sm:$0xff]  }
 0x2fe   : > { %v1104_v14 = vmul.f32 1.442695, %v1103_v13 }
 0x300   : > { %9631 = vpow2.f32 %v1104_v14 }
 0x30d   : > { %v9632_v15 = vpop.eup %9631 }
 0x30e   : > { %v1106_v16 = vsel %vm1099_vm3, %v9632_v15, 0.0 }
 0x30f   : > { %1107 = vadd.xlane.f32.xlu1 %v1106_v16  ;;  %v9257_v16 = vld [vmem:[%s11898_s8 + $0x2f0] sm:$0xff]  }
 0x398   : > { %v1108_v17 = vpop.xlane.xlu1 %1107 }
 0x399   : > { %9633 = vrcp.f32 %v1108_v17  ;;  %v9258_v17 = vld [vmem:[%s11898_s8 + $0x330] sm:$0xff]  }
 0x3a6   : > { %v9634_v18 = vpop.eup %9633 }
 0x3a7   : > { %v1110_v19 = vmul.f32 %v9634_v18, %v9632_v15  ;;  %v9259_v18 = vld [vmem:[%s11898_s8 + $0x2e8] sm:$0xff]  }
 0x3a9   : > { %v1111_v20 = vpack.c.bf16 %v1110_v19, %v1110_v19  ;;  %v9260_v19 = vld [vmem:[%s11898_s8 + $0x328] sm:$0xff]  }
 0x3ab   : > { %8247 = vmatmul.mubr.msk.bf16.vlgmr.msra.gmra.mxu0 %vm1099_vm3, %v1111_v20  ;;  %v9261_v20 = vld [vmem:[%s11898_s8 + $0x2e0] sm:$0xff]  }
 0x3ac   : > { %8251 = vmatpush3.bf16.xpose.msra.mxu0 %v1051_v57  ;;  %8252 = vmatprep.mubr.msk.bf16.mxu0 %vm9723_vm0, %v9722_v2  ;;  %v9253_v57 = vld [vmem:[%s11898_s8 + $0x280] sm:$0xff]  }
 0x3ad   : > { %8256 = vmatprep.subr.bf16.mxu0 %v9722_v2  ;;  %8277 = vmatpush3.bf16.msra.mxu1 %v9253_v57 }
 0x3ae   : > { %8302 = vmatprep.subr.bf16.mxu1 %v9722_v2 }
 0x3b3   : > { %8253 = vmatmul.mubr.bf16.vlgmr.msra.gmra.mxu0 %v1052_v51  ;;  %v9242_v51 = vld [vmem:[%s11898_s8 + $0x270] sm:$0xff]  }
 0x3b4   : > { %8257 = vmatpush3.bf16.msra.mxu0 %v1217_v22  ;;  %8258 = vmatprep.mubr.msk.bf16.mxu0 %vm9723_vm0, %v9722_v2  ;;  %v9263_v22 = vld [vmem:[%s11898_s8 + $0x2d8] sm:$0xff]  }
 0x3b5   : > { %8282 = vmatprep.subr.bf16.mxu0 %v9722_v2 }
 0x46b   : > { %v10044_v23 = vpop.f32.mrf.mxu0 }
 0x46d   : > { %v8248_v24 = vpop.f32.mrf.mxu0 }
 0x46e   : > { %v9264_v24 = vld [vmem:[%s11898_s8 + $0x318] sm:$0xff]  }
 0x46f   : > { %v1157_v25 = vpop.f32.mrf.mxu0 }
 0x470   : > { %v9265_v25 = vld [vmem:[%s11898_s8 + $0x2d0] sm:$0xff]  }
 0x471   : > { %v8249_v26 = vpop.f32.mrf.mxu0 }
 0x472   : > { %v9266_v26 = vld [vmem:[%s11898_s8 + $0x310] sm:$0xff]  }
 0x473   : > { %v1194_v27 = vpop.f32.mrf.mxu0 }
 0x474   : > { %v1195_v28 = vadd.f32 %v1194_v27, %v10031_v5  ;;  %v666_v27 = vadd.s32 4294967294, %v10028_v63 }
 0x475   : > { %v8254_v29 = vpop.f32.mrf.mxu0 }
 0x476   : > { %v1200_v30 = vsel %vm1099_vm3, %v1195_v28, -inf  ;;  %v9267_v29 = vld [vmem:[%s11898_s8 + $0x2c8] sm:$0xff]   ;;  %vm667_vm6 = vcmp.ge.s32.totalorder %v666_v27, 0 }
 0x477   : > { %1201 = vmax.xlane.f32.xlu1 %v1200_v30  ;;  %v1197_v31 = vpop.f32.mrf.mxu0  ;;  %v9268_v30 = vld [vmem:[%s11898_s8 + $0x308] sm:$0xff]  }
 0x479   : > { %v8255_v32 = vpop.f32.mrf.mxu0 }
 0x500   : > { %v1202_v33 = vpop.xlane.xlu1 %1201 }
 0x501   : > { %v1203_v34 = vsub.f32 %v1195_v28, %v1202_v33  ;;  %v672_v28 = vadd.s32 4294967295, %v10028_v63  ;;  %v9269_v33 = vld [vmem:[%s11898_s8 + $0x2c0] sm:$0xff]  }
 0x503   : > { %v1204_v35 = vmul.f32 1.442695, %v1203_v34  ;;  %vm673_vm7 = vcmp.ge.s32.totalorder %v672_v28, 0  ;;  %v9270_v34 = vld [vmem:[%s11898_s8 + $0x300] sm:$0xff]  }
 0x504   : > { %v9301_v28 = vld [vmem:[%s11898_s8 + $0x3c0] sm:$0xff]  }
 0x505   : > { %9635 = vpow2.f32 %v1204_v35  ;;  %v10201_v35 = vsel %vm667_vm6, 1.0, %v9722_v2 }
 0x512   : > { %v9636_v36 = vpop.eup %9635 }
 0x513   : > { %v1206_v37 = vsel %vm1099_vm3, %v9636_v36, 0.0 }
 0x514   : > { %1207 = vadd.xlane.f32.xlu1 %v1206_v37 }
 0x59d   : > { %v1208_v45 = vpop.xlane.xlu1 %1207 }
 0x59e   : > { %9637 = vrcp.f32 %v1208_v45  ;;  %v9275_v45 = vld [vmem:[%s11898_s8 + $0x368] sm:$0xff]  }
 0x5ab   : > { %v9638_v47 = vpop.eup %9637 }
 0x5ac   : > { %v1210_v48 = vmul.f32 %v9638_v47, %v9636_v36  ;;  %v10204_v36 = vsel %vm673_vm7, 1.0, %v9722_v2  ;;  %v9276_v47 = vld [vmem:[%s11898_s8 + $0x3a8] sm:$0xff]  }
 0x5ae   : > { %v1211_v50 = vpack.c.bf16 %v1210_v48, %v1210_v48  ;;  %v9277_v48 = vld [vmem:[%s11898_s8 + $0x360] sm:$0xff]  }
 0x5b0   : > { %8259 = vmatmul.mubr.msk.bf16.vlgmr.msra.gmra.mxu0 %vm1099_vm3, %v1211_v50  ;;  %v9279_v50 = vld [vmem:[%s11898_s8 + $0x358] sm:$0xff]  }
 0x5b1   : > { %8283 = vmatpush3.bf16.msra.mxu0 %v9240_v49  ;;  %8298 = vmatprep.mubr.msk.bf16.mxu0 %vm9723_vm0, %v9722_v2  ;;  %v9278_v49 = vld [vmem:[%s11898_s8 + $0x3a0] sm:$0xff]  }
 0x5b2   : > { %8284 = vmatprep.subr.bf16.mxu0 %v9722_v2 }
 0x5b5   : > { %8285 = vmatpush3.bf16.msra.mxu0 %v9242_v51  ;;  %v9280_v51 = vld [vmem:[%s11898_s8 + $0x398] sm:$0xff]  }
 0x5b6   : > { %8286 = vmatprep.subr.bf16.mxu0 %v9722_v2 }
 0x5b9   : > { %8287 = vmatpush3.bf16.msra.mxu0 %v9244_v52  ;;  %v9281_v52 = vld [vmem:[%s11898_s8 + $0x350] sm:$0xff]  }
 0x5ba   : > { %8288 = vmatprep.subr.bf16.mxu0 %v9722_v2 }
 0x5bd   : > { %8289 = vmatpush3.bf16.msra.mxu0 %v9246_v53  ;;  %v9282_v53 = vld [vmem:[%s11898_s8 + $0x390] sm:$0xff]  }
 0x5be   : > { %8290 = vmatprep.subr.bf16.mxu0 %v9722_v2 }
 0x5c1   : > { %8291 = vmatpush3.bf16.msra.mxu0 %v9248_v54  ;;  %v678_v54 = vadd.s32 1, %v10028_v63 }
 0x5c2   : > { %8292 = vmatprep.subr.bf16.mxu0 %v9722_v2 }
 0x5c3   : > { %vm680_vm8 = vcmp.lt.s32.totalorder %v678_v54, 8  ;;  %v9316_v54 = vld [vmem:[%s11898_s8 + $0x50] sm:$0xff]  }
 0x5c4   : > { %v10279_v60 = vsel %vm680_vm8, 1.0, %v9722_v2 }
 0x5c5   : > { %8293 = vmatpush3.bf16.msra.mxu0 %v9250_v55  ;;  %v9283_v55 = vld [vmem:[%s11898_s8 + $0x348] sm:$0xff]  }
 0x5c6   : > { %8294 = vmatprep.subr.bf16.mxu0 %v9722_v2 }
 0x5c9   : > { %8295 = vmatpush3.bf16.msra.mxu0 %v9252_v56  ;;  %v9284_v56 = vld [vmem:[%s11898_s8 + $0x388] sm:$0xff]  }
 0x5ca   : > { %8296 = vmatprep.subr.bf16.mxu0 %v9722_v2 }
 0x5cd   : > { %8297 = vmatpush3.bf16.msra.mxu0 %v9254_v58  ;;  %v9285_v58 = vld [vmem:[%s11898_s8 + $0x340] sm:$0xff]  }
 0x5ce   : > { %8322 = vmatprep.subr.bf16.mxu0 %v9722_v2 }
 0x670   : > { %v10118_v61 = vpop.f32.mrf.mxu0 }
 0x671   : > { %v1279_v0 = vrot.slane %v10118_v61, 5  ;;  %v1259_v1 = vrot.slane %v10118_v61, 4  ;;  %v1475_v31 = vrot.slane %v10118_v61, 6  ;;  %v1584_v32 = vrot.slane %v10118_v61, 7 }
 0x672   : > { %v8260_v3 = vpop.f32.mrf.mxu0  ;;  %v1800_v57 = vrot.slane %v10118_v61, 1  ;;  %v2018_v27 = vrot.slane %v10118_v61, 3 }
 0x673   : > { %v1280_v8 = vmul.f32 %v10123_v6, %v1279_v0  ;;  %v1260_v9 = vmul.f32 %v10126_v7, %v1259_v1  ;;  %v1476_v37 = vmul.f32 %v10201_v35, %v1475_v31  ;;  %v1585_v38 = vmul.f32 %v10204_v36, %v1584_v32  ;;  %v9287_v3 = vld [vmem:[%s11898_s8 + $0x3f8] sm:$0xff]  }
 0x674   : > { %v1256_v10 = vpop.f32.mrf.mxu0  ;;  %v1801_v0 = vmul.f32 %v10279_v60, %v1800_v57  ;;  %v9318_v57 = vld [vmem:[%s11898_s8 + $0x40] sm:$0xff]  }
 0x675   : > { %v1281_v13 = vpack.c.bf16 %v1280_v8, %v1280_v8  ;;  %v1261_v14 = vpack.c.bf16 %v1260_v9, %v1260_v9  ;;  %v1477_v41 = vpack.c.bf16 %v1476_v37, %v1476_v37  ;;  %v1586_v42 = vpack.c.bf16 %v1585_v38, %v1585_v38  ;;  %v9288_v8 = vld [vmem:[%s11898_s8 + $0x438] sm:$0xff]  }
 0x676   : > { %v8261_v15 = vpop.f32.mrf.mxu0  ;;  %v1693_v9 = vpack.c.bf16 %v10118_v61, %v10118_v61  ;;  %v1802_v10 = vpack.c.bf16 %v1801_v0, %v1801_v0 }
 0x677   : > { %8279 = vmatmul.mubr.bf16.vlgmr.msra.gmra.mxu1 %v1281_v13  ;;  %8299 = vmatmul.mubr.bf16.vlgmr.msra.gmra.mxu0 %v1261_v14  ;;  %v9291_v13 = vld [vmem:[%s11898_s8 + $0x3e8] sm:$0xff]   ;;  %v9293_v15 = vld [vmem:[%s11898_s8 + $0x3e0] sm:$0xff]  }
 0x678   : > { %8303 = vmatpush3.bf16.msra.mxu1 %v9255_v11  ;;  %8323 = vmatpush3.bf16.msra.mxu0 %v9256_v12  ;;  %v9289_v11 = vld [vmem:[%s11898_s8 + $0x3f0] sm:$0xff]   ;;  %v9292_v14 = vld [vmem:[%s11898_s8 + $0x428] sm:$0xff]  }
 0x679   : > { %8304 = vmatprep.subr.bf16.mxu1 %v9722_v2  ;;  %8324 = vmatprep.subr.bf16.mxu0 %v9722_v2  ;;  %v9290_v12 = vld [vmem:[%s11898_s8 + $0x430] sm:$0xff]  }
 0x67a   : > { %8318 = vmatprep.mubr.msk.bf16.mxu1 %vm9723_vm0, %v9722_v2  ;;  %8338 = vmatprep.mubr.msk.bf16.mxu0 %vm9723_vm0, %v9722_v2 }
 0x67c   : > { %8305 = vmatpush3.bf16.msra.mxu1 %v9257_v16  ;;  %8325 = vmatpush3.bf16.msra.mxu0 %v9258_v17  ;;  %v9294_v16 = vld [vmem:[%s11898_s8 + $0x420] sm:$0xff]   ;;  %v9295_v17 = vld [vmem:[%s11898_s8 + $0x3d8] sm:$0xff]  }
 0x67d   : > { %8306 = vmatprep.subr.bf16.mxu1 %v9722_v2  ;;  %8326 = vmatprep.subr.bf16.mxu0 %v9722_v2 }
 0x680   : > { %8307 = vmatpush3.bf16.msra.mxu1 %v9259_v18  ;;  %8327 = vmatpush3.bf16.msra.mxu0 %v9260_v19  ;;  %v9296_v18 = vld [vmem:[%s11898_s8 + $0x418] sm:$0xff]   ;;  %v9297_v19 = vld [vmem:[%s11898_s8 + $0x3d0] sm:$0xff]  }
 0x681   : > { %8308 = vmatprep.subr.bf16.mxu1 %v9722_v2  ;;  %8328 = vmatprep.subr.bf16.mxu0 %v9722_v2 }
 0x684   : > { %8309 = vmatpush3.bf16.msra.mxu1 %v9261_v20  ;;  %8329 = vmatpush3.bf16.msra.mxu0 %v9262_v21  ;;  %v9298_v20 = vld [vmem:[%s11898_s8 + $0x410] sm:$0xff]   ;;  %v684_v21 = vadd.s32 2, %v10028_v63 }
 0x685   : > { %8310 = vmatprep.subr.bf16.mxu1 %v9722_v2  ;;  %8330 = vmatprep.subr.bf16.mxu0 %v9722_v2 }
 0x686   : > { %vm686_vm9 = vcmp.lt.s32.totalorder %v684_v21, 8 }
 0x688   : > { %8311 = vmatpush3.bf16.msra.mxu1 %v9263_v22  ;;  %8331 = vmatpush3.bf16.msra.mxu0 %v9264_v24  ;;  %v690_v22 = vadd.s32 3, %v10028_v63  ;;  %v9299_v24 = vld [vmem:[%s11898_s8 + $0x3c8] sm:$0xff]  }
 0x689   : > { %8312 = vmatprep.subr.bf16.mxu1 %v9722_v2  ;;  %8332 = vmatprep.subr.bf16.mxu0 %v9722_v2 }
 0x68a   : > { %vm692_vm10 = vcmp.lt.s32.totalorder %v690_v22, 8  ;;  %v9327_v22 = vld [vmem:[%s11898_s8 + $0x138] sm:$0xff]  }
 0x68b   : > { %v10360_v31 = vsel %vm692_vm10, 1.0, %v9722_v2 }
 0x68c   : > { %8313 = vmatpush3.bf16.msra.mxu1 %v9265_v25  ;;  %8333 = vmatpush3.bf16.msra.mxu0 %v9266_v26  ;;  %v9300_v25 = vld [vmem:[%s11898_s8 + $0x408] sm:$0xff]   ;;  %v1909_v26 = vrot.slane %v10118_v61, 2 }
 0x68d   : > { %8314 = vmatprep.subr.bf16.mxu1 %v9722_v2  ;;  %8334 = vmatprep.subr.bf16.mxu0 %v9722_v2 }
 0x690   : > { %8315 = vmatpush3.bf16.msra.mxu1 %v9267_v29  ;;  %8335 = vmatpush3.bf16.msra.mxu0 %v9268_v30  ;;  %v9302_v29 = vld [vmem:[%s11898_s8 + $0x400] sm:$0xff]   ;;  %v10357_v30 = vsel %vm686_vm9, 1.0, %v9722_v2 }
 0x691   : > { %8316 = vmatprep.subr.bf16.mxu1 %v9722_v2  ;;  %8336 = vmatprep.subr.bf16.mxu0 %v9722_v2  ;;  %v1910_v32 = vmul.f32 %v10357_v30, %v1909_v26 }
 0x693   : > { %v1911_v37 = vpack.c.bf16 %v1910_v32, %v1910_v32 }
 0x694   : > { %8317 = vmatpush3.bf16.msra.mxu1 %v9269_v33  ;;  %8337 = vmatpush3.bf16.msra.mxu0 %v9270_v34  ;;  %v2019_v33 = vmul.f32 %v10360_v31, %v2018_v27  ;;  %v9303_v34 = vld [vmem:[%s11898_s8 + $0x478] sm:$0xff]  }
 0x695   : > { %8342 = vmatprep.subr.bf16.mxu1 %v9722_v2  ;;  %8362 = vmatprep.subr.bf16.mxu0 %v9722_v2 }
 0x696   : > { %v2020_v38 = vpack.c.bf16 %v2019_v33, %v2019_v33 }
 0x697   : > { %8319 = vmatmul.mubr.bf16.vlgmr.msra.gmra.mxu1 %v1477_v41  ;;  %8339 = vmatmul.mubr.bf16.vlgmr.msra.gmra.mxu0 %v1586_v42  ;;  %v9306_v41 = vld [vmem:[%s11898_s8 + $0x460] sm:$0xff]   ;;  %v9307_v42 = vld [vmem:[%s11898_s8 + $0x458] sm:$0xff]  }
 0x698   : > { %8343 = vmatpush3.bf16.msra.mxu1 %v9271_v39  ;;  %8363 = vmatpush3.bf16.msra.mxu0 %v9272_v40  ;;  %v9304_v39 = vld [vmem:[%s11898_s8 + $0x470] sm:$0xff]   ;;  %v9305_v40 = vld [vmem:[%s11898_s8 + $0x468] sm:$0xff]  }
 0x699   : > { %8344 = vmatprep.subr.bf16.mxu1 %v9722_v2  ;;  %8364 = vmatprep.subr.bf16.mxu0 %v9722_v2 }
 0x69a   : > { %8358 = vmatprep.mubr.msk.bf16.mxu1 %vm9723_vm0, %v9722_v2  ;;  %8378 = vmatprep.mubr.msk.bf16.mxu0 %vm9723_vm0, %v9722_v2 }
 0x69c   : > { %8345 = vmatpush3.bf16.msra.mxu1 %v9273_v43  ;;  %8365 = vmatpush3.bf16.msra.mxu0 %v9274_v44  ;;  %v9308_v43 = vld [vmem:[%s11898_s8 + $0x450] sm:$0xff]   ;;  %v696_v44 = vadd.s32 4, %v10028_v63 }
 0x69d   : > { %8346 = vmatprep.subr.bf16.mxu1 %v9722_v2  ;;  %8366 = vmatprep.subr.bf16.mxu0 %v9722_v2 }
 0x69e   : > { %vm698_vm11 = vcmp.lt.s32.totalorder %v696_v44, 8  ;;  %v9332_v44 = vld [vmem:[%s11898_s8 + $0x110] sm:$0xff]  }
 0x6a0   : > { %8347 = vmatpush3.bf16.msra.mxu1 %v9275_v45  ;;  %8367 = vmatpush3.bf16.msra.mxu0 %v9276_v47  ;;  %v9309_v45 = vld [vmem:[%s11898_s8 + $0x448] sm:$0xff]   ;;  %v9310_v47 = vld [vmem:[%s11898_s8 + $0x440] sm:$0xff]  }
 0x6a1   : > { %8348 = vmatprep.subr.bf16.mxu1 %v9722_v2  ;;  %8368 = vmatprep.subr.bf16.mxu0 %v9722_v2 }
 0x6a4   : > { %8349 = vmatpush3.bf16.msra.mxu1 %v9277_v48  ;;  %8369 = vmatpush3.bf16.msra.mxu0 %v9278_v49  ;;  %v10404_v48 = vsel %vm698_vm11, 1.0, %v9722_v2  ;;  %v9311_v49 = vld [vmem:[%s11898_s8 + $0x78] sm:$0xff]  }
 0x6a5   : > { %8350 = vmatprep.subr.bf16.mxu1 %v9722_v2  ;;  %8370 = vmatprep.subr.bf16.mxu0 %v9722_v2  ;;  %v2127_v63 = vmul.f32 %v10404_v48, %v1259_v1  ;;  %v9313_v1 = vld [vmem:[%s11898_s8 + $0x68] sm:$0xff]  }
 0x6a8   : > { %8351 = vmatpush3.bf16.msra.mxu1 %v9279_v50  ;;  %8371 = vmatpush3.bf16.msra.mxu0 %v9280_v51  ;;  %v2128_v50 = vpack.c.bf16 %v2127_v63, %v2127_v63  ;;  %v9312_v51 = vld [vmem:[%s11898_s8 + $0x70] sm:$0xff]   ;;  %v9335_v63 = vld [vmem:[%s11898_s8 + $0x1b8] sm:$0xff]  }
 0x6a9   : > { %8352 = vmatprep.subr.bf16.mxu1 %v9722_v2  ;;  %8372 = vmatprep.subr.bf16.mxu0 %v9722_v2 }
 0x6ac   : > { %8353 = vmatpush3.bf16.msra.mxu1 %v9281_v52  ;;  %8373 = vmatpush3.bf16.msra.mxu0 %v9282_v53  ;;  %v9314_v52 = vld [vmem:[%s11898_s8 + $0x60] sm:$0xff]   ;;  %v9315_v53 = vld [vmem:[%s11898_s8 + $0x58] sm:$0xff]  }
 0x6ad   : > { %8354 = vmatprep.subr.bf16.mxu1 %v9722_v2  ;;  %8374 = vmatprep.subr.bf16.mxu0 %v9722_v2 }
 0x6b0   : > { %8355 = vmatpush3.bf16.msra.mxu1 %v9283_v55  ;;  %8375 = vmatpush3.bf16.msra.mxu0 %v9284_v56  ;;  %v9317_v55 = vld [vmem:[%s11898_s8 + $0x48] sm:$0xff]   ;;  %v2411_v56 = vrot.slane %v10044_v23, 5 }
 0x6b1   : > { %8356 = vmatprep.subr.bf16.mxu1 %v9722_v2  ;;  %8376 = vmatprep.subr.bf16.mxu0 %v9722_v2 }
 0x6b4   : > { %8357 = vmatpush3.bf16.msra.mxu1 %v9285_v58  ;;  %8377 = vmatpush3.bf16.msra.mxu0 %v9286_v59  ;;  %v2412_v58 = vmul.f32 %v10123_v6, %v2411_v56  ;;  %v9319_v59 = vld [vmem:[%s11898_s8 + $0xb8] sm:$0xff]  }
 0x6b5   : > { %8382 = vmatprep.subr.bf16.mxu1 %v9722_v2  ;;  %8402 = vmatprep.subr.bf16.mxu0 %v9722_v2 }
 0x6b6   : > { %v2413_v0 = vpack.c.bf16 %v2412_v58, %v2412_v58  ;;  %v9337_v58 = vld [vmem:[%s11898_s8 + $0x1a8] sm:$0xff]  }
 0x6b7   : > { %8359 = vmatmul.mubr.bf16.vlgmr.msra.gmra.mxu1 %v1693_v9  ;;  %8379 = vmatmul.mubr.bf16.vlgmr.msra.gmra.mxu0 %v1802_v10  ;;  %v9351_v9 = vld [vmem:[%s11900_s10 + $0x78] sm:$0xff]   ;;  %v9352_v10 = vld [vmem:[%s11900_s10 + $0x70] sm:$0xff]  }
 0x6b8   : > { %8383 = vmatpush3.bf16.msra.mxu1 %v9287_v3  ;;  %8403 = vmatpush3.bf16.msra.mxu0 %v9288_v8  ;;  %v9320_v3 = vld [vmem:[%s11898_s8 + $0xb0] sm:$0xff]   ;;  %v9321_v8 = vld [vmem:[%s11898_s8 + $0xa8] sm:$0xff]  }
 0x6b9   : > { %8384 = vmatprep.subr.bf16.mxu1 %v9722_v2  ;;  %8404 = vmatprep.subr.bf16.mxu0 %v9722_v2 }
 0x6ba   : > { %8398 = vmatprep.mubr.msk.bf16.mxu1 %vm9723_vm0, %v9722_v2  ;;  %8418 = vmatprep.mubr.msk.bf16.mxu0 %vm9723_vm0, %v9722_v2 }
 0x6bc   : > { %8385 = vmatpush3.bf16.msra.mxu1 %v9289_v11  ;;  %8405 = vmatpush3.bf16.msra.mxu0 %v9290_v12  ;;  %v9322_v11 = vld [vmem:[%s11898_s8 + $0xa0] sm:$0xff]   ;;  %v9353_v12 = vld [vmem:[%s11900_s10 + $0x68] sm:$0xff]  }
 0x6bd   : > { %8386 = vmatprep.subr.bf16.mxu1 %v9722_v2  ;;  %8406 = vmatprep.subr.bf16.mxu0 %v9722_v2 }
 0x6c0   : > { %8387 = vmatpush3.bf16.msra.mxu1 %v9291_v13  ;;  %8407 = vmatpush3.bf16.msra.mxu0 %v9292_v14  ;;  %v9323_v13 = vld [vmem:[%s11898_s8 + $0x98] sm:$0xff]   ;;  %v9354_v14 = vld [vmem:[%s11900_s10 + $0x60] sm:$0xff]  }
 0x6c1   : > { %8388 = vmatprep.subr.bf16.mxu1 %v9722_v2  ;;  %8408 = vmatprep.subr.bf16.mxu0 %v9722_v2 }
 0x6c4   : > { %8389 = vmatpush3.bf16.msra.mxu1 %v9293_v15  ;;  %8409 = vmatpush3.bf16.msra.mxu0 %v9294_v16  ;;  %v9324_v15 = vld [vmem:[%s11898_s8 + $0x90] sm:$0xff]   ;;  %v9355_v16 = vld [vmem:[%s11900_s10 + $0x58] sm:$0xff]  }
 0x6c5   : > { %8390 = vmatprep.subr.bf16.mxu1 %v9722_v2  ;;  %8410 = vmatprep.subr.bf16.mxu0 %v9722_v2 }
 0x6c8   : > { %8391 = vmatpush3.bf16.msra.mxu1 %v9295_v17  ;;  %8411 = vmatpush3.bf16.msra.mxu0 %v9296_v18  ;;  %v9325_v17 = vld [vmem:[%s11898_s8 + $0x88] sm:$0xff]   ;;  %v2607_v18 = vrot.slane %v10044_v23, 6 }
 0x6c9   : > { %8392 = vmatprep.subr.bf16.mxu1 %v9722_v2  ;;  %8412 = vmatprep.subr.bf16.mxu0 %v9722_v2 }
 0x6ca   : > { %v2608_v21 = vmul.f32 %v10201_v35, %v2607_v18  ;;  %v9344_v18 = vld [vmem:[%s11898_s8 + $0x230] sm:$0xff]  }
 0x6cc   : > { %8393 = vmatpush3.bf16.msra.mxu1 %v9297_v19  ;;  %8413 = vmatpush3.bf16.msra.mxu0 %v9298_v20  ;;  %v9356_v19 = vld [vmem:[%s11900_s10 + $0x50] sm:$0xff]   ;;  %v9326_v20 = vld [vmem:[%s11898_s8 + $0x80] sm:$0xff]  }
 0x6cd   : > { %8394 = vmatprep.subr.bf16.mxu1 %v9722_v2  ;;  %8414 = vmatprep.subr.bf16.mxu0 %v9722_v2 }
 0x6d0   : > { %8395 = vmatpush3.bf16.msra.mxu1 %v9299_v24  ;;  %8415 = vmatpush3.bf16.msra.mxu0 %v9300_v25  ;;  %v2609_v24 = vpack.c.bf16 %v2608_v21, %v2608_v21  ;;  %v9357_v25 = vld [vmem:[%s11900_s10 + $0x48] sm:$0xff]  }
 0x6d1   : > { %8396 = vmatprep.subr.bf16.mxu1 %v9722_v2  ;;  %8416 = vmatprep.subr.bf16.mxu0 %v9722_v2 }
 0x6d4   : > { %8397 = vmatpush3.bf16.msra.mxu1 %v9301_v28  ;;  %8417 = vmatpush3.bf16.msra.mxu0 %v9302_v29  ;;  %v9328_v29 = vld [vmem:[%s11898_s8 + $0x130] sm:$0xff]  }
 0x6d5   : > { %8422 = vmatprep.subr.bf16.mxu1 %v9722_v2  ;;  %8442 = vmatprep.subr.bf16.mxu0 %v9722_v2 }
 0x6d7   : > { %8399 = vmatmul.mubr.bf16.vlgmr.msra.gmra.mxu1 %v1911_v37  ;;  %8419 = vmatmul.mubr.bf16.vlgmr.msra.gmra.mxu0 %v2020_v38 }
 0x6d8   : > { %8423 = vmatpush3.bf16.msra.mxu1 %v9303_v34  ;;  %8438 = vmatprep.mubr.msk.bf16.mxu1 %vm9723_vm0, %v9722_v2  ;;  %v9358_v34 = vld [vmem:[%s11900_s10 + $0x40] sm:$0xff]  }
 0x6d9   : > { %8424 = vmatprep.subr.bf16.mxu1 %v9722_v2  ;;  %8458 = vmatprep.mubr.msk.bf16.mxu0 %vm9723_vm0, %v9722_v2 }
 0x6da   : > { %8443 = vmatpush3.bf16.msra.mxu0 %v9351_v9  ;;  %v9340_v9 = vld [vmem:[%s11898_s8 + $0x190] sm:$0xff]  }
 0x6db   : > { %8444 = vmatprep.subr.bf16.mxu0 %v9722_v2 }
 0x6dc   : > { %8425 = vmatpush3.bf16.msra.mxu1 %v9304_v39  ;;  %v9329_v39 = vld [vmem:[%s11898_s8 + $0x128] sm:$0xff]  }
 0x6dd   : > { %8426 = vmatprep.subr.bf16.mxu1 %v9722_v2 }
 0x6de   : > { %8445 = vmatpush3.bf16.msra.mxu0 %v9352_v10  ;;  %v9341_v10 = vld [vmem:[%s11898_s8 + $0x188] sm:$0xff]  }
 0x6df   : > { %8446 = vmatprep.subr.bf16.mxu0 %v9722_v2 }
 0x6e0   : > { %8427 = vmatpush3.bf16.msra.mxu1 %v9305_v40 }
 0x6e1   : > { %8428 = vmatprep.subr.bf16.mxu1 %v9722_v2 }
 0x6e2   : > { %8447 = vmatpush3.bf16.msra.mxu0 %v9353_v12  ;;  %v9342_v12 = vld [vmem:[%s11898_s8 + $0x180] sm:$0xff]  }
 0x6e3   : > { %8448 = vmatprep.subr.bf16.mxu0 %v9722_v2 }
 0x6e4   : > { %8429 = vmatpush3.bf16.msra.mxu1 %v9306_v41 }
 0x6e5   : > { %8430 = vmatprep.subr.bf16.mxu1 %v9722_v2 }
 0x6e6   : > { %8449 = vmatpush3.bf16.msra.mxu0 %v9354_v14  ;;  %v9343_v14 = vld [vmem:[%s11898_s8 + $0x238] sm:$0xff]  }
 0x6e7   : > { %8450 = vmatprep.subr.bf16.mxu0 %v9722_v2 }
 0x6e8   : > { %8431 = vmatpush3.bf16.msra.mxu1 %v9307_v42  ;;  %v9330_v42 = vld [vmem:[%s11898_s8 + $0x120] sm:$0xff]  }
 0x6e9   : > { %8432 = vmatprep.subr.bf16.mxu1 %v9722_v2 }
 0x6ea   : > { %8451 = vmatpush3.bf16.msra.mxu0 %v9355_v16 }
 0x6eb   : > { %8452 = vmatprep.subr.bf16.mxu0 %v9722_v2 }
 0x6ec   : > { %8433 = vmatpush3.bf16.msra.mxu1 %v9308_v43  ;;  %v9331_v43 = vld [vmem:[%s11898_s8 + $0x118] sm:$0xff]  }
 0x6ed   : > { %8434 = vmatprep.subr.bf16.mxu1 %v9722_v2 }
 0x6ee   : > { %8453 = vmatpush3.bf16.msra.mxu0 %v9356_v19 }
 0x6ef   : > { %8454 = vmatprep.subr.bf16.mxu0 %v9722_v2 }
 0x6f0   : > { %8435 = vmatpush3.bf16.msra.mxu1 %v9309_v45  ;;  %v9333_v45 = vld [vmem:[%s11898_s8 + $0x108] sm:$0xff]  }
 0x6f1   : > { %8436 = vmatprep.subr.bf16.mxu1 %v9722_v2 }
 0x6f2   : > { %8455 = vmatpush3.bf16.msra.mxu0 %v9357_v25 }
 0x6f3   : > { %8456 = vmatprep.subr.bf16.mxu0 %v9722_v2 }
 0x6f4   : > { %8437 = vmatpush3.bf16.msra.mxu1 %v9310_v47  ;;  %v9334_v47 = vld [vmem:[%s11898_s8 + $0x100] sm:$0xff]  }
 0x6f5   : > { %8462 = vmatprep.subr.bf16.mxu1 %v9722_v2 }
 0x6f6   : > { %8457 = vmatpush3.bf16.msra.mxu0 %v9358_v34  ;;  %v9350_v34 = vld [vmem:[%s11898_s8 + $0x200] sm:$0xff]  }
 0x6f7   : > { %8439 = vmatmul.mubr.bf16.vlgmr.msra.gmra.mxu1 %v2128_v50  ;;  %8482 = vmatprep.subr.bf16.mxu0 %v9722_v2 }
 0x6f8   : > { %8463 = vmatpush3.bf16.msra.mxu1 %v9311_v49  ;;  %8478 = vmatprep.mubr.msk.bf16.mxu1 %vm9723_vm0, %v9722_v2  ;;  %v2825_v49 = vpack.c.bf16 %v10044_v23, %v10044_v23 }
 0x6f9   : > { %8464 = vmatprep.subr.bf16.mxu1 %v9722_v2 }
 0x6fc   : > { %8465 = vmatpush3.bf16.msra.mxu1 %v9312_v51 }
 0x6fd   : > { %8466 = vmatprep.subr.bf16.mxu1 %v9722_v2 }
 0x700   : > { %8467 = vmatpush3.bf16.msra.mxu1 %v9313_v1 }
 0x701   : > { %8468 = vmatprep.subr.bf16.mxu1 %v9722_v2 }
 0x704   : > { %8469 = vmatpush3.bf16.msra.mxu1 %v9314_v52  ;;  %v9336_v52 = vld [vmem:[%s11898_s8 + $0x1b0] sm:$0xff]  }
 0x705   : > { %8470 = vmatprep.subr.bf16.mxu1 %v9722_v2 }
 0x708   : > { %8471 = vmatpush3.bf16.msra.mxu1 %v9315_v53 }
 0x709   : > { %8472 = vmatprep.subr.bf16.mxu1 %v9722_v2 }
 0x70c   : > { %8473 = vmatpush3.bf16.msra.mxu1 %v9316_v54 }
 0x70d   : > { %8474 = vmatprep.subr.bf16.mxu1 %v9722_v2 }
 0x710   : > { %8475 = vmatpush3.bf16.msra.mxu1 %v9317_v55 }
 0x711   : > { %8476 = vmatprep.subr.bf16.mxu1 %v9722_v2 }
 0x714   : > { %8477 = vmatpush3.bf16.msra.mxu1 %v9318_v57 }
 0x715   : > { %8502 = vmatprep.subr.bf16.mxu1 %v9722_v2 }
 0x717   : > { %8479 = vmatmul.mubr.bf16.vlgmr.msra.gmra.mxu1 %v2413_v0 }
 0x718   : > { %8503 = vmatpush3.bf16.msra.mxu1 %v9319_v59  ;;  %8518 = vmatprep.mubr.msk.bf16.mxu1 %vm9723_vm0, %v9722_v2 }
 0x719   : > { %8504 = vmatprep.subr.bf16.mxu1 %v9722_v2 }
 0x71c   : > { %8505 = vmatpush3.bf16.msra.mxu1 %v9320_v3  ;;  %v9338_v3 = vld [vmem:[%s11898_s8 + $0x1a0] sm:$0xff]  }
 0x71d   : > { %8506 = vmatprep.subr.bf16.mxu1 %v9722_v2 }
 0x720   : > { %8507 = vmatpush3.bf16.msra.mxu1 %v9321_v8  ;;  %v9339_v8 = vld [vmem:[%s11898_s8 + $0x198] sm:$0xff]  }
 0x721   : > { %8508 = vmatprep.subr.bf16.mxu1 %v9722_v2 }
 0x724   : > { %8509 = vmatpush3.bf16.msra.mxu1 %v9322_v11  ;;  %v3041_v11 = vrot.slane %v10044_v23, 2 }
 0x725   : > { %8510 = vmatprep.subr.bf16.mxu1 %v9722_v2 }
 0x728   : > { %8511 = vmatpush3.bf16.msra.mxu1 %v9323_v13  ;;  %v3042_v13 = vmul.f32 %v10357_v30, %v3041_v11  ;;  %v9364_v11 = vld [vmem:[%s11898_s8 + $0x10] sm:$0xff]  }
 0x729   : > { %8512 = vmatprep.subr.bf16.mxu1 %v9722_v2 }
 0x72c   : > { %8513 = vmatpush3.bf16.msra.mxu1 %v9324_v15  ;;  %v3043_v15 = vpack.c.bf16 %v3042_v13, %v3042_v13 }
 0x72d   : > { %8514 = vmatprep.subr.bf16.mxu1 %v9722_v2 }
 0x730   : > { %8515 = vmatpush3.bf16.msra.mxu1 %v9325_v17 }
 0x731   : > { %8516 = vmatprep.subr.bf16.mxu1 %v9722_v2 }
 0x734   : > { %8517 = vmatpush3.bf16.msra.mxu1 %v9326_v20 }
 0x735   : > { %8542 = vmatprep.subr.bf16.mxu1 %v9722_v2 }
 0x737   : > { %8519 = vmatmul.mubr.bf16.vlgmr.msra.gmra.mxu1 %v2609_v24  ;;  %v1381_v26 = vpop.f32.mrf.mxu1  ;;  %v1469_v27 = vpop.f32.mrf.mxu0  ;;  %v9345_v24 = vld [vmem:[%s11898_s8 + $0x228] sm:$0xff]  }
 0x738   : > { %v1470_v28 = vadd.f32 %v1469_v27, %v1381_v26  ;;  %8543 = vmatpush3.bf16.msra.mxu1 %v9327_v22  ;;  %8558 = vmatprep.mubr.msk.bf16.mxu1 %vm9723_vm0, %v9722_v2  ;;  %v9346_v27 = vld [vmem:[%s11898_s8 + $0x220] sm:$0xff]  }
 0x739   : > { %v8280_v32 = vpop.f32.mrf.mxu1  ;;  %v8300_v33 = vpop.f32.mrf.mxu0  ;;  %8544 = vmatprep.subr.bf16.mxu1 %v9722_v2 }
 0x73a   : > { %v9349_v32 = vld [vmem:[%s11898_s8 + $0x208] sm:$0xff]   ;;  %v2392_v33 = vrot.slane %v10044_v23, 4 }
 0x73b   : > { %v1384_v37 = vpop.f32.mrf.mxu1  ;;  %v1472_v38 = vpop.f32.mrf.mxu0 }
 0x73c   : > { %8545 = vmatpush3.bf16.msra.mxu1 %v9328_v29  ;;  %v9348_v29 = vld [vmem:[%s11898_s8 + $0x210] sm:$0xff]   ;;  %v3259_v37 = vmul.f32 %v10404_v48, %v2392_v33 }
 0x73d   : > { %v8281_v40 = vpop.f32.mrf.mxu1  ;;  %v8301_v41 = vpop.f32.mrf.mxu0  ;;  %8546 = vmatprep.subr.bf16.mxu1 %v9722_v2 }
 0x73e   : > { %v3260_v38 = vpack.c.bf16 %v3259_v37, %v3259_v37 }
 0x740   : > { %8547 = vmatpush3.bf16.msra.mxu1 %v9329_v39 }
 0x741   : > { %8548 = vmatprep.subr.bf16.mxu1 %v9722_v2 }
 0x744   : > { %8549 = vmatpush3.bf16.msra.mxu1 %v9330_v42 }
 0x745   : > { %8550 = vmatprep.subr.bf16.mxu1 %v9722_v2 }
 0x748   : > { %8551 = vmatpush3.bf16.msra.mxu1 %v9331_v43 }
 0x749   : > { %8552 = vmatprep.subr.bf16.mxu1 %v9722_v2 }
 0x74c   : > { %8553 = vmatpush3.bf16.msra.mxu1 %v9332_v44 }
 0x74d   : > { %8554 = vmatprep.subr.bf16.mxu1 %v9722_v2 }
 0x750   : > { %8555 = vmatpush3.bf16.msra.mxu1 %v9333_v45 }
 0x751   : > { %8556 = vmatprep.subr.bf16.mxu1 %v9722_v2 }
 0x754   : > { %8557 = vmatpush3.bf16.msra.mxu1 %v9334_v47 }
 0x755   : > { %8582 = vmatprep.subr.bf16.mxu1 %v9722_v2 }
 0x757   : > { %v1577_v50 = vpop.f32.mrf.mxu1  ;;  %v1686_v51 = vpop.f32.mrf.mxu0  ;;  %8559 = vmatmul.mubr.bf16.vlgmr.msra.gmra.mxu1 %v2825_v49 }
 0x758   : > { %v1583_v1 = vadd.f32 %v1577_v50, %v1470_v28  ;;  %8583 = vmatpush3.bf16.msra.mxu1 %v9335_v63  ;;  %8598 = vmatprep.mubr.msk.bf16.mxu1 %vm9723_vm0, %v9722_v2  ;;  %v9347_v28 = vld [vmem:[%s11898_s8 + $0x218] sm:$0xff]  }
 0x759   : > { %v8320_v53 = vpop.f32.mrf.mxu1  ;;  %v8340_v54 = vpop.f32.mrf.mxu0  ;;  %8584 = vmatprep.subr.bf16.mxu1 %v9722_v2 }
 0x75a   : > { %v10560_v55 = vadd.f32 %v1686_v51, %v1583_v1 }
 0x75b   : > { %v1580_v56 = vpop.f32.mrf.mxu1  ;;  %v1689_v57 = vpop.f32.mrf.mxu0 }
 0x75c   : > { %8585 = vmatpush3.bf16.msra.mxu1 %v9336_v52  ;;  %v6992_v52 = vld [vmem:[%s11899_s9 + $0x1] ss:$0 sm:$0xff] }
 0x75d   : > { %v8321_v59 = vpop.f32.mrf.mxu1  ;;  %v8341_v0 = vpop.f32.mrf.mxu0  ;;  %8586 = vmatprep.subr.bf16.mxu1 %v9722_v2 }
 0x75e   : > { %v9359_v0 = vld [vmem:[%s11898_s8 + $0x38] sm:$0xff]  }
 0x760   : > { %8587 = vmatpush3.bf16.msra.mxu1 %v9337_v58 }
 0x761   : > { %8588 = vmatprep.subr.bf16.mxu1 %v9722_v2 }
 0x764   : > { %8589 = vmatpush3.bf16.msra.mxu1 %v9338_v3 }
 0x765   : > { %8590 = vmatprep.subr.bf16.mxu1 %v9722_v2 }
 0x768   : > { %8591 = vmatpush3.bf16.msra.mxu1 %v9339_v8  ;;  %v9361_v8 = vld [vmem:[%s11898_s8 + $0x28] sm:$0xff]  }
 0x769   : > { %8592 = vmatprep.subr.bf16.mxu1 %v9722_v2 }
 0x76c   : > { %8593 = vmatpush3.bf16.msra.mxu1 %v9340_v9  ;;  %v9362_v9 = vld [vmem:[%s11898_s8 + $0x20] sm:$0xff]  }
 0x76d   : > { %8594 = vmatprep.subr.bf16.mxu1 %v9722_v2 }
 0x770   : > { %8595 = vmatpush3.bf16.msra.mxu1 %v9341_v10  ;;  %v9363_v10 = vld [vmem:[%s11898_s8 + $0x18] sm:$0xff]  }
 0x771   : > { %8596 = vmatprep.subr.bf16.mxu1 %v9722_v2 }
 0x774   : > { %8597 = vmatpush3.bf16.msra.mxu1 %v9342_v12  ;;  %v9365_v12 = vld [vmem:[%s11898_s8 + $0x8] sm:$0xff]  }
 0x775   : > { %8622 = vmatprep.subr.bf16.mxu1 %v9722_v2 }
 0x777   : > { %v1793_v16 = vpop.f32.mrf.mxu1  ;;  %v1902_v17 = vpop.f32.mrf.mxu0  ;;  %8599 = vmatmul.mubr.bf16.vlgmr.msra.gmra.mxu1 %v3043_v15  ;;  %v9366_v15 = vld [vmem:[%s11898_s8] sm:$0xff]  }
 0x778   : > { %8623 = vmatpush3.bf16.msra.mxu1 %v9343_v14  ;;  %8638 = vmatprep.mubr.msk.bf16.mxu1 %vm9723_vm0, %v9722_v2  ;;  %v1799_v63 = vadd.f32 %v1793_v16, %v10560_v55  ;;  %v9360_v55 = vld [vmem:[%s11898_s8 + $0x30] sm:$0xff]   ;;  %v2393_v16 = vmul.f32 %v10126_v7, %v2392_v33  ;;  %v9374_v33 = vld [vmem:[%s11898_s8 + $0xc0] sm:$0xff]  }
 0x779   : > { %v8360_v19 = vpop.f32.mrf.mxu1  ;;  %v8380_v20 = vpop.f32.mrf.mxu0  ;;  %8624 = vmatprep.subr.bf16.mxu1 %v9722_v2 }
 0x77a   : > { %v1908_v49 = vadd.f32 %v1902_v17, %v1799_v63  ;;  %v9367_v19 = vld [vmem:[%s11898_s8 + $0xf8] sm:$0xff]   ;;  %v2394_v20 = vpack.c.bf16 %v2393_v16, %v2393_v16  ;;  %v2932_v63 = vrot.slane %v10044_v23, 1 }
 0x77b   : > { %v1796_v21 = vpop.f32.mrf.mxu1  ;;  %v1905_v22 = vpop.f32.mrf.mxu0 }
 0x77c   : > { %8625 = vmatpush3.bf16.msra.mxu1 %v9344_v18  ;;  %v9368_v21 = vld [vmem:[%s11898_s8 + $0xf0] sm:$0xff]   ;;  %v9369_v22 = vld [vmem:[%s11898_s8 + $0xe8] sm:$0xff]  }
 0x77d   : > { %v8361_v25 = vpop.f32.mrf.mxu1  ;;  %v8381_v26 = vpop.f32.mrf.mxu0  ;;  %8626 = vmatprep.subr.bf16.mxu1 %v9722_v2 }
 0x77e   : > { %v9371_v25 = vld [vmem:[%s11898_s8 + $0xd8] sm:$0xff]   ;;  %v9372_v26 = vld [vmem:[%s11898_s8 + $0xd0] sm:$0xff]  }
 0x780   : > { %8627 = vmatpush3.bf16.msra.mxu1 %v9345_v24  ;;  %v9370_v24 = vld [vmem:[%s11898_s8 + $0xe0] sm:$0xff]  }
 0x781   : > { %8628 = vmatprep.subr.bf16.mxu1 %v9722_v2 }
 0x784   : > { %8629 = vmatpush3.bf16.msra.mxu1 %v9346_v27  ;;  %v9373_v27 = vld [vmem:[%s11898_s8 + $0xc8] sm:$0xff]  }
 0x785   : > { %8630 = vmatprep.subr.bf16.mxu1 %v9722_v2 }
 0x788   : > { %8631 = vmatpush3.bf16.msra.mxu1 %v9347_v28  ;;  %v2716_v28 = vrot.slane %v10044_v23, 7 }
 0x789   : > { %8632 = vmatprep.subr.bf16.mxu1 %v9722_v2 }
 0x78c   : > { %8633 = vmatpush3.bf16.msra.mxu1 %v9348_v29 }
 0x78d   : > { %8634 = vmatprep.subr.bf16.mxu1 %v9722_v2 }
 0x790   : > { %8635 = vmatpush3.bf16.msra.mxu1 %v9349_v32 }
 0x791   : > { %8636 = vmatprep.subr.bf16.mxu1 %v9722_v2 }
 0x794   : > { %8637 = vmatpush3.bf16.msra.mxu1 %v9350_v34  ;;  %v2717_v34 = vmul.f32 %v10204_v36, %v2716_v28  ;;  %v7010_v28 = vld [vmem:[%s11901_s11 + $0x1] ss:$0 sm:$0xff] }
 0x797   : > { %v2011_v39 = vpop.f32.mrf.mxu1  ;;  %v2120_v40 = vpop.f32.mrf.mxu0  ;;  %8639 = vmatmul.mubr.bf16.vlgmr.msra.gmra.mxu1 %v3260_v38 }
 0x798   : > { %3649 = vmatprep.mubr.bf16.mxu1 %v9724_v4  ;;  %v2017_v50 = vadd.f32 %v2011_v39, %v1908_v49  ;;  %v9375_v39 = vld [vmem:[%s11898_s8 + $0x178] sm:$0xff]  }
 0x799   : > { %v8400_v41 = vpop.f32.mrf.mxu1  ;;  %v8420_v42 = vpop.f32.mrf.mxu0 }
 0x79a   : > { %v2126_v51 = vadd.f32 %v2120_v40, %v2017_v50  ;;  %v2718_v40 = vpack.c.bf16 %v2717_v34, %v2717_v34  ;;  %v9376_v41 = vld [vmem:[%s11898_s8 + $0x170] sm:$0xff]   ;;  %v9377_v42 = vld [vmem:[%s11898_s8 + $0x168] sm:$0xff]  }
 0x79b   : > { %v2014_v43 = vpop.f32.mrf.mxu1  ;;  %v2123_v44 = vpop.f32.mrf.mxu0 }
 0x79c   : > { %v9378_v43 = vld [vmem:[%s11898_s8 + $0x160] sm:$0xff]   ;;  %v9379_v44 = vld [vmem:[%s11898_s8 + $0x158] sm:$0xff]  }
 0x79d   : > { %v8401_v45 = vpop.f32.mrf.mxu1  ;;  %v8421_v47 = vpop.f32.mrf.mxu0 }
 0x79e   : > { %v9380_v45 = vld [vmem:[%s11898_s8 + $0x150] sm:$0xff]   ;;  %v9381_v47 = vld [vmem:[%s11898_s8 + $0x148] sm:$0xff]  }
 0x7b7   : > { %v2228_v1 = vpop.f32.mrf.mxu1 }
 0x7b8   : > { %v2234_v53 = vadd.f32 %v2228_v1, %v2126_v51  ;;  %v9382_v51 = vld [vmem:[%s11898_s8 + $0x140] sm:$0xff]   ;;  %v2933_v1 = vmul.f32 %v10279_v60, %v2932_v63 }
 0x7b9   : > { %v8440_v54 = vpop.f32.mrf.mxu1 }
 0x7ba   : > { %v2243_v56 = vadd.f32 %v6992_v52, %v2234_v53  ;;  %v9383_v54 = vld [vmem:[%s11898_s8 + $0x1f8] sm:$0xff]  }
 0x7bb   : > { %v2231_v57 = vpop.f32.mrf.mxu1 }
 0x7bc   : > { %v2244_v58 = vmax.f32 %v2243_v56, 0.0  ;;  %v2934_v56 = vpack.c.bf16 %v2933_v1, %v2933_v1  ;;  %v9384_v57 = vld [vmem:[%s11898_s8 + $0x1f0] sm:$0xff]  }
 0x7bd   : > { %v8441_v59 = vpop.f32.mrf.mxu1 }
 0x7be   : > { %v2245_v3 = vpack.c.bf16 %v2244_v58, %v2244_v58  ;;  %v9385_v58 = vld [vmem:[%s11898_s8 + $0x1e8] sm:$0xff]   ;;  %v9386_v59 = vld [vmem:[%s11898_s8 + $0x1e0] sm:$0xff]  }
 0x7c0   : > { %8459 = vmatmul.mubr.bf16.vlgmr.msra.gmra.mxu0 %v2245_v3  ;;  %v9388_v3 = vld [vmem:[%s11898_s8 + $0x1d0] sm:$0xff]  }
 0x7c1   : > { %8483 = vmatpush3.bf16.msra.mxu0 %v9359_v0  ;;  %8498 = vmatprep.mubr.msk.bf16.mxu0 %vm9723_vm0, %v9722_v2  ;;  %v9387_v0 = vld [vmem:[%s11898_s8 + $0x1d8] sm:$0xff]  }
 0x7c2   : > { %8484 = vmatprep.subr.bf16.mxu0 %v9722_v2 }
 0x7c5   : > { %8485 = vmatpush3.bf16.msra.mxu0 %v9360_v55  ;;  %v9389_v55 = vld [vmem:[%s11898_s8 + $0x1c8] sm:$0xff]  }
 0x7c6   : > { %8486 = vmatprep.subr.bf16.mxu0 %v9722_v2 }
 0x7c9   : > { %8487 = vmatpush3.bf16.msra.mxu0 %v9361_v8  ;;  %v3150_v8 = vrot.slane %v10044_v23, 3 }
 0x7ca   : > { %8488 = vmatprep.subr.bf16.mxu0 %v9722_v2 }
 0x7cd   : > { %8489 = vmatpush3.bf16.msra.mxu0 %v9362_v9 }
 0x7ce   : > { %8490 = vmatprep.subr.bf16.mxu0 %v9722_v2 }
 0x7d1   : > { %8491 = vmatpush3.bf16.msra.mxu0 %v9363_v10 }
 0x7d2   : > { %8492 = vmatprep.subr.bf16.mxu0 %v9722_v2 }
 0x7d5   : > { %8493 = vmatpush3.bf16.msra.mxu0 %v9364_v11  ;;  %v9390_v11 = vld [vmem:[%s11898_s8 + $0x1c0] sm:$0xff]  }
 0x7d6   : > { %8494 = vmatprep.subr.bf16.mxu0 %v9722_v2 }
 0x7d7   : > { %v10658_v13 = vpop.f32.mrf.mxu1 }
 0x7d9   : > { %8495 = vmatpush3.bf16.msra.mxu0 %v9365_v12  ;;  %v8480_v14 = vpop.f32.mrf.mxu1  ;;  %v3151_v12 = vmul.f32 %v10360_v31, %v3150_v8 }
 0x7da   : > { %8496 = vmatprep.subr.bf16.mxu0 %v9722_v2 }
 0x7db   : > { %v2516_v17 = vpop.f32.mrf.mxu1  ;;  %v3152_v16 = vpack.c.bf16 %v3151_v12, %v3151_v12 }
 0x7dd   : > { %8497 = vmatpush3.bf16.msra.mxu0 %v9366_v15  ;;  %v8481_v18 = vpop.f32.mrf.mxu1 }
 0x7de   : > { %8522 = vmatprep.subr.bf16.mxu0 %v9722_v2 }
 0x7e0   : > { %8499 = vmatmul.mubr.bf16.vlgmr.msra.gmra.mxu0 %v2394_v20 }
 0x7e1   : > { %8523 = vmatpush3.bf16.msra.mxu0 %v9367_v19  ;;  %8538 = vmatprep.mubr.msk.bf16.mxu0 %vm9723_vm0, %v9722_v2 }
 0x7e2   : > { %8524 = vmatprep.subr.bf16.mxu0 %v9722_v2 }
 0x7e5   : > { %8525 = vmatpush3.bf16.msra.mxu0 %v9368_v21  ;;  %v9391_v21 = vld [vmem:[%s11900_s10 + $0x38] sm:$0xff]  }
 0x7e6   : > { %8526 = vmatprep.subr.bf16.mxu0 %v9722_v2 }
 0x7e9   : > { %8527 = vmatpush3.bf16.msra.mxu0 %v9369_v22  ;;  %v9392_v22 = vld [vmem:[%s11900_s10 + $0x30] sm:$0xff]  }
 0x7ea   : > { %8528 = vmatprep.subr.bf16.mxu0 %v9722_v2 }
 0x7ed   : > { %8529 = vmatpush3.bf16.msra.mxu0 %v9370_v24  ;;  %v9393_v24 = vld [vmem:[%s11900_s10 + $0x28] sm:$0xff]  }
 0x7ee   : > { %8530 = vmatprep.subr.bf16.mxu0 %v9722_v2 }
 0x7f1   : > { %8531 = vmatpush3.bf16.msra.mxu0 %v9371_v25  ;;  %v9394_v25 = vld [vmem:[%s11900_s10 + $0x20] sm:$0xff]  }
 0x7f2   : > { %8532 = vmatprep.subr.bf16.mxu0 %v9722_v2 }
 0x7f5   : > { %8533 = vmatpush3.bf16.msra.mxu0 %v9372_v26  ;;  %v9395_v26 = vld [vmem:[%s11900_s10 + $0x18] sm:$0xff]  }
 0x7f6   : > { %8534 = vmatprep.subr.bf16.mxu0 %v9722_v2 }
 0x7f7   : > { %v10696_v29 = vpop.f32.mrf.mxu1 }
 0x7f9   : > { %8535 = vmatpush3.bf16.msra.mxu0 %v9373_v27  ;;  %v8520_v32 = vpop.f32.mrf.mxu1  ;;  %v703_v27 = vand.u32 127, %v652_v62  ;;  %v9397_v62 = vld [vmem:[%s11900_s10 + $0x8] sm:$0xff]  }
 0x7fa   : > { %8536 = vmatprep.subr.bf16.mxu0 %v9722_v2  ;;  %v9396_v32 = vld [vmem:[%s11900_s10 + $0x10] sm:$0xff]  }
 0x7fb   : > { %v2712_v37 = vpop.f32.mrf.mxu1  ;;  %vm704_vm12 = vcmp.lt.s32.totalorder %v703_v27, 32 }
 0x7fd   : > { %8537 = vmatpush3.bf16.msra.mxu0 %v9374_v33  ;;  %v8521_v38 = vpop.f32.mrf.mxu1 }
 0x7fe   : > { %8562 = vmatprep.subr.bf16.mxu0 %v9722_v2  ;;  %v10811_v38 = vsel %vm704_vm12, 1.0, %v9722_v2 }
 0x800   : > { %8539 = vmatmul.mubr.bf16.vlgmr.msra.gmra.mxu0 %v2718_v40 }
 0x801   : > { %8563 = vmatpush3.bf16.msra.mxu0 %v9375_v39  ;;  %8578 = vmatprep.mubr.msk.bf16.mxu0 %vm9723_vm0, %v9722_v2 }
 0x802   : > { %8564 = vmatprep.subr.bf16.mxu0 %v9722_v2 }
 0x805   : > { %8565 = vmatpush3.bf16.msra.mxu0 %v9376_v41 }
 0x806   : > { %8566 = vmatprep.subr.bf16.mxu0 %v9722_v2 }
 0x809   : > { %8567 = vmatpush3.bf16.msra.mxu0 %v9377_v42 }
 0x80a   : > { %8568 = vmatprep.subr.bf16.mxu0 %v9722_v2 }
 0x80d   : > { %8569 = vmatpush3.bf16.msra.mxu0 %v9378_v43  ;;  %v9398_v43 = vld [vmem:[%s11900_s10] sm:$0xff]  }
 0x80e   : > { %8570 = vmatprep.subr.bf16.mxu0 %v9722_v2 }
 0x811   : > { %8571 = vmatpush3.bf16.msra.mxu0 %v9379_v44 }
 0x812   : > { %8572 = vmatprep.subr.bf16.mxu0 %v9722_v2 }
 0x815   : > { %8573 = vmatpush3.bf16.msra.mxu0 %v9380_v45 }
 0x816   : > { %8574 = vmatprep.subr.bf16.mxu0 %v9722_v2 }
 0x817   : > { %v10734_v49 = vpop.f32.mrf.mxu1 }
 0x819   : > { %8575 = vmatpush3.bf16.msra.mxu0 %v9381_v47  ;;  %v8560_v50 = vpop.f32.mrf.mxu1 }
 0x81a   : > { %8576 = vmatprep.subr.bf16.mxu0 %v9722_v2 }
 0x81b   : > { %v2928_v52 = vpop.f32.mrf.mxu1 }
 0x81d   : > { %8577 = vmatpush3.bf16.msra.mxu0 %v9382_v51  ;;  %v8561_v53 = vpop.f32.mrf.mxu1 }
 0x81e   : > { %8602 = vmatprep.subr.bf16.mxu0 %v9722_v2 }
 0x820   : > { %8579 = vmatmul.mubr.bf16.vlgmr.msra.gmra.mxu0 %v2934_v56 }
 0x821   : > { %8603 = vmatpush3.bf16.msra.mxu0 %v9383_v54  ;;  %8618 = vmatprep.mubr.msk.bf16.mxu0 %vm9723_vm0, %v9722_v2 }
 0x822   : > { %8604 = vmatprep.subr.bf16.mxu0 %v9722_v2 }
 0x825   : > { %8605 = vmatpush3.bf16.msra.mxu0 %v9384_v57 }
 0x826   : > { %8606 = vmatprep.subr.bf16.mxu0 %v9722_v2 }
 0x829   : > { %8607 = vmatpush3.bf16.msra.mxu0 %v9385_v58 }
 0x82a   : > { %8608 = vmatprep.subr.bf16.mxu0 %v9722_v2 }
 0x82d   : > { %8609 = vmatpush3.bf16.msra.mxu0 %v9386_v59 }
 0x82e   : > { %8610 = vmatprep.subr.bf16.mxu0 %v9722_v2 }
 0x831   : > { %8611 = vmatpush3.bf16.msra.mxu0 %v9387_v0 }
 0x832   : > { %8612 = vmatprep.subr.bf16.mxu0 %v9722_v2 }
 0x835   : > { %8613 = vmatpush3.bf16.msra.mxu0 %v9388_v3 }
 0x836   : > { %8614 = vmatprep.subr.bf16.mxu0 %v9722_v2 }
 0x837   : > { %v10772_v9 = vpop.f32.mrf.mxu1 }
 0x839   : > { %8615 = vmatpush3.bf16.msra.mxu0 %v9389_v55  ;;  %v8600_v10 = vpop.f32.mrf.mxu1 }
 0x83a   : > { %8616 = vmatprep.subr.bf16.mxu0 %v9722_v2 }
 0x83b   : > { %v3146_v14 = vpop.f32.mrf.mxu1 }
 0x83d   : > { %8617 = vmatpush3.bf16.msra.mxu0 %v9390_v11  ;;  %v8601_v15 = vpop.f32.mrf.mxu1  ;;  %v7223_v11 = vld [vmem:[%s11899_s9] ss:$0 sm:$0xff] }
 0x83e   : > { %8642 = vmatprep.subr.bf16.mxu0 %v9722_v2 }
 0x840   : > { %8619 = vmatmul.mubr.bf16.vlgmr.msra.gmra.mxu0 %v3152_v16 }
 0x841   : > { %8658 = vmatprep.mubr.msk.bf16.mxu0 %vm9723_vm0, %v9722_v2  ;;  %8643 = vmatpush3.bf16.msra.mxu0 %v9391_v21 }
 0x842   : > { %8644 = vmatprep.subr.bf16.mxu0 %v9722_v2 }
 0x845   : > { %8645 = vmatpush3.bf16.msra.mxu0 %v9392_v22 }
 0x846   : > { %8646 = vmatprep.subr.bf16.mxu0 %v9722_v2 }
 0x849   : > { %8647 = vmatpush3.bf16.msra.mxu0 %v9393_v24 }
 0x84a   : > { %8648 = vmatprep.subr.bf16.mxu0 %v9722_v2 }
 0x84d   : > { %8649 = vmatpush3.bf16.msra.mxu0 %v9394_v25 }
 0x84e   : > { %8650 = vmatprep.subr.bf16.mxu0 %v9722_v2 }
 0x851   : > { %8651 = vmatpush3.bf16.msra.mxu0 %v9395_v26 }
 0x852   : > { %8652 = vmatprep.subr.bf16.mxu0 %v9722_v2 }
 0x855   : > { %8653 = vmatpush3.bf16.msra.mxu0 %v9396_v32  ;;  %v9401_v32 = vld [vmem:[%s11897_s7 + $0xf4] ss:$8 sps:$4 sm:$0xff]  }
 0x856   : > { %8654 = vmatprep.subr.bf16.mxu0 %v9722_v2 }
 0x857   : > { %v3360_v17 = vpop.f32.mrf.mxu1 }
 0x859   : > { %v8640_v18 = vpop.f32.mrf.mxu1  ;;  %8655 = vmatpush3.bf16.msra.mxu0 %v9397_v62  ;;  %v9405_v62 = vld [vmem:[%s11897_s7 + $0xd0] ss:$8 sps:$4 sm:$0xff]  }
 0x85a   : > { %8656 = vmatprep.subr.bf16.mxu0 %v9722_v2 }
 0x85b   : > { %v3363_v19 = vpop.f32.mrf.mxu1 }
 0x85d   : > { %v8641_v20 = vpop.f32.mrf.mxu1  ;;  %8657 = vmatpush3.bf16.msra.mxu0 %v9398_v43  ;;  %v9416_v43 = vld [vmem:[%s11897_s7 + $0xa4] ss:$8 sps:$4 sm:$0xff]  }
 0x85e   : > { %3756 = vmatprep.subr.bf16.mxu0 %v9401_v32 }
 0x880   : > { %v2353_v33 = vpop.f32.mrf.mxu0 }
 0x881   : > { %v2354_v34 = vadd.f32 %v7010_v28, %v2353_v33  ;;  %v9399_v33 = vld [vmem:[%s11897_s7 + $0xf0] ss:$8 sps:$4 sm:$0xff]  }
 0x882   : > { %v8460_v37 = vpop.f32.mrf.mxu0 }
 0x883   : > { %v2359_v39 = vadd.f32 %v2354_v34, %v10118_v61  ;;  %v9402_v34 = vld [vmem:[%s11897_s7 + $0xe0] ss:$8 sps:$4 sm:$0xff]   ;;  %v9407_v37 = vld [vmem:[%s11897_s7 + $0xd4] ss:$8 sps:$4 sm:$0xff]  }
 0x884   : > { %v2356_v40 = vpop.f32.mrf.mxu0 }
 0x885   : > { %v2360_v41 = vmul.f32 %v10811_v38, %v2359_v39  ;;  %v9408_v40 = vld [vmem:[%s11897_s7 + $0xc0] ss:$8 sps:$4 sm:$0xff]  }
 0x886   : > { %v8461_v42 = vpop.f32.mrf.mxu0 }
 0x887   : > { %2361 = vadd.xlane.f32.xlu1 %v2360_v41  ;;  %v9413_v41 = vld [vmem:[%s11897_s7 + $0xb4] ss:$8 sps:$4 sm:$0xff]   ;;  %v9411_v42 = vld [vmem:[%s11897_s7 + $0xb0] ss:$8 sps:$4 sm:$0xff]  }
 0x8a0   : > { %v2601_v44 = vpop.f32.mrf.mxu0 }
 0x8a1   : > { %v2602_v57 = vadd.f32 %v2601_v44, %v10658_v13  ;;  %v9414_v44 = vld [vmem:[%s11897_s7 + $0xa0] ss:$8 sps:$4 sm:$0xff]  }
 0x8a2   : > { %v8500_v45 = vpop.f32.mrf.mxu0 }
 0x8a3   : > { %v2715_v58 = vadd.f32 %v10696_v29, %v2602_v57  ;;  %v9419_v45 = vld [vmem:[%s11897_s7 + $0x94] ss:$8 sps:$4 sm:$0xff]  }
 0x8a4   : > { %v2604_v47 = vpop.f32.mrf.mxu0 }
 0x8a5   : > { %v9417_v47 = vld [vmem:[%s11897_s7 + $0x90] ss:$8 sps:$4 sm:$0xff]  }
 0x8a6   : > { %v8501_v63 = vpop.f32.mrf.mxu0 }
 0x8a7   : > { %v9422_v63 = vld [vmem:[%s11897_s7 + $0x84] ss:$8 sps:$4 sm:$0xff]  }
 0x8c0   : > { %v2818_v50 = vpop.f32.mrf.mxu0 }
 0x8c1   : > { %v2824_v59 = vadd.f32 %v2818_v50, %v2715_v58  ;;  %v9420_v50 = vld [vmem:[%s11897_s7 + $0x80] ss:$8 sps:$4 sm:$0xff]  }
 0x8c2   : > { %v8540_v51 = vpop.f32.mrf.mxu0 }
 0x8c3   : > { %v2931_v0 = vadd.f32 %v10734_v49, %v2824_v59  ;;  %v9423_v51 = vld [vmem:[%s11896_s6 + $0xf0] ss:$8 sps:$4 sm:$0xff]  }
 0x8c4   : > { %v2821_v61 = vpop.f32.mrf.mxu0 }
 0x8c5   : > { %v9425_v61 = vld [vmem:[%s11896_s6 + $0xf4] ss:$8 sps:$4 sm:$0xff]  }
 0x8c6   : > { %v8541_v1 = vpop.f32.mrf.mxu0  ;;  %3617 = vmatprep.subr.bf16.mxu1 %v9425_v61 }
 0x8c7   : > { %3618 = vmatpush1.bf16.msra.mxu1 %v9423_v51 }
 0x8e0   : > { %v3034_v52 = vpop.f32.mrf.mxu0 }
 0x8e1   : > { %v3040_v3 = vadd.f32 %v3034_v52, %v2931_v0  ;;  %v9428_v0 = vld [vmem:[%s11896_s6 + $0xe4] ss:$8 sps:$4 sm:$0xff]  }
 0x8e2   : > { %v8580_v53 = vpop.f32.mrf.mxu0  ;;  %3619 = vmatprep.subr.bf16.mxu1 %v9428_v0 }
 0x8e3   : > { %v3149_v55 = vadd.f32 %v10772_v9, %v3040_v3  ;;  %v7224_v9 = vld [vmem:[%s11901_s11] ss:$0 sm:$0xff] }
 0x8e4   : > { %v3037_v54 = vpop.f32.mrf.mxu0  ;;  %v9426_v3 = vld [vmem:[%s11896_s6 + $0xe0] ss:$8 sps:$4 sm:$0xff]  }
 0x8e5   : > { %3620 = vmatpush1.bf16.msra.mxu1 %v9426_v3 }
 0x8e6   : > { %v8581_v56 = vpop.f32.mrf.mxu0 }
 0x900   : > { %v3252_v8 = vpop.f32.mrf.mxu0 }
 0x901   : > { %v3258_v10 = vadd.f32 %v3252_v8, %v3149_v55  ;;  %v9431_v55 = vld [vmem:[%s11896_s6 + $0xd4] ss:$8 sps:$4 sm:$0xff]  }
 0x902   : > { %v8620_v12 = vpop.f32.mrf.mxu0  ;;  %3621 = vmatprep.subr.bf16.mxu1 %v9431_v55 }
 0x903   : > { %v3366_v14 = vadd.f32 %v3360_v17, %v3258_v10  ;;  %v7020_v10 = vld [vmem:[%s11902_s12 + $0x1] ss:$0 sm:$0xff] }
 0x904   : > { %v3255_v15 = vpop.f32.mrf.mxu0 }
 0x905   : > { %v3374_v16 = vadd.f32 %v7223_v11, %v3366_v14  ;;  %v9429_v11 = vld [vmem:[%s11896_s6 + $0xd0] ss:$8 sps:$4 sm:$0xff]   ;;  %v9434_v14 = vld [vmem:[%s11896_s6 + $0xc4] ss:$8 sps:$4 sm:$0xff]   ;;  %v7022_v15 = vld [vmem:[%s11903_s13 + $0x1] ss:$0 sm:$0xff] }
 0x906   : > { %v8621_v18 = vpop.f32.mrf.mxu0  ;;  %3622 = vmatpush1.bf16.msra.mxu1 %v9429_v11 }
 0x907   : > { %v3375_v13 = vmax.f32 %v3374_v16, 0.0  ;;  %v9432_v16 = vld [vmem:[%s11896_s6 + $0xc0] ss:$8 sps:$4 sm:$0xff]   ;;  %3623 = vmatprep.subr.bf16.mxu1 %v9434_v14 }
 0x909   : > { %v3376_v19 = vpack.c.bf16 %v3375_v13, %v3375_v13  ;;  %v9437_v13 = vld [vmem:[%s11896_s6 + $0xb4] ss:$8 sps:$4 sm:$0xff]  }
 0x90a   : > { %3624 = vmatpush1.bf16.msra.mxu1 %v9432_v16 }
 0x90b   : > { %8659 = vmatmul.mubr.bf16.vlgmr.msra.gmra.mxu0 %v3376_v19  ;;  %3625 = vmatprep.subr.bf16.mxu1 %v9437_v13 }
 0x90c   : > { %3788 = vmatprep.mubr.bf16.mxu0 %v9724_v4  ;;  %3757 = vmatpush1.bf16.msra.mxu0 %v9399_v33  ;;  %v7233_v33 = vld [vmem:[%s11902_s12] ss:$0 sm:$0xff] }
 0x910   : > { %v2362_v29 = vpop.xlane.xlu1 %2361 }
 0x911   : > { %v2363_v49 = vmul.f32 0.03125, %v2362_v29  ;;  %v9435_v29 = vld [vmem:[%s11896_s6 + $0xb0] ss:$8 sps:$4 sm:$0xff]  }
 0x912   : > { %3626 = vmatpush1.bf16.msra.mxu1 %v9435_v29 }
 0x913   : > { %v2364_v21 = vsub.f32 %v2359_v39, %v2363_v49  ;;  %v9410_v39 = vld [vmem:[%s11897_s7 + $0xc4] ss:$8 sps:$4 sm:$0xff]  }
 0x914   : > { %v9659_v49 = vld [vmem:[%s9990_s23] sm:$0xff]  ;;  %s9725_s23 = smov [#allocation3]  }
 0x915   : > { %v2365_v27 = vmul.f32 %v10811_v38, %v2364_v21  ;;  %s9664_s18 = sshll.u32 %s9725_s23, 4  ;;  %s9665_s18 = int_to_ptr.vmem [resolvable:$false] %s9664_s18 }
 0x916   : > { %s9666_s2 = scalar_lea.vmem %s9665_s18, 256  ;;  %p9667_p0 = scmp.lt.s32.totalorder %s6630_s28, %s9665_s18 }
 0x917   : > { %v2366_v4 = vmul.f32 %v2365_v27, %v2365_v27  ;;  %p9668_p1 = scmp.lt.s32.totalorder %s9666_s2, %s9660_s22 }
 0x919   : > { %p9669_p2 = por %p9668_p1, %p9667_p0 }
 0x91b   : > { %p9670_p3 = pnand %p9669_p2, %p9663_p13 }
 0x9cb   : > { %v3482_v20 = vpop.f32.mrf.mxu0 }
 0x9cc   : > { %v3483_v22 = vadd.f32 %v7224_v9, %v3482_v20  ;;  %v9440_v20 = vld [vmem:[%s11896_s6 + $0xa4] ss:$8 sps:$4 sm:$0xff]  }
 0x9cd   : > { %v8660_v24 = vpop.f32.mrf.mxu0  ;;  %3627 = vmatprep.subr.bf16.mxu1 %v9440_v20  ;;  %v9449_v20 = vld [vmem:[%s11898_s8 + $0x730] sm:$0xff]  }
 0x9ce   : > { %v3488_v17 = vadd.f32 %v3483_v22, %v10044_v23  ;;  %v9404_v23 = vld [vmem:[%s11897_s7 + $0xe4] ss:$8 sps:$4 sm:$0xff]   ;;  %v9438_v22 = vld [vmem:[%s11896_s6 + $0xa0] ss:$8 sps:$4 sm:$0xff]   ;;  %v9443_v24 = vld [vmem:[%s11896_s6 + $0x94] ss:$8 sps:$4 sm:$0xff]  }
 0x9cf   : > { %v3485_v25 = vpop.f32.mrf.mxu0  ;;  %3758 = vmatprep.subr.bf16.mxu0 %v9404_v23  ;;  %3628 = vmatpush1.bf16.msra.mxu1 %v9438_v22  ;;  %v9453_v22 = vld [vmem:[%s11898_s8 + $0x720] sm:$0xff]  }
 0x9d0   : > { %v3489_v26 = vmul.f32 %v10811_v38, %v3488_v17  ;;  %3759 = vmatpush1.bf16.msra.mxu0 %v9402_v34  ;;  %3629 = vmatprep.subr.bf16.mxu1 %v9443_v24  ;;  %v9446_v25 = vld [vmem:[%s11896_s6 + $0x84] ss:$8 sps:$4 sm:$0xff]   ;;  %v7234_v34 = vld [vmem:[%s11903_s13] ss:$0 sm:$0xff]  ;;  %v9455_v24 = vld [vmem:[%s11898_s8 + $0x718] sm:$0xff]  }
 0x9d1   : > { %v8661_v28 = vpop.f32.mrf.mxu0  ;;  %3760 = vmatprep.subr.bf16.mxu0 %v9407_v37 }
 0x9d2   : > { %3490 = vadd.xlane.f32.xlu1 %v3489_v26  ;;  %v9444_v26 = vld [vmem:[%s11896_s6 + $0x80] ss:$8 sps:$4 sm:$0xff]  }
 0x9d4   : > { %3761 = vmatpush1.bf16.msra.mxu0 %v9405_v62 }
 0x9d5   : > { %3762 = vmatprep.subr.bf16.mxu0 %v9410_v39 }
 0x9d6   : > { %2367 = vadd.xlane.f32.xlu1 %v2366_v4 }
 0x9d8   : > { %3763 = vmatpush1.bf16.msra.mxu0 %v9408_v40 }
 0x9d9   : > { %3764 = vmatprep.subr.bf16.mxu0 %v9413_v41 }
 0x9dc   : > { %3765 = vmatpush1.bf16.msra.mxu0 %v9411_v42 }
 0x9dd   : > { %3766 = vmatprep.subr.bf16.mxu0 %v9416_v43 }
 0x9e0   : > { %3767 = vmatpush1.bf16.msra.mxu0 %v9414_v44 }
 0x9e1   : > { %3768 = vmatprep.subr.bf16.mxu0 %v9419_v45 }
 0x9e4   : > { %3769 = vmatpush1.bf16.msra.mxu0 %v9417_v47 }
 0x9e5   : > { %3770 = vmatprep.subr.bf16.mxu0 %v9422_v63 }
 0x9e8   : > { %3771 = vmatpush1.bf16.msra.mxu0 %v9420_v50 }
 0x9e9   : > { %8668 = vmatprep.subr.bf16.mxu0 %v9722_v2 }
 0xa5b   : > { %v3491_v1 = vpop.xlane.xlu1 %3490 }
 0xa5c   : > { %v3492_v52 = vmul.f32 0.03125, %v3491_v1 }
 0xa5e   : > { %v3493_v53 = vsub.f32 %v3488_v17, %v3492_v52  ;;  %v9441_v17 = vld [vmem:[%s11896_s6 + $0x90] ss:$8 sps:$4 sm:$0xff]  }
 0xa5f   : > { %v2368_v54 = vpop.xlane.xlu1 %2367  ;;  %3630 = vmatpush1.bf16.msra.mxu1 %v9441_v17 }
 0xa60   : > { %v2369_v56 = vmul.f32 0.03125, %v2368_v54  ;;  %v3494_v57 = vmul.f32 %v10811_v38, %v3493_v53  ;;  %3631 = vmatprep.subr.bf16.mxu1 %v9446_v25 }
 0xa62   : > { %v2370_v58 = vadd.f32 1e-05, %v2369_v56  ;;  %v3495_v59 = vmul.f32 %v3494_v57, %v3494_v57 }
 0xa63   : > { %3632 = vmatpush1.bf16.msra.mxu1 %v9444_v26 }
 0xa64   : > { %9639 = vrsqrt.f32 %v2370_v58  ;;  %3496 = vadd.xlane.f32.xlu1 %v3495_v59  ;;  %8662 = vmatprep.subr.bf16.mxu1 %v9722_v2 }
 0xa71   : > { %v9640_v8 = vpop.eup %9639 }
 0xa72   : > { %v2372_v12 = vmul.f32 %v9640_v8, %v2365_v27 }
 0xa74   : > { %v2381_v18 = vmul.f32 %v7020_v10, %v2372_v12 }
 0xa76   : > { %v2390_v19 = vadd.f32 %v7022_v15, %v2381_v18 }
 0xa78   : > { %v10923_v9 = vadd.f32 %v9659_v49, %v2390_v19  ;;  %v9447_v49 = vld [vmem:[%s11898_s8 + $0x738] sm:$0xff]  }
 0xa7a   : > { %v3658_v21 = vpack.c.bf16 %v10923_v9, %v10923_v9 }
 0xa7c   : > { %3789 = vmatmul.mubr.bf16.vlgmr.msra.gmra.mxu0 %v3658_v21  ;;  %v9451_v21 = vld [vmem:[%s11898_s8 + $0x728] sm:$0xff]  }
 0xa7d   : > { %8670 = vmatprep.mubr.msk.bf16.mxu0 %vm9723_vm0, %v9722_v2 }
 0xaed   : > { %v3497_v27 = vpop.xlane.xlu1 %3496 }
 0xaee   : > { %v3498_v28 = vmul.f32 0.03125, %v3497_v27 }
 0xaf0   : > { %v3499_v4 = vadd.f32 1e-05, %v3498_v28 }
 0xaf2   : > { %9641 = vrsqrt.f32 %v3499_v4 }
 0xaff   : > { %v9642_v32 = vpop.eup %9641 }
 0xb00   : > { %v3501_v23 = vmul.f32 %v9642_v32, %v3494_v57 }
 0xb02   : > { %v3509_v37 = vmul.f32 %v7233_v33, %v3501_v23 }
 0xb04   : > { %v3517_v62 = vadd.f32 %v7234_v34, %v3509_v37  ;;  %v9448_v34 = vld [vmem:[%s11898_s8 + $0x6f8] sm:$0xff]  }
 0xb06   : > { %v10955_v39 = vadd.f32 %v3517_v62, %v10012_v46  ;;  %v9450_v62 = vld [vmem:[%s11898_s8 + $0x6f0] sm:$0xff]  }
 0xb08   : > { %v3519_v40 = vpack.c.bf16 %v10955_v39, %v10955_v39 }
 0xb0a   : > { %3650 = vmatmul.mubr.bf16.vlgmr.msra.gmra.mxu1 %v3519_v40  ;;  %v9452_v40 = vld [vmem:[%s11898_s8 + $0x6e8] sm:$0xff]  }
 0xb0b   : > { %8664 = vmatprep.mubr.msk.bf16.mxu1 %vm9723_vm0, %v9722_v2 }
 0xb3c   : > { %v3790_v41 = vpop.f32.mrf.mxu0 }
 0xb3d   : > { %v3798_v42 = vpack.c.bf16 %v3790_v41, %v3790_v41  ;;  %v9454_v41 = vld [vmem:[%s11898_s8 + $0x6e0] sm:$0xff]  }
 0xb3e   : > { %v3792_v43 = vpop.f32.mrf.mxu0 }
 0xb3f   : > { %v3851_v44 = vpack.c.bf16 %v3792_v43, %v3792_v43  ;;  %8663 = vmatpush3.bf16.xpose.msra.mxu1 %v3798_v42  ;;  %v9457_v43 = vld [vmem:[%s11898_s8 + $0x710] sm:$0xff]  }
 0xb40   : > { %v3794_v45 = vpop.f32.mrf.mxu0  ;;  %8674 = vmatprep.subr.bf16.mxu1 %v9722_v2 }
 0xb41   : > { %v3856_v47 = vsel %vm1116_vm2, %v3851_v44, 0  ;;  %v9458_v44 = vld [vmem:[%s11898_s8 + $0x6d0] sm:$0xff]   ;;  %v9459_v45 = vld [vmem:[%s11898_s8 + $0x708] sm:$0xff]  }
 0xb42   : > { %v3795_v63 = vpop.f32.mrf.mxu0  ;;  %8669 = vmatpush3.bf16.msra.mxu0 %v3856_v47  ;;  %v9460_v47 = vld [vmem:[%s11898_s8 + $0x6c8] sm:$0xff]  }
 0xb43   : > { %8680 = vmatprep.subr.bf16.mxu0 %v9722_v2  ;;  %v9461_v63 = vld [vmem:[%s11898_s8 + $0x700] sm:$0xff]  }
 0xbca   : > { %v3651_v46 = vpop.f32.mrf.mxu1 }
 0xbcb   : > { %v3797_v50 = vpack.c.bf16 %v3651_v46, %v3651_v46  ;;  %v9462_v46 = vld [vmem:[%s11898_s8 + $0x6c0] sm:$0xff]  }
 0xbcc   : > { %v3653_v51 = vpop.f32.mrf.mxu1 }
 0xbcd   : > { %8665 = vmatmul.mubr.bf16.vlgmr.msra.gmra.mxu1 %v3797_v50  ;;  %v3950_v27 = vpack.c.bf16 %v3653_v51, %v3653_v51 }
 0xbce   : > { %8675 = vmatpush3.bf16.xpose.msra.mxu1 %v3797_v50  ;;  %v3655_v61 = vpop.f32.mrf.mxu1  ;;  %8676 = vmatprep.mubr.msk.bf16.mxu1 %vm9723_vm0, %v9722_v2 }
 0xbcf   : > { %8686 = vmatprep.subr.bf16.mxu1 %v9722_v2  ;;  %v3955_v32 = vsel %vm1116_vm2, %v3950_v27, 0  ;;  %v9479_v27 = vld [vmem:[%s11898_s8 + $0x7f8] sm:$0xff]  }
 0xbd0   : > { %v3656_v1 = vpop.f32.mrf.mxu1 }
 0xbd5   : > { %8677 = vmatmul.mubr.bf16.vlgmr.msra.gmra.mxu1 %v3798_v42  ;;  %v9456_v42 = vld [vmem:[%s11898_s8 + $0x6d8] sm:$0xff]  }
 0xbd6   : > { %8702 = vmatprep.mubr.msk.bf16.mxu1 %vm9723_vm0, %v9722_v2  ;;  %8687 = vmatpush3.bf16.msra.mxu1 %v9447_v49  ;;  %v9475_v49 = vld [vmem:[%s11898_s8 + $0x748] sm:$0xff]  }
 0xbd7   : > { %8688 = vmatprep.subr.bf16.mxu1 %v9722_v2 }
 0xbda   : > { %8689 = vmatpush3.bf16.msra.mxu1 %v9449_v20  ;;  %v9476_v20 = vld [vmem:[%s11898_s8 + $0x788] sm:$0xff]  }
 0xbdb   : > { %8690 = vmatprep.subr.bf16.mxu1 %v9722_v2 }
 0xbde   : > { %8691 = vmatpush3.bf16.msra.mxu1 %v9451_v21 }
 0xbdf   : > { %8692 = vmatprep.subr.bf16.mxu1 %v9722_v2 }
 0xbe2   : > { %8693 = vmatpush3.bf16.msra.mxu1 %v9453_v22 }
 0xbe3   : > { %8694 = vmatprep.subr.bf16.mxu1 %v9722_v2 }
 0xbe6   : > { %8695 = vmatpush3.bf16.msra.mxu1 %v9455_v24  ;;  %v9477_v24 = vld [vmem:[%s11898_s8 + $0x740] sm:$0xff]  }
 0xbe7   : > { %8696 = vmatprep.subr.bf16.mxu1 %v9722_v2 }
 0xbea   : > { %8697 = vmatpush3.bf16.msra.mxu1 %v9457_v43  ;;  %v9489_v43 = vld [vmem:[%s11898_s8 + $0x7d0] sm:$0xff]  }
 0xbeb   : > { %8698 = vmatprep.subr.bf16.mxu1 %v9722_v2 }
 0xbee   : > { %8699 = vmatpush3.bf16.msra.mxu1 %v9459_v45  ;;  %v9491_v45 = vld [vmem:[%s11898_s8 + $0x7c8] sm:$0xff]  }
 0xbef   : > { %8700 = vmatprep.subr.bf16.mxu1 %v9722_v2 }
 0xbf2   : > { %8701 = vmatpush3.bf16.msra.mxu1 %v9461_v63 }
 0xbf3   : > { %8726 = vmatprep.subr.bf16.mxu1 %v9722_v2 }
 0xc8d   : > { %v3833_v52 = vpop.f32.mrf.mxu1 }
 0xc8e   : > { %v3834_v53 = vadd.f32 %v3833_v52, %v10031_v5 }
 0xc8f   : > { %v8666_v54 = vpop.f32.mrf.mxu1 }
 0xc90   : > { %v3839_v56 = vsel %vm1099_vm3, %v3834_v53, -inf }
 0xc91   : > { %3840 = vmax.xlane.f32.xlu1 %v3839_v56  ;;  %v3836_v57 = vpop.f32.mrf.mxu1 }
 0xc93   : > { %v8667_v58 = vpop.f32.mrf.mxu1 }
 0xc95   : > { %v3932_v59 = vpop.f32.mrf.mxu1 }
 0xc96   : > { %v3933_v0 = vadd.f32 %v3932_v59, %v10031_v5 }
 0xc97   : > { %v8678_v3 = vpop.f32.mrf.mxu1 }
 0xc98   : > { %v3938_v55 = vsel %vm1099_vm3, %v3933_v0, -inf  ;;  %v9464_v3 = vld [vmem:[%s11898_s8 + $0x7b8] sm:$0xff]  }
 0xc99   : > { %3939 = vmax.xlane.f32.xlu1 %v3938_v55  ;;  %v3935_v8 = vpop.f32.mrf.mxu1 }
 0xc9b   : > { %v8679_v10 = vpop.f32.mrf.mxu1 }
 0xd1a   : > { %v3841_v11 = vpop.xlane.xlu1 %3840 }
 0xd1b   : > { %v3842_v12 = vsub.f32 %v3834_v53, %v3841_v11  ;;  %v9465_v11 = vld [vmem:[%s11898_s8 + $0x770] sm:$0xff]  }
 0xd1d   : > { %v3843_v14 = vmul.f32 1.442695, %v3842_v12  ;;  %v9466_v12 = vld [vmem:[%s11898_s8 + $0x7b0] sm:$0xff]  }
 0xd1f   : > { %9643 = vpow2.f32 %v3843_v14  ;;  %v9467_v14 = vld [vmem:[%s11898_s8 + $0x768] sm:$0xff]  }
 0xd22   : > { %v3940_v15 = vpop.xlane.xlu1 %3939 }
 0xd23   : > { %v3941_v16 = vsub.f32 %v3933_v0, %v3940_v15  ;;  %v9463_v0 = vld [vmem:[%s11898_s8 + $0x778] sm:$0xff]   ;;  %v9468_v15 = vld [vmem:[%s11898_s8 + $0x7a8] sm:$0xff]  }
 0xd25   : > { %v3942_v18 = vmul.f32 1.442695, %v3941_v16  ;;  %v9469_v16 = vld [vmem:[%s11898_s8 + $0x760] sm:$0xff]  }
 0xd27   : > { %9645 = vpow2.f32 %v3942_v18  ;;  %v9470_v18 = vld [vmem:[%s11898_s8 + $0x7a0] sm:$0xff]  }
 0xd2c   : > { %v9644_v13 = vpop.eup %9643 }
 0xd2d   : > { %v3845_v19 = vsel %vm1099_vm3, %v9644_v13, 0.0 }
 0xd2e   : > { %3846 = vadd.xlane.f32.xlu0 %v3845_v19  ;;  %v9472_v19 = vld [vmem:[%s11898_s8 + $0x798] sm:$0xff]  }
 0xd34   : > { %v9646_v29 = vpop.eup %9645 }
 0xd35   : > { %v3944_v5 = vsel %vm1099_vm3, %v9646_v29, 0.0 }
 0xd36   : > { %3945 = vadd.xlane.f32.xlu1 %v3944_v5  ;;  %v9474_v5 = vld [vmem:[%s11898_s8 + $0x790] sm:$0xff]  }
 0xdb7   : > { %v3847_v17 = vpop.xlane.xlu0 %3846 }
 0xdb8   : > { %9647 = vrcp.f32 %v3847_v17  ;;  %v9478_v17 = vld [vmem:[%s11898_s8 + $0x780] sm:$0xff]  }
 0xdbf   : > { %v3946_v25 = vpop.xlane.xlu1 %3945 }
 0xdc0   : > { %9649 = vrcp.f32 %v3946_v25 }
 0xdc5   : > { %v9648_v26 = vpop.eup %9647 }
 0xdc6   : > { %v3849_v28 = vmul.f32 %v9648_v26, %v9644_v13  ;;  %v9471_v13 = vld [vmem:[%s11898_s8 + $0x758] sm:$0xff]  }
 0xdc8   : > { %v3850_v4 = vpack.c.bf16 %v3849_v28, %v3849_v28  ;;  %v9480_v28 = vld [vmem:[%s11898_s8 + $0x838] sm:$0xff]  }
 0xdca   : > { %8671 = vmatmul.mubr.msk.bf16.vlgmr.msra.gmra.mxu0 %vm1099_vm3, %v3850_v4 }
 0xdcb   : > { %8681 = vmatpush3.bf16.msra.mxu0 %v3955_v32  ;;  %8682 = vmatprep.mubr.msk.bf16.mxu0 %vm9723_vm0, %v9722_v2 }
 0xdcc   : > { %8706 = vmatprep.subr.bf16.mxu0 %v9722_v2 }
 0xdcd   : > { %v9650_v33 = vpop.eup %9649 }
 0xdce   : > { %v3948_v23 = vmul.f32 %v9650_v33, %v9646_v29  ;;  %v9473_v29 = vld [vmem:[%s11898_s8 + $0x750] sm:$0xff]  }
 0xdcf   : > { %v9481_v33 = vld [vmem:[%s11898_s8 + $0x7f0] sm:$0xff]  }
 0xdd0   : > { %v3949_v37 = vpack.c.bf16 %v3948_v23, %v3948_v23  ;;  %v9482_v23 = vld [vmem:[%s11898_s8 + $0x830] sm:$0xff]  }
 0xdd2   : > { %8683 = vmatmul.mubr.msk.bf16.vlgmr.msra.gmra.mxu0 %vm1099_vm3, %v3949_v37  ;;  %v9484_v37 = vld [vmem:[%s11898_s8 + $0x828] sm:$0xff]  }
 0xdd3   : > { %8707 = vmatpush3.bf16.msra.mxu0 %v9448_v34  ;;  %8722 = vmatprep.mubr.msk.bf16.mxu0 %vm9723_vm0, %v9722_v2  ;;  %v9483_v34 = vld [vmem:[%s11898_s8 + $0x7e8] sm:$0xff]  }
 0xdd4   : > { %8708 = vmatprep.subr.bf16.mxu0 %v9722_v2 }
 0xdd7   : > { %8709 = vmatpush3.bf16.msra.mxu0 %v9450_v62  ;;  %v9485_v62 = vld [vmem:[%s11898_s8 + $0x7e0] sm:$0xff]  }
 0xdd8   : > { %8710 = vmatprep.subr.bf16.mxu0 %v9722_v2 }
 0xddb   : > { %8711 = vmatpush3.bf16.msra.mxu0 %v9452_v40  ;;  %v9486_v40 = vld [vmem:[%s11898_s8 + $0x820] sm:$0xff]  }
 0xddc   : > { %8712 = vmatprep.subr.bf16.mxu0 %v9722_v2 }
 0xddf   : > { %8713 = vmatpush3.bf16.msra.mxu0 %v9454_v41  ;;  %v9487_v41 = vld [vmem:[%s11898_s8 + $0x7d8] sm:$0xff]  }
 0xde0   : > { %8714 = vmatprep.subr.bf16.mxu0 %v9722_v2 }
 0xde3   : > { %8715 = vmatpush3.bf16.msra.mxu0 %v9456_v42  ;;  %v9488_v42 = vld [vmem:[%s11898_s8 + $0x818] sm:$0xff]  }
 0xde4   : > { %8716 = vmatprep.subr.bf16.mxu0 %v9722_v2 }
 0xde7   : > { %8717 = vmatpush3.bf16.msra.mxu0 %v9458_v44  ;;  %v9490_v44 = vld [vmem:[%s11898_s8 + $0x810] sm:$0xff]  }
 0xde8   : > { %8718 = vmatprep.subr.bf16.mxu0 %v9722_v2 }
 0xdeb   : > { %8719 = vmatpush3.bf16.msra.mxu0 %v9460_v47  ;;  %v9492_v47 = vld [vmem:[%s11898_s8 + $0x808] sm:$0xff]  }
 0xdec   : > { %8720 = vmatprep.subr.bf16.mxu0 %v9722_v2 }
 0xdef   : > { %8721 = vmatpush3.bf16.msra.mxu0 %v9462_v46  ;;  %v9493_v46 = vld [vmem:[%s11898_s8 + $0x7c0] sm:$0xff]  }
 0xdf0   : > { %8746 = vmatprep.subr.bf16.mxu0 %v9722_v2 }
 0xe8a   : > { %v11047_v50 = vpop.f32.mrf.mxu0 }
 0xe8c   : > { %v8672_v51 = vpop.f32.mrf.mxu0 }
 0xe8d   : > { %v9494_v51 = vld [vmem:[%s11898_s8 + $0x800] sm:$0xff]  }
 0xe8e   : > { %v3895_v61 = vpop.f32.mrf.mxu0 }
 0xe90   : > { %v8673_v1 = vpop.f32.mrf.mxu0 }
 0xe91   : > { %v9495_v1 = vld [vmem:[%s11898_s8 + $0x878] sm:$0xff]  }
 0xe92   : > { %v11049_v52 = vpop.f32.mrf.mxu0 }
 0xe93   : > { %v4017_v53 = vrot.slane %v11049_v52, 5  ;;  %v3997_v54 = vrot.slane %v11049_v52, 4  ;;  %v4213_v21 = vrot.slane %v11049_v52, 6  ;;  %v4322_v22 = vrot.slane %v11049_v52, 7 }
 0xe94   : > { %v8684_v56 = vpop.f32.mrf.mxu0  ;;  %v4538_v63 = vrot.slane %v11049_v52, 1 }
 0xe95   : > { %v4018_v57 = vmul.f32 %v10123_v6, %v4017_v53  ;;  %v3998_v58 = vmul.f32 %v10126_v7, %v3997_v54  ;;  %v4214_v25 = vmul.f32 %v10201_v35, %v4213_v21  ;;  %v4323_v26 = vmul.f32 %v10204_v36, %v4322_v22  ;;  %v9496_v53 = vld [vmem:[%s11898_s8 + $0x8b8] sm:$0xff]  }
 0xe96   : > { %v3994_v59 = vpop.f32.mrf.mxu0  ;;  %v4539_v61 = vmul.f32 %v10279_v60, %v4538_v63  ;;  %v4431_v56 = vpack.c.bf16 %v11049_v52, %v11049_v52  ;;  %v9528_v63 = vld [vmem:[%s11898_s8 + $0x530] sm:$0xff]  }
 0xe97   : > { %v4019_v55 = vpack.c.bf16 %v4018_v57, %v4018_v57  ;;  %v3999_v8 = vpack.c.bf16 %v3998_v58, %v3998_v58  ;;  %v4215_v4 = vpack.c.bf16 %v4214_v25, %v4214_v25  ;;  %v4324_v32 = vpack.c.bf16 %v4323_v26, %v4323_v26  ;;  %v9497_v58 = vld [vmem:[%s11898_s8 + $0x870] sm:$0xff]   ;;  %v9514_v25 = vld [vmem:[%s11898_s8 + $0x8e0] sm:$0xff]   ;;  %v9515_v26 = vld [vmem:[%s11898_s8 + $0x8d8] sm:$0xff]  }
 0xe98   : > { %v8685_v10 = vpop.f32.mrf.mxu0  ;;  %v4540_v57 = vpack.c.bf16 %v4539_v61, %v4539_v61  ;;  %v9498_v59 = vld [vmem:[%s11898_s8 + $0x8b0] sm:$0xff]   ;;  %v9530_v61 = vld [vmem:[%s11898_s8 + $0x520] sm:$0xff]  }
 0xe99   : > { %8703 = vmatmul.mubr.bf16.vlgmr.msra.gmra.mxu1 %v4019_v55  ;;  %8723 = vmatmul.mubr.bf16.vlgmr.msra.gmra.mxu0 %v3999_v8  ;;  %v9501_v55 = vld [vmem:[%s11898_s8 + $0x860] sm:$0xff]   ;;  %v9503_v10 = vld [vmem:[%s11898_s8 + $0x858] sm:$0xff]  }
 0xe9a   : > { %8727 = vmatpush3.bf16.msra.mxu1 %v9463_v0  ;;  %8747 = vmatpush3.bf16.msra.mxu0 %v9464_v3  ;;  %v9499_v0 = vld [vmem:[%s11898_s8 + $0x868] sm:$0xff]   ;;  %v9502_v8 = vld [vmem:[%s11898_s8 + $0x8a0] sm:$0xff]  }
 0xe9b   : > { %8728 = vmatprep.subr.bf16.mxu1 %v9722_v2  ;;  %8748 = vmatprep.subr.bf16.mxu0 %v9722_v2  ;;  %v9500_v3 = vld [vmem:[%s11898_s8 + $0x8a8] sm:$0xff]  }
 0xe9c   : > { %8742 = vmatprep.mubr.msk.bf16.mxu1 %vm9723_vm0, %v9722_v2  ;;  %8762 = vmatprep.mubr.msk.bf16.mxu0 %vm9723_vm0, %v9722_v2 }
 0xe9e   : > { %8729 = vmatpush3.bf16.msra.mxu1 %v9465_v11  ;;  %8749 = vmatpush3.bf16.msra.mxu0 %v9466_v12  ;;  %v9504_v11 = vld [vmem:[%s11898_s8 + $0x898] sm:$0xff]   ;;  %v9505_v12 = vld [vmem:[%s11898_s8 + $0x850] sm:$0xff]  }
 0xe9f   : > { %8730 = vmatprep.subr.bf16.mxu1 %v9722_v2  ;;  %8750 = vmatprep.subr.bf16.mxu0 %v9722_v2 }
 0xea2   : > { %8731 = vmatpush3.bf16.msra.mxu1 %v9467_v14  ;;  %8751 = vmatpush3.bf16.msra.mxu0 %v9468_v15  ;;  %v9506_v14 = vld [vmem:[%s11898_s8 + $0x890] sm:$0xff]   ;;  %v9507_v15 = vld [vmem:[%s11898_s8 + $0x848] sm:$0xff]  }
 0xea3   : > { %8732 = vmatprep.subr.bf16.mxu1 %v9722_v2  ;;  %8752 = vmatprep.subr.bf16.mxu0 %v9722_v2 }
 0xea6   : > { %8733 = vmatpush3.bf16.msra.mxu1 %v9469_v16  ;;  %8753 = vmatpush3.bf16.msra.mxu0 %v9470_v18  ;;  %v9508_v16 = vld [vmem:[%s11898_s8 + $0x888] sm:$0xff]   ;;  %v4647_v18 = vrot.slane %v11049_v52, 2 }
 0xea7   : > { %8734 = vmatprep.subr.bf16.mxu1 %v9722_v2  ;;  %8754 = vmatprep.subr.bf16.mxu0 %v9722_v2 }
 0xeaa   : > { %8735 = vmatpush3.bf16.msra.mxu1 %v9471_v13  ;;  %8755 = vmatpush3.bf16.msra.mxu0 %v9472_v19  ;;  %v4756_v13 = vrot.slane %v11049_v52, 3  ;;  %v9509_v19 = vld [vmem:[%s11898_s8 + $0x840] sm:$0xff]  }
 0xeab   : > { %8736 = vmatprep.subr.bf16.mxu1 %v9722_v2  ;;  %8756 = vmatprep.subr.bf16.mxu0 %v9722_v2 }
 0xeae   : > { %8737 = vmatpush3.bf16.msra.mxu1 %v9473_v29  ;;  %8757 = vmatpush3.bf16.msra.mxu0 %v9474_v5  ;;  %v9510_v29 = vld [vmem:[%s11898_s8 + $0x880] sm:$0xff]   ;;  %v4648_v5 = vmul.f32 %v10357_v30, %v4647_v18 }
 0xeaf   : > { %8738 = vmatprep.subr.bf16.mxu1 %v9722_v2  ;;  %8758 = vmatprep.subr.bf16.mxu0 %v9722_v2 }
 0xeb0   : > { %v4649_v21 = vpack.c.bf16 %v4648_v5, %v4648_v5 }
 0xeb2   : > { %8739 = vmatpush3.bf16.msra.mxu1 %v9475_v49  ;;  %8759 = vmatpush3.bf16.msra.mxu0 %v9476_v20  ;;  %v4757_v49 = vmul.f32 %v10360_v31, %v4756_v13  ;;  %v9511_v20 = vld [vmem:[%s11898_s8 + $0x8f8] sm:$0xff]  }
 0xeb3   : > { %8740 = vmatprep.subr.bf16.mxu1 %v9722_v2  ;;  %8760 = vmatprep.subr.bf16.mxu0 %v9722_v2 }
 0xeb4   : > { %v4758_v22 = vpack.c.bf16 %v4757_v49, %v4757_v49  ;;  %v9537_v49 = vld [vmem:[%s11898_s8 + $0x5a8] sm:$0xff]  }
 0xeb6   : > { %8741 = vmatpush3.bf16.msra.mxu1 %v9477_v24  ;;  %8761 = vmatpush3.bf16.msra.mxu0 %v9478_v17  ;;  %v9512_v24 = vld [vmem:[%s11898_s8 + $0x8f0] sm:$0xff]   ;;  %v9513_v17 = vld [vmem:[%s11898_s8 + $0x8e8] sm:$0xff]  }
 0xeb7   : > { %8766 = vmatprep.subr.bf16.mxu1 %v9722_v2  ;;  %8786 = vmatprep.subr.bf16.mxu0 %v9722_v2 }
 0xeb9   : > { %8743 = vmatmul.mubr.bf16.vlgmr.msra.gmra.mxu1 %v4215_v4  ;;  %8763 = vmatmul.mubr.bf16.vlgmr.msra.gmra.mxu0 %v4324_v32  ;;  %v9518_v4 = vld [vmem:[%s11898_s8 + $0x8c0] sm:$0xff]   ;;  %v4865_v32 = vmul.f32 %v10404_v48, %v3997_v54  ;;  %v9521_v54 = vld [vmem:[%s11898_s8 + $0x4e8] sm:$0xff]  }
 0xeba   : > { %8767 = vmatpush3.bf16.msra.mxu1 %v9479_v27  ;;  %8787 = vmatpush3.bf16.msra.mxu0 %v9480_v28  ;;  %v9516_v27 = vld [vmem:[%s11898_s8 + $0x8d0] sm:$0xff]   ;;  %v9517_v28 = vld [vmem:[%s11898_s8 + $0x8c8] sm:$0xff]  }
 0xebb   : > { %8768 = vmatprep.subr.bf16.mxu1 %v9722_v2  ;;  %8788 = vmatprep.subr.bf16.mxu0 %v9722_v2 }
 0xebc   : > { %8782 = vmatprep.mubr.msk.bf16.mxu1 %vm9723_vm0, %v9722_v2  ;;  %8802 = vmatprep.mubr.msk.bf16.mxu0 %vm9723_vm0, %v9722_v2 }
 0xebe   : > { %8769 = vmatpush3.bf16.msra.mxu1 %v9481_v33  ;;  %8789 = vmatpush3.bf16.msra.mxu0 %v9482_v23  ;;  %v9519_v33 = vld [vmem:[%s11898_s8 + $0x4f8] sm:$0xff]   ;;  %v4866_v23 = vpack.c.bf16 %v4865_v32, %v4865_v32 }
 0xebf   : > { %8770 = vmatprep.subr.bf16.mxu1 %v9722_v2  ;;  %8790 = vmatprep.subr.bf16.mxu0 %v9722_v2 }
 0xec2   : > { %8771 = vmatpush3.bf16.msra.mxu1 %v9483_v34  ;;  %8791 = vmatpush3.bf16.msra.mxu0 %v9484_v37  ;;  %v9520_v34 = vld [vmem:[%s11898_s8 + $0x4f0] sm:$0xff]   ;;  %v9522_v37 = vld [vmem:[%s11898_s8 + $0x4e0] sm:$0xff]  }
 0xec3   : > { %8772 = vmatprep.subr.bf16.mxu1 %v9722_v2  ;;  %8792 = vmatprep.subr.bf16.mxu0 %v9722_v2 }
 0xec6   : > { %8773 = vmatpush3.bf16.msra.mxu1 %v9485_v62  ;;  %8793 = vmatpush3.bf16.msra.mxu0 %v9486_v40  ;;  %v9523_v62 = vld [vmem:[%s11898_s8 + $0x4d8] sm:$0xff]   ;;  %v9524_v40 = vld [vmem:[%s11898_s8 + $0x4d0] sm:$0xff]  }
 0xec7   : > { %8774 = vmatprep.subr.bf16.mxu1 %v9722_v2  ;;  %8794 = vmatprep.subr.bf16.mxu0 %v9722_v2 }
 0xeca   : > { %8775 = vmatpush3.bf16.msra.mxu1 %v9487_v41  ;;  %8795 = vmatpush3.bf16.msra.mxu0 %v9488_v42  ;;  %v9525_v41 = vld [vmem:[%s11898_s8 + $0x4c8] sm:$0xff]   ;;  %v5150_v42 = vrot.slane %v11047_v50, 5 }
 0xecb   : > { %8776 = vmatprep.subr.bf16.mxu1 %v9722_v2  ;;  %8796 = vmatprep.subr.bf16.mxu0 %v9722_v2 }
 0xece   : > { %8777 = vmatpush3.bf16.msra.mxu1 %v9489_v43  ;;  %8797 = vmatpush3.bf16.msra.mxu0 %v9490_v44  ;;  %v9526_v43 = vld [vmem:[%s11898_s8 + $0x4c0] sm:$0xff]   ;;  %v5151_v44 = vmul.f32 %v10123_v6, %v5150_v42  ;;  %v9529_v6 = vld [vmem:[%s11898_s8 + $0x528] sm:$0xff]  }
 0xecf   : > { %8778 = vmatprep.subr.bf16.mxu1 %v9722_v2  ;;  %8798 = vmatprep.subr.bf16.mxu0 %v9722_v2 }
 0xed2   : > { %8779 = vmatpush3.bf16.msra.mxu1 %v9491_v45  ;;  %8799 = vmatpush3.bf16.msra.mxu0 %v9492_v47  ;;  %v9527_v45 = vld [vmem:[%s11898_s8 + $0x538] sm:$0xff]   ;;  %v5152_v47 = vpack.c.bf16 %v5151_v44, %v5151_v44  ;;  %v9546_v44 = vld [vmem:[%s11898_s8 + $0x620] sm:$0xff]  }
 0xed3   : > { %8780 = vmatprep.subr.bf16.mxu1 %v9722_v2  ;;  %8800 = vmatprep.subr.bf16.mxu0 %v9722_v2 }
 0xed6   : > { %8781 = vmatpush3.bf16.msra.mxu1 %v9493_v46  ;;  %8801 = vmatpush3.bf16.msra.mxu0 %v9494_v51  ;;  %v9559_v46 = vld [vmem:[%s11900_s10 + $0xf8] sm:$0xff]   ;;  %v9560_v51 = vld [vmem:[%s11900_s10 + $0xf0] sm:$0xff]  }
 0xed7   : > { %8806 = vmatprep.subr.bf16.mxu1 %v9722_v2  ;;  %8826 = vmatprep.subr.bf16.mxu0 %v9722_v2 }
 0xed9   : > { %8783 = vmatmul.mubr.bf16.vlgmr.msra.gmra.mxu1 %v4431_v56  ;;  %8803 = vmatmul.mubr.bf16.vlgmr.msra.gmra.mxu0 %v4540_v57  ;;  %v9562_v56 = vld [vmem:[%s11900_s10 + $0xe0] sm:$0xff]   ;;  %v9532_v57 = vld [vmem:[%s11898_s8 + $0x510] sm:$0xff]  }
 0xeda   : > { %8807 = vmatpush3.bf16.msra.mxu1 %v9495_v1  ;;  %8827 = vmatpush3.bf16.msra.mxu0 %v9496_v53  ;;  %v9561_v1 = vld [vmem:[%s11900_s10 + $0xe8] sm:$0xff]   ;;  %v9531_v53 = vld [vmem:[%s11898_s8 + $0x518] sm:$0xff]  }
 0xedb   : > { %8808 = vmatprep.subr.bf16.mxu1 %v9722_v2  ;;  %8828 = vmatprep.subr.bf16.mxu0 %v9722_v2 }
 0xedc   : > { %8822 = vmatprep.mubr.msk.bf16.mxu1 %vm9723_vm0, %v9722_v2  ;;  %8842 = vmatprep.mubr.msk.bf16.mxu0 %vm9723_vm0, %v9722_v2 }
 0xede   : > { %8809 = vmatpush3.bf16.msra.mxu1 %v9497_v58  ;;  %8829 = vmatpush3.bf16.msra.mxu0 %v9498_v59  ;;  %v9563_v58 = vld [vmem:[%s11900_s10 + $0xd8] sm:$0xff]   ;;  %v9533_v59 = vld [vmem:[%s11898_s8 + $0x508] sm:$0xff]  }
 0xedf   : > { %8810 = vmatprep.subr.bf16.mxu1 %v9722_v2  ;;  %8830 = vmatprep.subr.bf16.mxu0 %v9722_v2 }
 0xee2   : > { %8811 = vmatpush3.bf16.msra.mxu1 %v9499_v0  ;;  %8831 = vmatpush3.bf16.msra.mxu0 %v9500_v3  ;;  %v5346_v0 = vrot.slane %v11047_v50, 6  ;;  %v9564_v3 = vld [vmem:[%s11900_s10 + $0xd0] sm:$0xff]  }
 0xee3   : > { %8812 = vmatprep.subr.bf16.mxu1 %v9722_v2  ;;  %8832 = vmatprep.subr.bf16.mxu0 %v9722_v2 }
 0xee6   : > { %8813 = vmatpush3.bf16.msra.mxu1 %v9501_v55  ;;  %8833 = vmatpush3.bf16.msra.mxu0 %v9502_v8  ;;  %v9534_v55 = vld [vmem:[%s11898_s8 + $0x500] sm:$0xff]   ;;  %v5347_v8 = vmul.f32 %v10201_v35, %v5346_v0  ;;  %v9536_v35 = vld [vmem:[%s11898_s8 + $0x5b0] sm:$0xff]  }
 0xee7   : > { %8814 = vmatprep.subr.bf16.mxu1 %v9722_v2  ;;  %8834 = vmatprep.subr.bf16.mxu0 %v9722_v2 }
 0xeea   : > { %8815 = vmatpush3.bf16.msra.mxu1 %v9503_v10  ;;  %8835 = vmatpush3.bf16.msra.mxu0 %v9504_v11  ;;  %v9535_v10 = vld [vmem:[%s11898_s8 + $0x5b8] sm:$0xff]   ;;  %v5348_v11 = vpack.c.bf16 %v5347_v8, %v5347_v8 }
 0xeeb   : > { %8816 = vmatprep.subr.bf16.mxu1 %v9722_v2  ;;  %8836 = vmatprep.subr.bf16.mxu0 %v9722_v2 }
 0xeee   : > { %8817 = vmatpush3.bf16.msra.mxu1 %v9505_v12  ;;  %8837 = vmatpush3.bf16.msra.mxu0 %v9506_v14  ;;  %v9565_v12 = vld [vmem:[%s11900_s10 + $0xc8] sm:$0xff]  }
 0xeef   : > { %8818 = vmatprep.subr.bf16.mxu1 %v9722_v2  ;;  %8838 = vmatprep.subr.bf16.mxu0 %v9722_v2 }
 0xef2   : > { %8819 = vmatpush3.bf16.msra.mxu1 %v9507_v15  ;;  %8839 = vmatpush3.bf16.msra.mxu0 %v9508_v16 }
 0xef3   : > { %8820 = vmatprep.subr.bf16.mxu1 %v9722_v2  ;;  %8840 = vmatprep.subr.bf16.mxu0 %v9722_v2 }
 0xef6   : > { %8821 = vmatpush3.bf16.msra.mxu1 %v9509_v19  ;;  %8841 = vmatpush3.bf16.msra.mxu0 %v9510_v29  ;;  %v9566_v19 = vld [vmem:[%s11900_s10 + $0xc0] sm:$0xff]  }
 0xef7   : > { %8846 = vmatprep.subr.bf16.mxu1 %v9722_v2  ;;  %8866 = vmatprep.subr.bf16.mxu0 %v9722_v2 }
 0xef9   : > { %8823 = vmatmul.mubr.bf16.vlgmr.msra.gmra.mxu1 %v4649_v21  ;;  %8843 = vmatmul.mubr.bf16.vlgmr.msra.gmra.mxu0 %v4758_v22  ;;  %v9538_v22 = vld [vmem:[%s11898_s8 + $0x5a0] sm:$0xff]  }
 0xefa   : > { %8847 = vmatpush3.bf16.msra.mxu1 %v9511_v20  ;;  %8862 = vmatprep.mubr.msk.bf16.mxu1 %vm9723_vm0, %v9722_v2 }
 0xefb   : > { %8848 = vmatprep.subr.bf16.mxu1 %v9722_v2  ;;  %8882 = vmatprep.mubr.msk.bf16.mxu0 %vm9723_vm0, %v9722_v2 }
 0xefc   : > { %8867 = vmatpush3.bf16.msra.mxu0 %v9559_v46  ;;  %v9550_v46 = vld [vmem:[%s11898_s8 + $0x600] sm:$0xff]  }
 0xefd   : > { %8868 = vmatprep.subr.bf16.mxu0 %v9722_v2 }
 0xefe   : > { %8849 = vmatpush3.bf16.msra.mxu1 %v9512_v24  ;;  %v9539_v24 = vld [vmem:[%s11898_s8 + $0x598] sm:$0xff]  }
 0xeff   : > { %8850 = vmatprep.subr.bf16.mxu1 %v9722_v2 }
 0xf00   : > { %8869 = vmatpush3.bf16.msra.mxu0 %v9560_v51 }
 0xf01   : > { %8870 = vmatprep.subr.bf16.mxu0 %v9722_v2 }
 0xf02   : > { %8851 = vmatpush3.bf16.msra.mxu1 %v9513_v17  ;;  %v9540_v17 = vld [vmem:[%s11898_s8 + $0x590] sm:$0xff]  }
 0xf03   : > { %8852 = vmatprep.subr.bf16.mxu1 %v9722_v2 }
 0xf04   : > { %8871 = vmatpush3.bf16.msra.mxu0 %v9561_v1 }
 0xf05   : > { %8872 = vmatprep.subr.bf16.mxu0 %v9722_v2 }
 0xf06   : > { %8853 = vmatpush3.bf16.msra.mxu1 %v9514_v25  ;;  %v9541_v25 = vld [vmem:[%s11898_s8 + $0x588] sm:$0xff]  }
 0xf07   : > { %8854 = vmatprep.subr.bf16.mxu1 %v9722_v2 }
 0xf08   : > { %8873 = vmatpush3.bf16.msra.mxu0 %v9562_v56 }
 0xf09   : > { %8874 = vmatprep.subr.bf16.mxu0 %v9722_v2 }
 0xf0a   : > { %8855 = vmatpush3.bf16.msra.mxu1 %v9515_v26  ;;  %v9542_v26 = vld [vmem:[%s11898_s8 + $0x580] sm:$0xff]  }
 0xf0b   : > { %8856 = vmatprep.subr.bf16.mxu1 %v9722_v2 }
 0xf0c   : > { %8875 = vmatpush3.bf16.msra.mxu0 %v9563_v58 }
 0xf0d   : > { %8876 = vmatprep.subr.bf16.mxu0 %v9722_v2 }
 0xf0e   : > { %8857 = vmatpush3.bf16.msra.mxu1 %v9516_v27  ;;  %v9543_v27 = vld [vmem:[%s11898_s8 + $0x638] sm:$0xff]  }
 0xf0f   : > { %8858 = vmatprep.subr.bf16.mxu1 %v9722_v2 }
 0xf10   : > { %8877 = vmatpush3.bf16.msra.mxu0 %v9564_v3  ;;  %v9553_v3 = vld [vmem:[%s11898_s8 + $0x6a8] sm:$0xff]  }
 0xf11   : > { %8878 = vmatprep.subr.bf16.mxu0 %v9722_v2 }
 0xf12   : > { %8859 = vmatpush3.bf16.msra.mxu1 %v9517_v28  ;;  %v5564_v28 = vpack.c.bf16 %v11047_v50, %v11047_v50 }
 0xf13   : > { %8860 = vmatprep.subr.bf16.mxu1 %v9722_v2 }
 0xf14   : > { %8879 = vmatpush3.bf16.msra.mxu0 %v9565_v12  ;;  %v9556_v12 = vld [vmem:[%s11898_s8 + $0x690] sm:$0xff]  }
 0xf15   : > { %8880 = vmatprep.subr.bf16.mxu0 %v9722_v2 }
 0xf16   : > { %8861 = vmatpush3.bf16.msra.mxu1 %v9518_v4 }
 0xf17   : > { %8886 = vmatprep.subr.bf16.mxu1 %v9722_v2 }
 0xf18   : > { %8881 = vmatpush3.bf16.msra.mxu0 %v9566_v19 }
 0xf19   : > { %8863 = vmatmul.mubr.bf16.vlgmr.msra.gmra.mxu1 %v4866_v23  ;;  %8906 = vmatprep.subr.bf16.mxu0 %v9722_v2  ;;  %v9544_v23 = vld [vmem:[%s11898_s8 + $0x630] sm:$0xff]  }
 0xf1a   : > { %8887 = vmatpush3.bf16.msra.mxu1 %v9519_v33  ;;  %8902 = vmatprep.mubr.msk.bf16.mxu1 %vm9723_vm0, %v9722_v2 }
 0xf1b   : > { %8888 = vmatprep.subr.bf16.mxu1 %v9722_v2 }
 0xf1e   : > { %8889 = vmatpush3.bf16.msra.mxu1 %v9520_v34 }
 0xf1f   : > { %8890 = vmatprep.subr.bf16.mxu1 %v9722_v2 }
 0xf22   : > { %8891 = vmatpush3.bf16.msra.mxu1 %v9521_v54 }
 0xf23   : > { %8892 = vmatprep.subr.bf16.mxu1 %v9722_v2 }
 0xf26   : > { %8893 = vmatpush3.bf16.msra.mxu1 %v9522_v37 }
 0xf27   : > { %8894 = vmatprep.subr.bf16.mxu1 %v9722_v2 }
 0xf2a   : > { %8895 = vmatpush3.bf16.msra.mxu1 %v9523_v62 }
 0xf2b   : > { %8896 = vmatprep.subr.bf16.mxu1 %v9722_v2 }
 0xf2e   : > { %8897 = vmatpush3.bf16.msra.mxu1 %v9524_v40 }
 0xf2f   : > { %8898 = vmatprep.subr.bf16.mxu1 %v9722_v2 }
 0xf32   : > { %8899 = vmatpush3.bf16.msra.mxu1 %v9525_v41  ;;  %v9545_v41 = vld [vmem:[%s11898_s8 + $0x628] sm:$0xff]  }
 0xf33   : > { %8900 = vmatprep.subr.bf16.mxu1 %v9722_v2 }
 0xf36   : > { %8901 = vmatpush3.bf16.msra.mxu1 %v9526_v43 }
 0xf37   : > { %8926 = vmatprep.subr.bf16.mxu1 %v9722_v2 }
 0xf39   : > { %8903 = vmatmul.mubr.bf16.vlgmr.msra.gmra.mxu1 %v5152_v47  ;;  %v9548_v47 = vld [vmem:[%s11898_s8 + $0x610] sm:$0xff]  }
 0xf3a   : > { %8927 = vmatpush3.bf16.msra.mxu1 %v9527_v45  ;;  %8942 = vmatprep.mubr.msk.bf16.mxu1 %vm9723_vm0, %v9722_v2  ;;  %v9547_v45 = vld [vmem:[%s11898_s8 + $0x618] sm:$0xff]  }
 0xf3b   : > { %8928 = vmatprep.subr.bf16.mxu1 %v9722_v2 }
 0xf3e   : > { %8929 = vmatpush3.bf16.msra.mxu1 %v9528_v63  ;;  %v9549_v63 = vld [vmem:[%s11898_s8 + $0x608] sm:$0xff]  }
 0xf3f   : > { %8930 = vmatprep.subr.bf16.mxu1 %v9722_v2 }
 0xf42   : > { %8931 = vmatpush3.bf16.msra.mxu1 %v9529_v6  ;;  %v5780_v6 = vrot.slane %v11047_v50, 2 }
 0xf43   : > { %8932 = vmatprep.subr.bf16.mxu1 %v9722_v2 }
 0xf44   : > { %v5781_v51 = vmul.f32 %v10357_v30, %v5780_v6 }
 0xf46   : > { %8933 = vmatpush3.bf16.msra.mxu1 %v9530_v61  ;;  %v9551_v61 = vld [vmem:[%s11898_s8 + $0x6b8] sm:$0xff]   ;;  %v5782_v1 = vpack.c.bf16 %v5781_v51, %v5781_v51 }
 0xf47   : > { %8934 = vmatprep.subr.bf16.mxu1 %v9722_v2 }
 0xf4a   : > { %8935 = vmatpush3.bf16.msra.mxu1 %v9531_v53 }
 0xf4b   : > { %8936 = vmatprep.subr.bf16.mxu1 %v9722_v2 }
 0xf4e   : > { %8937 = vmatpush3.bf16.msra.mxu1 %v9532_v57  ;;  %v9552_v57 = vld [vmem:[%s11898_s8 + $0x6b0] sm:$0xff]  }
 0xf4f   : > { %8938 = vmatprep.subr.bf16.mxu1 %v9722_v2 }
 0xf52   : > { %8939 = vmatpush3.bf16.msra.mxu1 %v9533_v59 }
 0xf53   : > { %8940 = vmatprep.subr.bf16.mxu1 %v9722_v2 }
 0xf56   : > { %8941 = vmatpush3.bf16.msra.mxu1 %v9534_v55 }
 0xf57   : > { %8966 = vmatprep.subr.bf16.mxu1 %v9722_v2 }
 0xf59   : > { %8943 = vmatmul.mubr.bf16.vlgmr.msra.gmra.mxu1 %v5348_v11  ;;  %v4119_v14 = vpop.f32.mrf.mxu1  ;;  %v4207_v15 = vpop.f32.mrf.mxu0  ;;  %v9555_v11 = vld [vmem:[%s11898_s8 + $0x698] sm:$0xff]  }
 0xf5a   : > { %v4208_v16 = vadd.f32 %v4207_v15, %v4119_v14  ;;  %8967 = vmatpush3.bf16.msra.mxu1 %v9535_v10  ;;  %8982 = vmatprep.mubr.msk.bf16.mxu1 %vm9723_vm0, %v9722_v2  ;;  %v9554_v10 = vld [vmem:[%s11898_s8 + $0x6a0] sm:$0xff]   ;;  %v9557_v14 = vld [vmem:[%s11898_s8 + $0x688] sm:$0xff]   ;;  %v5130_v15 = vrot.slane %v11047_v50, 4 }
 0xf5b   : > { %v8704_v18 = vpop.f32.mrf.mxu1  ;;  %v8724_v13 = vpop.f32.mrf.mxu0  ;;  %8968 = vmatprep.subr.bf16.mxu1 %v9722_v2 }
 0xf5c   : > { %v5131_v6 = vmul.f32 %v10126_v7, %v5130_v15  ;;  %v9577_v7 = vld [vmem:[%s11898_s8 + $0x568] sm:$0xff]  }
 0xf5d   : > { %v4122_v29 = vpop.f32.mrf.mxu1  ;;  %v4210_v5 = vpop.f32.mrf.mxu0 }
 0xf5e   : > { %8969 = vmatpush3.bf16.msra.mxu1 %v9536_v35  ;;  %v5998_v35 = vmul.f32 %v10404_v48, %v5130_v15  ;;  %v9584_v15 = vld [vmem:[%s11898_s8 + $0x5f0] sm:$0xff]  }
 0xf5f   : > { %v8705_v20 = vpop.f32.mrf.mxu1  ;;  %v8725_v21 = vpop.f32.mrf.mxu0  ;;  %8970 = vmatprep.subr.bf16.mxu1 %v9722_v2 }
 0xf60   : > { %v5999_v18 = vpack.c.bf16 %v5998_v35, %v5998_v35  ;;  %v9587_v35 = vld [vmem:[%s11898_s8 + $0x5d8] sm:$0xff]  }
 0xf62   : > { %8971 = vmatpush3.bf16.msra.mxu1 %v9537_v49 }
 0xf63   : > { %8972 = vmatprep.subr.bf16.mxu1 %v9722_v2 }
 0xf66   : > { %8973 = vmatpush3.bf16.msra.mxu1 %v9538_v22 }
 0xf67   : > { %8974 = vmatprep.subr.bf16.mxu1 %v9722_v2 }
 0xf6a   : > { %8975 = vmatpush3.bf16.msra.mxu1 %v9539_v24 }
 0xf6b   : > { %8976 = vmatprep.subr.bf16.mxu1 %v9722_v2 }
 0xf6e   : > { %8977 = vmatpush3.bf16.msra.mxu1 %v9540_v17 }
 0xf6f   : > { %8978 = vmatprep.subr.bf16.mxu1 %v9722_v2 }
 0xf72   : > { %8979 = vmatpush3.bf16.msra.mxu1 %v9541_v25 }
 0xf73   : > { %8980 = vmatprep.subr.bf16.mxu1 %v9722_v2 }
 0xf76   : > { %8981 = vmatpush3.bf16.msra.mxu1 %v9542_v26 }
 0xf77   : > { %9006 = vmatprep.subr.bf16.mxu1 %v9722_v2 }
 0xf79   : > { %v4315_v4 = vpop.f32.mrf.mxu1  ;;  %v4424_v32 = vpop.f32.mrf.mxu0  ;;  %8983 = vmatmul.mubr.bf16.vlgmr.msra.gmra.mxu1 %v5564_v28 }
 0xf7a   : > { %v4321_v33 = vadd.f32 %v4315_v4, %v4208_v16  ;;  %9007 = vmatpush3.bf16.msra.mxu1 %v9543_v27  ;;  %9022 = vmatprep.mubr.msk.bf16.mxu1 %vm9723_vm0, %v9722_v2  ;;  %v9558_v16 = vld [vmem:[%s11898_s8 + $0x680] sm:$0xff]  }
 0xf7b   : > { %v8744_v34 = vpop.f32.mrf.mxu1  ;;  %v8764_v54 = vpop.f32.mrf.mxu0  ;;  %9008 = vmatprep.subr.bf16.mxu1 %v9722_v2  ;;  %v7518_v27 = vld [vmem:[%s11899_s9 + $0x3] ss:$0 sm:$0xff] }
 0xf7c   : > { %v11461_v37 = vadd.f32 %v4424_v32, %v4321_v33  ;;  %v9567_v54 = vld [vmem:[%s11898_s8 + $0x4b8] sm:$0xff]  }
 0xf7d   : > { %v4318_v62 = vpop.f32.mrf.mxu1  ;;  %v4427_v40 = vpop.f32.mrf.mxu0 }
 0xf7e   : > { %9009 = vmatpush3.bf16.msra.mxu1 %v9544_v23  ;;  %v9569_v40 = vld [vmem:[%s11898_s8 + $0x4a8] sm:$0xff]  }
 0xf7f   : > { %v8745_v42 = vpop.f32.mrf.mxu1  ;;  %v8765_v43 = vpop.f32.mrf.mxu0  ;;  %9010 = vmatprep.subr.bf16.mxu1 %v9722_v2 }
 0xf80   : > { %v9571_v42 = vld [vmem:[%s11898_s8 + $0x498] sm:$0xff]   ;;  %v9572_v43 = vld [vmem:[%s11898_s8 + $0x490] sm:$0xff]  }
 0xf82   : > { %9011 = vmatpush3.bf16.msra.mxu1 %v9545_v41  ;;  %v9570_v41 = vld [vmem:[%s11898_s8 + $0x4a0] sm:$0xff]  }
 0xf83   : > { %9012 = vmatprep.subr.bf16.mxu1 %v9722_v2 }
 0xf86   : > { %9013 = vmatpush3.bf16.msra.mxu1 %v9546_v44  ;;  %v9573_v44 = vld [vmem:[%s11898_s8 + $0x488] sm:$0xff]  }
 0xf87   : > { %9014 = vmatprep.subr.bf16.mxu1 %v9722_v2 }
 0xf8a   : > { %9015 = vmatpush3.bf16.msra.mxu1 %v9547_v45 }
 0xf8b   : > { %9016 = vmatprep.subr.bf16.mxu1 %v9722_v2 }
 0xf8e   : > { %9017 = vmatpush3.bf16.msra.mxu1 %v9548_v47 }
 0xf8f   : > { %9018 = vmatprep.subr.bf16.mxu1 %v9722_v2 }
 0xf92   : > { %9019 = vmatpush3.bf16.msra.mxu1 %v9549_v63  ;;  %v9574_v63 = vld [vmem:[%s11898_s8 + $0x480] sm:$0xff]  }
 0xf93   : > { %9020 = vmatprep.subr.bf16.mxu1 %v9722_v2 }
 0xf96   : > { %9021 = vmatpush3.bf16.msra.mxu1 %v9550_v46 }
 0xf97   : > { %9046 = vmatprep.subr.bf16.mxu1 %v9722_v2 }
 0xf99   : > { %v4531_v53 = vpop.f32.mrf.mxu1  ;;  %v4640_v56 = vpop.f32.mrf.mxu0  ;;  %9023 = vmatmul.mubr.bf16.vlgmr.msra.gmra.mxu1 %v5782_v1  ;;  %v5132_v1 = vpack.c.bf16 %v5131_v6, %v5131_v6  ;;  %v9603_v6 = vld [vmem:[%s11900_s10 + $0x98] sm:$0xff]  }
 0xf9a   : > { %9047 = vmatpush3.bf16.msra.mxu1 %v9551_v61  ;;  %9062 = vmatprep.mubr.msk.bf16.mxu1 %vm9723_vm0, %v9722_v2  ;;  %v4537_v24 = vadd.f32 %v4531_v53, %v11461_v37  ;;  %v9568_v37 = vld [vmem:[%s11898_s8 + $0x4b0] sm:$0xff]   ;;  %v9575_v61 = vld [vmem:[%s11898_s8 + $0x578] sm:$0xff]  }
 0xf9b   : > { %v8784_v30 = vpop.f32.mrf.mxu1  ;;  %v8804_v58 = vpop.f32.mrf.mxu0  ;;  %9048 = vmatprep.subr.bf16.mxu1 %v9722_v2  ;;  %v9576_v53 = vld [vmem:[%s11898_s8 + $0x570] sm:$0xff]  }
 0xf9c   : > { %v4646_v17 = vadd.f32 %v4640_v56, %v4537_v24  ;;  %v9578_v56 = vld [vmem:[%s11898_s8 + $0x560] sm:$0xff]   ;;  %v9580_v30 = vld [vmem:[%s11898_s8 + $0x550] sm:$0xff]   ;;  %v9581_v58 = vld [vmem:[%s11898_s8 + $0x548] sm:$0xff]  }
 0xf9d   : > { %v4534_v59 = vpop.f32.mrf.mxu1  ;;  %v4643_v0 = vpop.f32.mrf.mxu0  ;;  %v9591_v24 = vld [vmem:[%s11898_s8 + $0x678] sm:$0xff]  }
 0xf9e   : > { %9049 = vmatpush3.bf16.msra.mxu1 %v9552_v57  ;;  %v9579_v57 = vld [vmem:[%s11898_s8 + $0x558] sm:$0xff]   ;;  %v5455_v59 = vrot.slane %v11047_v50, 7 }
 0xf9f   : > { %v8785_v55 = vpop.f32.mrf.mxu1  ;;  %v8805_v8 = vpop.f32.mrf.mxu0  ;;  %9050 = vmatprep.subr.bf16.mxu1 %v9722_v2 }
 0xfa0   : > { %v9582_v55 = vld [vmem:[%s11898_s8 + $0x540] sm:$0xff]   ;;  %v5456_v8 = vmul.f32 %v10204_v36, %v5455_v59  ;;  %v9585_v36 = vld [vmem:[%s11898_s8 + $0x5e8] sm:$0xff]  }
 0xfa1   : > { %v9606_v59 = vld [vmem:[%s11900_s10 + $0x80] sm:$0xff]  }
 0xfa2   : > { %9051 = vmatpush3.bf16.msra.mxu1 %v9553_v3 }
 0xfa3   : > { %9052 = vmatprep.subr.bf16.mxu1 %v9722_v2 }
 0xfa6   : > { %9053 = vmatpush3.bf16.msra.mxu1 %v9554_v10 }
 0xfa7   : > { %9054 = vmatprep.subr.bf16.mxu1 %v9722_v2 }
 0xfaa   : > { %9055 = vmatpush3.bf16.msra.mxu1 %v9555_v11 }
 0xfab   : > { %9056 = vmatprep.subr.bf16.mxu1 %v9722_v2 }
 0xfae   : > { %9057 = vmatpush3.bf16.msra.mxu1 %v9556_v12  ;;  %v9583_v12 = vld [vmem:[%s11898_s8 + $0x5f8] sm:$0xff]  }
 0xfaf   : > { %9058 = vmatprep.subr.bf16.mxu1 %v9722_v2 }
 0xfb2   : > { %9059 = vmatpush3.bf16.msra.mxu1 %v9557_v14  ;;  %v5457_v14 = vpack.c.bf16 %v5456_v8, %v5456_v8 }
 0xfb3   : > { %9060 = vmatprep.subr.bf16.mxu1 %v9722_v2 }
 0xfb6   : > { %9061 = vmatpush3.bf16.msra.mxu1 %v9558_v16  ;;  %v9586_v16 = vld [vmem:[%s11898_s8 + $0x5e0] sm:$0xff]  }
 0xfb7   : > { %9086 = vmatprep.subr.bf16.mxu1 %v9722_v2 }
 0xfb9   : > { %v4749_v13 = vpop.f32.mrf.mxu1  ;;  %v4858_v19 = vpop.f32.mrf.mxu0  ;;  %9063 = vmatmul.mubr.bf16.vlgmr.msra.gmra.mxu1 %v5999_v18  ;;  %v9588_v18 = vld [vmem:[%s11898_s8 + $0x5d0] sm:$0xff]  }
 0xfba   : > { %9102 = vmatprep.mubr.msk.bf16.mxu1 %vm9723_vm0, %v9722_v2  ;;  %v4755_v48 = vadd.f32 %v4749_v13, %v4646_v17  ;;  %v9589_v13 = vld [vmem:[%s11898_s8 + $0x5c8] sm:$0xff]  }
 0xfbb   : > { %v8824_v29 = vpop.f32.mrf.mxu1  ;;  %v8844_v5 = vpop.f32.mrf.mxu0 }
 0xfbc   : > { %v4864_v25 = vadd.f32 %v4858_v19, %v4755_v48  ;;  %v5671_v19 = vrot.slane %v11047_v50, 1  ;;  %v9592_v48 = vld [vmem:[%s11898_s8 + $0x670] sm:$0xff]  }
 0xfbd   : > { %v4752_v49 = vpop.f32.mrf.mxu1  ;;  %v4861_v20 = vpop.f32.mrf.mxu0 }
 0xfbe   : > { %v9590_v49 = vld [vmem:[%s11898_s8 + $0x5c0] sm:$0xff]   ;;  %v5672_v20 = vmul.f32 %v10279_v60, %v5671_v19  ;;  %v9593_v60 = vld [vmem:[%s11898_s8 + $0x668] sm:$0xff]  }
 0xfbf   : > { %v8825_v21 = vpop.f32.mrf.mxu1  ;;  %v8845_v22 = vpop.f32.mrf.mxu0 }
 0xfc0   : > { %v5673_v17 = vpack.c.bf16 %v5672_v20, %v5672_v20 }
 0xfd9   : > { %v4966_v26 = vpop.f32.mrf.mxu1 }
 0xfda   : > { %v4972_v28 = vadd.f32 %v4966_v26, %v4864_v25  ;;  %v9594_v25 = vld [vmem:[%s11898_s8 + $0x660] sm:$0xff]   ;;  %v9595_v26 = vld [vmem:[%s11898_s8 + $0x658] sm:$0xff]  }
 0xfdb   : > { %v8864_v4 = vpop.f32.mrf.mxu1 }
 0xfdc   : > { %v4981_v32 = vadd.f32 %v7518_v27, %v4972_v28  ;;  %v9596_v27 = vld [vmem:[%s11898_s8 + $0x650] sm:$0xff]   ;;  %v9597_v28 = vld [vmem:[%s11898_s8 + $0x648] sm:$0xff]   ;;  %v5889_v4 = vrot.slane %v11047_v50, 3 }
 0xfdd   : > { %v4969_v33 = vpop.f32.mrf.mxu1 }
 0xfde   : > { %v4982_v23 = vmax.f32 %v4981_v32, 0.0 }
 0xfdf   : > { %v8865_v34 = vpop.f32.mrf.mxu1 }
 0xfe0   : > { %v4983_v62 = vpack.c.bf16 %v4982_v23, %v4982_v23  ;;  %v9598_v23 = vld [vmem:[%s11898_s8 + $0x640] sm:$0xff]   ;;  %v5890_v34 = vmul.f32 %v10360_v31, %v5889_v4  ;;  %v9600_v31 = vld [vmem:[%s11900_s10 + $0xb0] sm:$0xff]  }
 0xfe2   : > { %8883 = vmatmul.mubr.bf16.vlgmr.msra.gmra.mxu0 %v4983_v62 }
 0xfe3   : > { %8907 = vmatpush3.bf16.msra.mxu0 %v9567_v54  ;;  %8922 = vmatprep.mubr.msk.bf16.mxu0 %vm9723_vm0, %v9722_v2 }
 0xfe4   : > { %8908 = vmatprep.subr.bf16.mxu0 %v9722_v2 }
 0xfe7   : > { %8909 = vmatpush3.bf16.msra.mxu0 %v9568_v37  ;;  %v5891_v37 = vpack.c.bf16 %v5890_v34, %v5890_v34  ;;  %v9609_v34 = vld [vmem:[%s11905_s15 + $0x28] sm:$0xff]  }
 0xfe8   : > { %8910 = vmatprep.subr.bf16.mxu0 %v9722_v2 }
 0xfeb   : > { %8911 = vmatpush3.bf16.msra.mxu0 %v9569_v40 }
 0xfec   : > { %8912 = vmatprep.subr.bf16.mxu0 %v9722_v2 }
 0xfef   : > { %8913 = vmatpush3.bf16.msra.mxu0 %v9570_v41 }
 0xff0   : > { %8914 = vmatprep.subr.bf16.mxu0 %v9722_v2 }
 0xff3   : > { %8915 = vmatpush3.bf16.msra.mxu0 %v9571_v42 }
 0xff4   : > { %8916 = vmatprep.subr.bf16.mxu0 %v9722_v2 }
 0xff7   : > { %8917 = vmatpush3.bf16.msra.mxu0 %v9572_v43 }
 0xff8   : > { %8918 = vmatprep.subr.bf16.mxu0 %v9722_v2 }
 0xff9   : > { %v11561_v45 = vpop.f32.mrf.mxu1 }
 0xffb   : > { %8919 = vmatpush3.bf16.msra.mxu0 %v9573_v44  ;;  %v8904_v47 = vpop.f32.mrf.mxu1  ;;  %v9599_v44 = vld [vmem:[%s11900_s10 + $0xb8] sm:$0xff]  }
 0xffc   : > { %8920 = vmatprep.subr.bf16.mxu0 %v9722_v2  ;;  %v9601_v47 = vld [vmem:[%s11900_s10 + $0xa8] sm:$0xff]  }
 0xffd   : > { %v5255_v46 = vpop.f32.mrf.mxu1 }
 0xffe   : > { %v7536_v46 = vld [vmem:[%s11901_s11 + $0x3] ss:$0 sm:$0xff] }
 0xfff   : > { %8921 = vmatpush3.bf16.msra.mxu0 %v9574_v63  ;;  %v8905_v51 = vpop.f32.mrf.mxu1  ;;  %v9602_v63 = vld [vmem:[%s11900_s10 + $0xa0] sm:$0xff]  }
0x1000   : > { %8946 = vmatprep.subr.bf16.mxu0 %v9722_v2  ;;  %v9604_v51 = vld [vmem:[%s11900_s10 + $0x90] sm:$0xff]  }
0x1002   : > { %8923 = vmatmul.mubr.bf16.vlgmr.msra.gmra.mxu0 %v5132_v1 }
0x1003   : > { %8947 = vmatpush3.bf16.msra.mxu0 %v9575_v61  ;;  %8962 = vmatprep.mubr.msk.bf16.mxu0 %vm9723_vm0, %v9722_v2 }
0x1004   : > { %8948 = vmatprep.subr.bf16.mxu0 %v9722_v2 }
0x1007   : > { %8949 = vmatpush3.bf16.msra.mxu0 %v9576_v53 }
0x1008   : > { %8950 = vmatprep.subr.bf16.mxu0 %v9722_v2 }
0x100b   : > { %8951 = vmatpush3.bf16.msra.mxu0 %v9577_v7  ;;  %v9605_v7 = vld [vmem:[%s11900_s10 + $0x88] sm:$0xff]  }
0x100c   : > { %8952 = vmatprep.subr.bf16.mxu0 %v9722_v2 }
0x100f   : > { %8953 = vmatpush3.bf16.msra.mxu0 %v9578_v56 }
0x1010   : > { %8954 = vmatprep.subr.bf16.mxu0 %v9722_v2 }
0x1013   : > { %8955 = vmatpush3.bf16.msra.mxu0 %v9579_v57 }
0x1014   : > { %8956 = vmatprep.subr.bf16.mxu0 %v9722_v2 }
0x1017   : > { %8957 = vmatpush3.bf16.msra.mxu0 %v9580_v30 }
0x1018   : > { %8958 = vmatprep.subr.bf16.mxu0 %v9722_v2 }
0x1019   : > { %v11599_v0 = vpop.f32.mrf.mxu1 }
0x101b   : > { %8959 = vmatpush3.bf16.msra.mxu0 %v9581_v58  ;;  %v8944_v3 = vpop.f32.mrf.mxu1 }
0x101c   : > { %8960 = vmatprep.subr.bf16.mxu0 %v9722_v2  ;;  %v9607_v3 = vld [vmem:[%s11905_s15 + $0x38] sm:$0xff]  }
0x101d   : > { %v5451_v10 = vpop.f32.mrf.mxu1  ;;  %9087 = vmatpush3.bf16.msra.mxu1 %v9607_v3  ;;  %v9615_v3 = vld [vmem:[%s11904_s14 + $0x38] sm:$0xff]  }
0x101e   : > { %9088 = vmatprep.subr.bf16.mxu1 %v9722_v2 }
0x101f   : > { %8961 = vmatpush3.bf16.msra.mxu0 %v9582_v55  ;;  %v8945_v11 = vpop.f32.mrf.mxu1 }
0x1020   : > { %8986 = vmatprep.subr.bf16.mxu0 %v9722_v2 }
0x1022   : > { %8963 = vmatmul.mubr.bf16.vlgmr.msra.gmra.mxu0 %v5457_v14 }
0x1023   : > { %8987 = vmatpush3.bf16.msra.mxu0 %v9583_v12  ;;  %9002 = vmatprep.mubr.msk.bf16.mxu0 %vm9723_vm0, %v9722_v2 }
0x1024   : > { %8988 = vmatprep.subr.bf16.mxu0 %v9722_v2 }
0x1027   : > { %8989 = vmatpush3.bf16.msra.mxu0 %v9584_v15 }
0x1028   : > { %8990 = vmatprep.subr.bf16.mxu0 %v9722_v2 }
0x102b   : > { %8991 = vmatpush3.bf16.msra.mxu0 %v9585_v36 }
0x102c   : > { %8992 = vmatprep.subr.bf16.mxu0 %v9722_v2 }
0x102f   : > { %8993 = vmatpush3.bf16.msra.mxu0 %v9586_v16 }
0x1030   : > { %8994 = vmatprep.subr.bf16.mxu0 %v9722_v2 }
0x1033   : > { %8995 = vmatpush3.bf16.msra.mxu0 %v9587_v35 }
0x1034   : > { %8996 = vmatprep.subr.bf16.mxu0 %v9722_v2 }
0x1037   : > { %8997 = vmatpush3.bf16.msra.mxu0 %v9588_v18 }
0x1038   : > { %8998 = vmatprep.subr.bf16.mxu0 %v9722_v2 }
0x1039   : > { %v11637_v29 = vpop.f32.mrf.mxu1 }
0x103b   : > { %8999 = vmatpush3.bf16.msra.mxu0 %v9589_v13  ;;  %v8984_v5 = vpop.f32.mrf.mxu1 }
0x103c   : > { %9000 = vmatprep.subr.bf16.mxu0 %v9722_v2 }
0x103d   : > { %v5667_v21 = vpop.f32.mrf.mxu1 }
0x103f   : > { %9001 = vmatpush3.bf16.msra.mxu0 %v9590_v49  ;;  %v8985_v22 = vpop.f32.mrf.mxu1 }
0x1040   : > { %9026 = vmatprep.subr.bf16.mxu0 %v9722_v2 }
0x1042   : > { %9003 = vmatmul.mubr.bf16.vlgmr.msra.gmra.mxu0 %v5673_v17  ;;  %v7766_v17 = vld [vmem:[%s11899_s9 + $0x2] ss:$0 sm:$0xff] }
0x1043   : > { %9027 = vmatpush3.bf16.msra.mxu0 %v9591_v24  ;;  %9042 = vmatprep.mubr.msk.bf16.mxu0 %vm9723_vm0, %v9722_v2 }
0x1044   : > { %9028 = vmatprep.subr.bf16.mxu0 %v9722_v2 }
0x1047   : > { %9029 = vmatpush3.bf16.msra.mxu0 %v9592_v48 }
0x1048   : > { %9030 = vmatprep.subr.bf16.mxu0 %v9722_v2 }
0x104b   : > { %9031 = vmatpush3.bf16.msra.mxu0 %v9593_v60 }
0x104c   : > { %9032 = vmatprep.subr.bf16.mxu0 %v9722_v2 }
0x104f   : > { %9033 = vmatpush3.bf16.msra.mxu0 %v9594_v25 }
0x1050   : > { %9034 = vmatprep.subr.bf16.mxu0 %v9722_v2 }
0x1053   : > { %9035 = vmatpush3.bf16.msra.mxu0 %v9595_v26 }
0x1054   : > { %9036 = vmatprep.subr.bf16.mxu0 %v9722_v2 }
0x1057   : > { %9037 = vmatpush3.bf16.msra.mxu0 %v9596_v27 }
0x1058   : > { %9038 = vmatprep.subr.bf16.mxu0 %v9722_v2 }
0x1059   : > { %v11675_v32 = vpop.f32.mrf.mxu1 }
0x105b   : > { %9039 = vmatpush3.bf16.msra.mxu0 %v9597_v28  ;;  %v9024_v33 = vpop.f32.mrf.mxu1 }
0x105c   : > { %9040 = vmatprep.subr.bf16.mxu0 %v9722_v2 }
0x105d   : > { %v5885_v54 = vpop.f32.mrf.mxu1 }
0x105e   : > { %v9610_v54 = vld [vmem:[%s11905_s15 + $0x20] sm:$0xff]  }
0x105f   : > { %9041 = vmatpush3.bf16.msra.mxu0 %v9598_v23  ;;  %v9025_v62 = vpop.f32.mrf.mxu1  ;;  %v9608_v23 = vld [vmem:[%s11905_s15 + $0x30] sm:$0xff]  }
0x1060   : > { %9066 = vmatprep.subr.bf16.mxu0 %v9722_v2  ;;  %9089 = vmatpush3.bf16.msra.mxu1 %v9608_v23  ;;  %v9611_v62 = vld [vmem:[%s11905_s15 + $0x18] sm:$0xff]  }
0x1061   : > { %9090 = vmatprep.subr.bf16.mxu1 %v9722_v2 }
0x1062   : > { %9043 = vmatmul.mubr.bf16.vlgmr.msra.gmra.mxu0 %v5891_v37  ;;  %v9612_v37 = vld [vmem:[%s11905_s15 + $0x10] sm:$0xff]  }
0x1063   : > { %9082 = vmatprep.mubr.msk.bf16.mxu0 %vm9723_vm0, %v9722_v2  ;;  %9067 = vmatpush3.bf16.msra.mxu0 %v9599_v44 }
0x1064   : > { %9068 = vmatprep.subr.bf16.mxu0 %v9722_v2  ;;  %9091 = vmatpush3.bf16.msra.mxu1 %v9609_v34  ;;  %v7813_v34 = vld [vmem:[%s11906_s16] ss:$0 sm:$0xff] }
0x1065   : > { %9092 = vmatprep.subr.bf16.mxu1 %v9722_v2 }
0x1067   : > { %9069 = vmatpush3.bf16.msra.mxu0 %v9600_v31 }
0x1068   : > { %9070 = vmatprep.subr.bf16.mxu0 %v9722_v2  ;;  %9093 = vmatpush3.bf16.msra.mxu1 %v9610_v54 }
0x1069   : > { %9094 = vmatprep.subr.bf16.mxu1 %v9722_v2 }
0x106b   : > { %9071 = vmatpush3.bf16.msra.mxu0 %v9601_v47  ;;  %v7546_v47 = vld [vmem:[%s11902_s12 + $0x3] ss:$0 sm:$0xff] }
0x106c   : > { %9072 = vmatprep.subr.bf16.mxu0 %v9722_v2  ;;  %9095 = vmatpush3.bf16.msra.mxu1 %v9611_v62 }
0x106d   : > { %9096 = vmatprep.subr.bf16.mxu1 %v9722_v2 }
0x106f   : > { %9073 = vmatpush3.bf16.msra.mxu0 %v9602_v63 }
0x1070   : > { %9074 = vmatprep.subr.bf16.mxu0 %v9722_v2  ;;  %9097 = vmatpush3.bf16.msra.mxu1 %v9612_v37 }
0x1071   : > { %9098 = vmatprep.subr.bf16.mxu1 %v9722_v2 }
0x1073   : > { %9075 = vmatpush3.bf16.msra.mxu0 %v9603_v6  ;;  %v7548_v6 = vld [vmem:[%s11903_s13 + $0x3] ss:$0 sm:$0xff] }
0x1074   : > { %9076 = vmatprep.subr.bf16.mxu0 %v9722_v2 }
0x1077   : > { %9077 = vmatpush3.bf16.msra.mxu0 %v9604_v51 }
0x1078   : > { %9078 = vmatprep.subr.bf16.mxu0 %v9722_v2 }
0x1079   : > { %v6099_v40 = vpop.f32.mrf.mxu1 }
0x107b   : > { %v9064_v41 = vpop.f32.mrf.mxu1  ;;  %9079 = vmatpush3.bf16.msra.mxu0 %v9605_v7 }
0x107c   : > { %9080 = vmatprep.subr.bf16.mxu0 %v9722_v2  ;;  %v9614_v41 = vld [vmem:[%s11905_s15] sm:$0xff]  }
0x107d   : > { %v6102_v42 = vpop.f32.mrf.mxu1 }
0x107f   : > { %v9065_v43 = vpop.f32.mrf.mxu1  ;;  %9081 = vmatpush3.bf16.msra.mxu0 %v9606_v59 }
0x1080   : > { %9106 = vmatprep.subr.bf16.mxu0 %v9722_v2 }
0x10a2   : > { %v5091_v61 = vpop.f32.mrf.mxu0 }
0x10a3   : > { %v5092_v1 = vadd.f32 %v7536_v46, %v5091_v61 }
0x10a4   : > { %v8884_v53 = vpop.f32.mrf.mxu0 }
0x10a5   : > { %v5097_v56 = vadd.f32 %v5092_v1, %v11049_v52  ;;  %v7784_v53 = vld [vmem:[%s11901_s11 + $0x2] ss:$0 sm:$0xff] }
0x10a6   : > { %v5094_v57 = vpop.f32.mrf.mxu0 }
0x10a7   : > { %v5098_v30 = vmul.f32 %v10811_v38, %v5097_v56 }
0x10a8   : > { %v8885_v58 = vpop.f32.mrf.mxu0 }
0x10a9   : > { %5099 = vadd.xlane.f32.xlu0 %v5098_v30 }
0x10c2   : > { %v5340_v52 = vpop.f32.mrf.mxu0 }
0x10c3   : > { %v5341_v13 = vadd.f32 %v5340_v52, %v11561_v45 }
0x10c4   : > { %v8924_v55 = vpop.f32.mrf.mxu0 }
0x10c5   : > { %v5454_v19 = vadd.f32 %v11599_v0, %v5341_v13  ;;  %v9622_v13 = vld [vmem:[%s11904_s14] sm:$0xff]  }
0x10c6   : > { %v5343_v8 = vpop.f32.mrf.mxu0 }
0x10c8   : > { %v8925_v10 = vpop.f32.mrf.mxu0 }
0x10e2   : > { %v5557_v11 = vpop.f32.mrf.mxu0 }
0x10e3   : > { %v5563_v5 = vadd.f32 %v5557_v11, %v5454_v19 }
0x10e4   : > { %v8964_v12 = vpop.f32.mrf.mxu0 }
0x10e5   : > { %v5670_v49 = vadd.f32 %v11637_v29, %v5563_v5  ;;  %v9617_v12 = vld [vmem:[%s11904_s14 + $0x28] sm:$0xff]   ;;  %v9623_v5 = vld [vmem:[%s11907_s17 + $0x38] sm:$0xff]  }
0x10e6   : > { %v5560_v14 = vpop.f32.mrf.mxu0 }
0x10e7   : > { %v9619_v14 = vld [vmem:[%s11904_s14 + $0x18] sm:$0xff]  }
0x10e8   : > { %v8965_v15 = vpop.f32.mrf.mxu0 }
0x10e9   : > { %v9620_v15 = vld [vmem:[%s11904_s14 + $0x10] sm:$0xff]  }
0x1102   : > { %v5773_v36 = vpop.f32.mrf.mxu0 }
0x1103   : > { %v5779_v20 = vadd.f32 %v5773_v36, %v5670_v49  ;;  %v9624_v49 = vld [vmem:[%s11907_s17 + $0x30] sm:$0xff]  }
0x1104   : > { %v9004_v16 = vpop.f32.mrf.mxu0 }
0x1105   : > { %v5888_v21 = vadd.f32 %v11675_v32, %v5779_v20  ;;  %v9625_v20 = vld [vmem:[%s11907_s17 + $0x28] sm:$0xff]  }
0x1106   : > { %v5776_v35 = vpop.f32.mrf.mxu0 }
0x1107   : > { %v9621_v35 = vld [vmem:[%s11904_s14 + $0x8] sm:$0xff]  }
0x1108   : > { %v9005_v18 = vpop.f32.mrf.mxu0 }
0x1122   : > { %v5991_v22 = vpop.f32.mrf.mxu0 }
0x1123   : > { %v5997_v24 = vadd.f32 %v5991_v22, %v5888_v21  ;;  %v9626_v21 = vld [vmem:[%s11907_s17 + $0x20] sm:$0xff]   ;;  %v9627_v22 = vld [vmem:[%s11907_s17 + $0x18] sm:$0xff]  }
0x1124   : > { %v9044_v48 = vpop.f32.mrf.mxu0 }
0x1125   : > { %v6105_v60 = vadd.f32 %v6099_v40, %v5997_v24  ;;  %v9613_v40 = vld [vmem:[%s11905_s15 + $0x8] sm:$0xff]   ;;  %v9628_v24 = vld [vmem:[%s11907_s17 + $0x10] sm:$0xff]  }
0x1126   : > { %v5994_v25 = vpop.f32.mrf.mxu0  ;;  %9099 = vmatpush3.bf16.msra.mxu1 %v9613_v40 }
0x1127   : > { %v6114_v26 = vadd.f32 %v7766_v17, %v6105_v60  ;;  %9100 = vmatprep.subr.bf16.mxu1 %v9722_v2 }
0x1128   : > { %v9045_v27 = vpop.f32.mrf.mxu0 }
0x1129   : > { %v6115_v45 = vmax.f32 %v6114_v26, 0.0  ;;  %v7794_v26 = vld [vmem:[%s11902_s12 + $0x2] ss:$0 sm:$0xff] }
0x112a   : > { %9101 = vmatpush3.bf16.msra.mxu1 %v9614_v41 }
0x112b   : > { %v6116_v28 = vpack.c.bf16 %v6115_v45, %v6115_v45  ;;  %9126 = vmatprep.subr.bf16.mxu1 %v9722_v2  ;;  %v7796_v45 = vld [vmem:[%s11903_s13 + $0x2] ss:$0 sm:$0xff] }
0x112d   : > { %9083 = vmatmul.mubr.bf16.vlgmr.msra.gmra.mxu0 %v6116_v28 }
0x112e   : > { %9122 = vmatprep.mubr.msk.bf16.mxu0 %vm9723_vm0, %v9722_v2  ;;  %9107 = vmatpush3.bf16.msra.mxu0 %v9615_v3 }
0x112f   : > { %9108 = vmatprep.subr.bf16.mxu0 %v9722_v2 }
0x1132   : > { %v5100_v0 = vpop.xlane.xlu0 %5099 }
0x1133   : > { %v5101_v29 = vmul.f32 0.03125, %v5100_v0 }
0x1135   : > { %v5102_v4 = vsub.f32 %v5097_v56, %v5101_v29 }
0x1137   : > { %v5103_v32 = vmul.f32 %v10811_v38, %v5102_v4 }
0x1139   : > { %v5104_v33 = vmul.f32 %v5103_v32, %v5103_v32 }
0x113b   : > { %5105 = vadd.xlane.f32.xlu0 %v5104_v33  ;;  %v9630_v33 = vld [vmem:[%s11907_s17] sm:$0xff]  }
0x11c4   : > { %v5106_v42 = vpop.xlane.xlu0 %5105 }
0x11c5   : > { %v5107_v43 = vmul.f32 0.03125, %v5106_v42 }
0x11c7   : > { %v5108_v44 = vadd.f32 1e-05, %v5107_v43  ;;  %v7814_v43 = vld [vmem:[#allocation2] ss:$0 sm:$0xff] }
0x11c9   : > { %9651 = vrsqrt.f32 %v5108_v44 }
0x11d6   : > { %v9652_v31 = vpop.eup %9651 }
0x11d7   : > { %v5110_v63 = vmul.f32 %v9652_v31, %v5103_v32  ;;  %v9629_v32 = vld [vmem:[%s11907_s17 + $0x8] sm:$0xff]  }
0x11d9   : > { %v5119_v46 = vmul.f32 %v7546_v47, %v5110_v63 }
0x11db   : > { %v5128_v51 = vadd.f32 %v7548_v6, %v5119_v46 }
0x11dd   : > { %v11771_v61 = vadd.f32 %v5128_v51, %v10923_v9 }
0x11df   : > { %v6280_v1 = vpack.c.bf16 %v11771_v61, %v11771_v61 }
0x11e1   : > { %9103 = vmatmul.mubr.bf16.vlgmr.msra.gmra.mxu1 %v6280_v1 }
0x11e2   : > { %9142 = vmatprep.mubr.msk.bf16.mxu1 %vm9723_vm0, %v9722_v2  ;;  %9127 = vmatpush3.bf16.msra.mxu1 %v9623_v5 }
0x11e3   : > { %9128 = vmatprep.subr.bf16.mxu1 %v9722_v2 }
0x11e6   : > { %9129 = vmatpush3.bf16.msra.mxu1 %v9624_v49 }
0x11e7   : > { %9130 = vmatprep.subr.bf16.mxu1 %v9722_v2 }
0x11ea   : > { %9131 = vmatpush3.bf16.msra.mxu1 %v9625_v20 }
0x11eb   : > { %9132 = vmatprep.subr.bf16.mxu1 %v9722_v2 }
0x11ed   : > { %v6224_v7 = vpop.f32.mrf.mxu0 }
0x11ee   : > { %v6225_v56 = vadd.f32 %v7784_v53, %v6224_v7  ;;  %9133 = vmatpush3.bf16.msra.mxu1 %v9626_v21 }
0x11ef   : > { %v9084_v57 = vpop.f32.mrf.mxu0  ;;  %9134 = vmatprep.subr.bf16.mxu1 %v9722_v2 }
0x11f0   : > { %v6230_v30 = vadd.f32 %v6225_v56, %v11047_v50  ;;  %v9616_v50 = vld [vmem:[%s11904_s14 + $0x30] sm:$0xff]  }
0x11f1   : > { %v6227_v58 = vpop.f32.mrf.mxu0  ;;  %9109 = vmatpush3.bf16.msra.mxu0 %v9616_v50 }
0x11f2   : > { %v6231_v9 = vmul.f32 %v10811_v38, %v6230_v30  ;;  %9110 = vmatprep.subr.bf16.mxu0 %v9722_v2  ;;  %9135 = vmatpush3.bf16.msra.mxu1 %v9627_v22 }
0x11f3   : > { %v9085_v59 = vpop.f32.mrf.mxu0  ;;  %9136 = vmatprep.subr.bf16.mxu1 %v9722_v2 }
0x11f4   : > { %6232 = vadd.xlane.f32.xlu1 %v6231_v9 }
0x11f5   : > { %9111 = vmatpush3.bf16.msra.mxu0 %v9617_v12 }
0x11f6   : > { %9112 = vmatprep.subr.bf16.mxu0 %v9722_v2  ;;  %9137 = vmatpush3.bf16.msra.mxu1 %v9628_v24 }
0x11f7   : > { %9138 = vmatprep.subr.bf16.mxu1 %v9722_v2 }
0x11fa   : > { %9139 = vmatpush3.bf16.msra.mxu1 %v9629_v32 }
0x11fb   : > { %9140 = vmatprep.subr.bf16.mxu1 %v9722_v2 }
0x11fe   : > { %9141 = vmatpush3.bf16.msra.mxu1 %v9630_v33 }
0x127d   : > { %v6233_v52 = vpop.xlane.xlu1 %6232 }
0x127e   : > { %v6234_v55 = vmul.f32 0.03125, %v6233_v52 }
0x1280   : > { %v6235_v8 = vsub.f32 %v6230_v30, %v6234_v55 }
0x1282   : > { %v6236_v10 = vmul.f32 %v10811_v38, %v6235_v8  ;;  %v9618_v38 = vld [vmem:[%s11904_s14 + $0x20] sm:$0xff]  }
0x1283   : > { %9113 = vmatpush3.bf16.msra.mxu0 %v9618_v38 }
0x1284   : > { %v6237_v11 = vmul.f32 %v6236_v10, %v6236_v10  ;;  %9114 = vmatprep.subr.bf16.mxu0 %v9722_v2 }
0x1286   : > { %6238 = vadd.xlane.f32.xlu1 %v6237_v11 }
0x1287   : > { %9115 = vmatpush3.bf16.msra.mxu0 %v9619_v14 }
0x1288   : > { %9116 = vmatprep.subr.bf16.mxu0 %v9722_v2 }
0x128b   : > { %9117 = vmatpush3.bf16.msra.mxu0 %v9620_v15 }
0x128c   : > { %9118 = vmatprep.subr.bf16.mxu0 %v9722_v2 }
0x128f   : > { %9119 = vmatpush3.bf16.msra.mxu0 %v9621_v35 }
0x1290   : > { %9120 = vmatprep.subr.bf16.mxu0 %v9722_v2 }
0x1293   : > { %9121 = vmatpush3.bf16.msra.mxu0 %v9622_v13 }
0x12a1   : > { %v6379_v36 = vpop.f32.mrf.mxu1 }
0x12a3   : > { %v9104_v16 = vpop.f32.mrf.mxu1 }
0x12a5   : > { %v6382_v18 = vpop.f32.mrf.mxu1 }
0x12a7   : > { %v9105_v19 = vpop.f32.mrf.mxu1 }
0x130f   : > { %v6239_v17 = vpop.xlane.xlu1 %6238 }
0x1310   : > { %v6240_v48 = vmul.f32 0.03125, %v6239_v17 }
0x1312   : > { %v6241_v60 = vadd.f32 1e-05, %v6240_v48 }
0x1314   : > { %9653 = vrsqrt.f32 %v6241_v60 }
0x1321   : > { %v9654_v25 = vpop.eup %9653 }
0x1322   : > { %v6243_v27 = vmul.f32 %v9654_v25, %v6236_v10 }
0x1324   : > { %v6252_v28 = vmul.f32 %v7794_v26, %v6243_v27 }
0x1326   : > { %v6261_v0 = vadd.f32 %v7796_v45, %v6252_v28 }
0x1328   : > { %v6262_v29 = vadd.f32 %v6261_v0, %v10955_v39 }
0x132a   : > { %v6263_v4 = vpack.c.bf16 %v6262_v29, %v6262_v29 }
0x132c   : > { %9123 = vmatmul.mubr.bf16.vlgmr.msra.gmra.mxu0 %v6263_v4 }
0x13ec   : > { %v6467_v23 = vpop.f32.mrf.mxu0 }
0x13ed   : > { %v6468_v39 = vadd.f32 %v6467_v23, %v6379_v36 }
0x13ee   : > { %v9124_v54 = vpop.f32.mrf.mxu0 }
0x13ef   : > { %v6480_v62 = vadd.f32 %v7813_v34, %v6468_v39 }
0x13f0   : > { %v6470_v37 = vpop.f32.mrf.mxu0 }
0x13f1   : > { %v6481_v40 = vmax.f32 %v6480_v62, 0.0 }
0x13f2   : > { %v9125_v41 = vpop.f32.mrf.mxu0 }
0x13f3   : > { %v6482_v42 = vpack.c.bf16 %v6481_v40, %v6481_v40 }
0x13f5   : > { %9143 = vmatmul.mubr.bf16.vlgmr.msra.gmra.mxu1 %v6482_v42 }
0x14b5   : > { %v6588_v2 = vpop.f32.mrf.mxu1 }
0x14b6   : > { %v6589_v44 = vadd.f32 %v7814_v43, %v6588_v2 }
0x14b7   : > { %v9144_v31 = vpop.f32.mrf.mxu1 }
0x14b8   : > { %v6594_v47 = vsub.f32 0.0, %v6589_v44 }
0x14b9   : > { %v6591_v63 = vpop.f32.mrf.mxu1 }
0x14ba   : > { %v6595_v6 = vmul.f32 1.442695, %v6594_v47 }
0x14bb   : > { %v9145_v46 = vpop.f32.mrf.mxu1 }
0x14bc   : > { %9655 = vpow2.f32 %v6595_v6 }
0x14c9   : > { %v9656_v51 = vpop.eup %9655 }
0x14ca   : > { %v6597_v1 = vadd.f32 1.0, %v9656_v51 }
0x14cc   : > { %9657 = vrcp.f32 %v6597_v1 }
0x14d9   : > { %v9658_v53 = vpop.eup %9657 }
0x14da   : > { %6602 = vperm.xlu0 %9188, %v9658_v53   ;;  %v6606_v7 = vsub.f32 1.0, %v9658_v53 }
0x14dc   : > { %6609 = vperm.xlu1 %9189, %v6606_v7  }
0x1555   : > { %v6603_v56 = vpop.permute.xlu0 %6602 }
0x1556   : > { %v6605_v30 = vmul.f32 %v6603_v56, %v6262_v29 }
0x1557   : > { %v6610_v57 = vpop.permute.xlu1 %6609 }
0x1558   : > { %v6612_v58 = vmul.f32 %v6610_v57, %v11771_v61 }
0x155a   : > { %v6613_v9 = vadd.f32 %v6612_v58, %v6605_v30 }
0x155c   : > { %6614 = vst [vmem:[%s632_s25] sm:$0xff] %v6613_v9 }
0x155d   : > { %9673 = shalt.err (!%p9670_p3)
}
0x155e   : > { %s9674_s24 = scalar_lea.hbm %s6627_s3, 128  ;;  %s9678_s0 = scalar_lea.hbm %s11909_s19, 512 }
0x155f   : > { %p9675_p4 = scmp.ne.s32.totalorder %s6627_s3, %s9674_s24  ;;  %p9679_p9 = scmp.lt.s32.totalorder %s6627_s3, %s11909_s19 }
0x1560   : > { %p9680_p10 = scmp.lt.s32.totalorder %s9678_s0, %s9674_s24 }
0x1561   : > { %p9676_p7 = pnand %p9675_p4, %p9867_p5 }
0x1562   : > { %p9681_p11 = por %p9680_p10, %p9679_p9 }
0x1563   : > { %p9677_p8 = pneg %p9676_p7 }
0x1565   : > { %p9682_p12 = pnand %p9681_p11, %p9677_p8 }
0x1567   : > { %9685 = shalt.err (!%p9682_p12)
}
0x1568   : > { %9146 = dma.vmem_to_hbm [thread:$0]  (%p9867_p5), %s6630_s28, 128, %s6627_s3, %s6616_s20  }
0x1569 PF: > { %s11934_s29 = sld [smem:[#allocation8_spill]] }
0x156a   : > { %s11935_s4 = sld [smem:[#allocation6_spill]] }
0x156f   : > { %p9152_p13 = scmp.ge.s32.totalorder %s11934_s29, 2 }
0x1570   : > { %s6641_s23 = sand.u32 1, %s11935_s4  }
0x1571   : > { %p9149_p0 = pnand %p9152_p13, %p9871_p6  ;;  %s6642_s18 = scalar_lea.sflag [#allocation4], %s6641_s23 }
0x1573   : > { %p9150_p1 = pneg %p9149_p0 }
0x1575   : > { %9703 = dma.done.wait (%p9150_p1), %s6642_s18, 128  }
0x1576   : > { %9705 = vsyncadd (%p9150_p1), %s6642_s18, 4294967168  ;;  %s11937_s22 = sld [smem:[#allocation9_spill]]  ;;  %s11940_s20 = smov %s9712_s21 }
0x1577   : > { %s11938_s2 = sld [smem:[#allocation7_spill]] }
0x1578   : > { %s11939_s1 = sld [smem:[#allocation10_spill]] }
0x157c   : > { %p31_p2 = scmp.ge.s32.totalorder %s11937_s22, 6  }
0x157d   : > { %s11941_s21 = smov %s11938_s2 }
0x157e   :  { %33 = sbr.rel (!%p31_p2) target bundleno = 9 (0x9), region = 192 }
0x1583   :  { %6647 = vsyncpa [#allocation4], 1 }
0x1584   :  { %6649 = vsyncpa [#allocation4 + $0x1], 1 }

</bundles_post_ra>
